<compile_context>
chip_gen: v7x
topology: tpu7x:2x2x1
jax: 0.10.0
libtpu: 0.0.40
codegen_flags: <defaults>
</compile_context>

<pallas_src>
import math
import functools

import jax
import jax.numpy as jnp
from jax.experimental import pallas as pl
from jax.experimental.pallas import tpu as pltpu

NUM_BLOCKS = 3
LN_EPS = 1e-5   # PyTorch nn.LayerNorm default eps

PARAM_ORDER = ("wq", "bq", "wk", "bk", "wv", "bv", "wo", "bo",
               "g1", "be1", "w1", "bf1", "w2", "bf2", "g2", "be2")
MATMUL_WEIGHTS = ("wq", "wk", "wv", "wo", "w1", "w2")


def _layernorm(x, gamma, beta):
    mean = jnp.mean(x, axis=-1, keepdims=True)
    var = jnp.mean((x - mean) ** 2, axis=-1, keepdims=True)
    return (x - mean) * jax.lax.rsqrt(var + LN_EPS) * gamma + beta


def lemma_encoder_kernel(num_heads,
                         x_ref,
                         wq_ref, bq_ref, wk_ref, bk_ref, wv_ref, bv_ref,
                         wo_ref, bo_ref, g1_ref, be1_ref,
                         w1_ref, bf1_ref, w2_ref, bf2_ref, g2_ref, be2_ref,
                         out_ref):
    BC, S, D = x_ref.shape
    H = num_heads
    hd = D // H
    R = BC * S
    scale = 1.0 / math.sqrt(hd)

    # (BC, S, D) -> (BC*S, D): layout-preserving when S % 8 == 0; all linear
    # layers below run with M = BC*S rows on the MXU.
    x = x_ref[...].astype(jnp.float32).reshape(R, D)

    for blk in range(NUM_BLOCKS):          # static unroll over 3 encoder blocks
        xb = x.astype(jnp.bfloat16)        # bf16 MXU operands, f32 accumulation
        q = jnp.dot(xb, wq_ref[blk], preferred_element_type=jnp.float32) + bq_ref[blk]
        k = jnp.dot(xb, wk_ref[blk], preferred_element_type=jnp.float32) + bk_ref[blk]
        v = jnp.dot(xb, wv_ref[blk], preferred_element_type=jnp.float32) + bv_ref[blk]

        q3 = q.reshape(BC, S, D)
        k3 = k.reshape(BC, S, D)
        v3 = v.reshape(BC, S, D)

        # Multi-head self-attention (source_mask = None): true per-head
        # matmuls on static lane slices, batch handled by a batched einsum.
        head_outs = []
        for h in range(H):                 # static unroll over heads
            sl = slice(h * hd, (h + 1) * hd)
            qh = q3[:, :, sl].astype(jnp.bfloat16)
            kh = k3[:, :, sl].astype(jnp.bfloat16)
            vh = v3[:, :, sl].astype(jnp.bfloat16)
            s = jnp.einsum('bqd,bkd->bqk', qh, kh,
                           preferred_element_type=jnp.float32) * scale
            s = s - jnp.max(s, axis=-1, keepdims=True)
            p = jnp.exp(s)
            p = p * pl.reciprocal(jnp.sum(p, axis=-1, keepdims=True), approx=True)
            head_outs.append(
                jnp.einsum('bqk,bkd->bqd', p.astype(jnp.bfloat16), vh,
                           preferred_element_type=jnp.float32))
        attn = jnp.concatenate(head_outs, axis=-1).reshape(R, D)

        attn = jnp.dot(attn.astype(jnp.bfloat16), wo_ref[blk],
                       preferred_element_type=jnp.float32) + bo_ref[blk]
        # residual + LayerNorm (post-LN block); dropout == identity (eval)
        x = _layernorm(x + attn, g1_ref[blk], be1_ref[blk])

        # position-wise feed-forward: Linear -> ReLU -> Linear
        h1 = jnp.dot(x.astype(jnp.bfloat16), w1_ref[blk],
                     preferred_element_type=jnp.float32) + bf1_ref[blk]
        h1 = jnp.maximum(h1, 0.0)
        h2 = jnp.dot(h1.astype(jnp.bfloat16), w2_ref[blk],
                     preferred_element_type=jnp.float32) + bf2_ref[blk]
        x = _layernorm(x + h2, g2_ref[blk], be2_ref[blk])

    out_ref[...] = x.reshape(BC, S, D).astype(out_ref.dtype)


def sinusoidal_pe(seq_len, embed_dim):
    pos = jnp.arange(seq_len, dtype=jnp.float32)[:, None]
    i = jnp.arange(0, embed_dim, 2, dtype=jnp.float32)[None, :]
    div = jnp.exp(-i * (math.log(10000.0) / embed_dim))
    pe = jnp.zeros((seq_len, embed_dim), jnp.float32)
    pe = pe.at[:, 0::2].set(jnp.sin(pos * div))
    pe = pe.at[:, 1::2].set(jnp.cos(pos * div))
    return pe


def init_params(key, vocab_size, embed_dim, ffn_dim):
    ks = jax.random.split(key, 8)
    n = lambda k, shape: 0.02 * jax.random.normal(k, shape, jnp.float32)
    D, F = embed_dim, ffn_dim
    params = {
        "embedding": n(ks[0], (vocab_size, D)),
        "wq": n(ks[1], (NUM_BLOCKS, D, D)), "bq": jnp.zeros((NUM_BLOCKS, 1, D), jnp.float32),
        "wk": n(ks[2], (NUM_BLOCKS, D, D)), "bk": jnp.zeros((NUM_BLOCKS, 1, D), jnp.float32),
        "wv": n(ks[3], (NUM_BLOCKS, D, D)), "bv": jnp.zeros((NUM_BLOCKS, 1, D), jnp.float32),
        "wo": n(ks[4], (NUM_BLOCKS, D, D)), "bo": jnp.zeros((NUM_BLOCKS, 1, D), jnp.float32),
        "g1": jnp.ones((NUM_BLOCKS, 1, D), jnp.float32),
        "be1": jnp.zeros((NUM_BLOCKS, 1, D), jnp.float32),
        "w1": n(ks[5], (NUM_BLOCKS, D, F)), "bf1": jnp.zeros((NUM_BLOCKS, 1, F), jnp.float32),
        "w2": n(ks[6], (NUM_BLOCKS, F, D)), "bf2": jnp.zeros((NUM_BLOCKS, 1, D), jnp.float32),
        "g2": jnp.ones((NUM_BLOCKS, 1, D), jnp.float32),
        "be2": jnp.zeros((NUM_BLOCKS, 1, D), jnp.float32),
    }
    return params


def lemma_encoder(tokens, params, *, num_heads, target_rows=256):
    B, S = tokens.shape
    D = params["embedding"].shape[1]
    assert D % num_heads == 0, "embed_dim must be divisible by num_heads"

    # Embedding gather (data-dependent) + positional encoding are glue done in
    # plain JAX; the add fuses into the gather. Dropout == identity (eval).
    x = jnp.take(params["embedding"], tokens, axis=0) + sinusoidal_pe(S, D)[None]
    x = x.astype(jnp.float32)

    # Batch chunk: each grid step processes ~target_rows rows (BC*S) so the
    # MXU M dimension is filled; grid stays parallel for megacore (v7x).
    bc = max(1, min(B, target_rows // max(S, 1)))
    while B % bc:
        bc -= 1
    grid = (B // bc,)

    weights = []
    for name in PARAM_ORDER:
        w = params[name]
        if name in MATMUL_WEIGHTS:
            w = w.astype(jnp.bfloat16)   # bf16 MXU operands, halved VMEM/DMA
        weights.append(w)

    def full_spec(shape):
        return pl.BlockSpec(shape, lambda b, _n=len(shape): (0,) * _n)

    # NOTE(v7x): at large D/F, single-buffer the constant-index weight specs
    # (pipeline_mode=pl.Buffered(1)) or stage weights via pl.ANY so the fully
    # resident weight stack fits the 64 MiB VMEM budget.
    in_specs = ([pl.BlockSpec((bc, S, D), lambda b: (b, 0, 0))]
                + [full_spec(w.shape) for w in weights])

    kernel = functools.partial(lemma_encoder_kernel, num_heads)
    return pl.pallas_call(
        kernel,
        out_shape=jax.ShapeDtypeStruct((B, S, D), jnp.float32),
        grid=grid,
        in_specs=in_specs,
        out_specs=pl.BlockSpec((bc, S, D), lambda b: (b, 0, 0)),
        compiler_params=pltpu.CompilerParams(
            dimension_semantics=("parallel",),
            vmem_limit_bytes=48 * 1024 * 1024),
    )(x, *weights)


if __name__ == "__main__":
    vocab_size = 50
    embed_dim = 32
    num_heads = 4
    ffn_dim = 4 * embed_dim
    batch, seq = 2, 8

    key = jax.random.PRNGKey(0)
    k_params, k_tok = jax.random.split(key)
    params = init_params(k_params, vocab_size, embed_dim, ffn_dim)
    tokens = jax.random.randint(k_tok, (batch, seq), 0, vocab_size, dtype=jnp.int32)

    out = lemma_encoder(tokens, params, num_heads=num_heads)
    out = jax.block_until_ready(out)
    assert out.shape == (batch, seq, embed_dim)
    assert bool(jnp.all(jnp.isfinite(out)))
    print("KERNEL_OK")
</pallas_src>

<mosaic_0001>
module attributes {stable_mosaic.version = 11 : i64} {
  func.func @lemma_encoder_kernel(%arg0: i32, %arg1: memref<2x8x32xf32, #tpu.memory_space<vmem>>, %arg2: memref<3x32x32xbf16, #tpu.memory_space<vmem>>, %arg3: memref<3x1x32xf32, #tpu.memory_space<vmem>>, %arg4: memref<3x32x32xbf16, #tpu.memory_space<vmem>>, %arg5: memref<3x1x32xf32, #tpu.memory_space<vmem>>, %arg6: memref<3x32x32xbf16, #tpu.memory_space<vmem>>, %arg7: memref<3x1x32xf32, #tpu.memory_space<vmem>>, %arg8: memref<3x32x32xbf16, #tpu.memory_space<vmem>>, %arg9: memref<3x1x32xf32, #tpu.memory_space<vmem>>, %arg10: memref<3x1x32xf32, #tpu.memory_space<vmem>>, %arg11: memref<3x1x32xf32, #tpu.memory_space<vmem>>, %arg12: memref<3x32x128xbf16, #tpu.memory_space<vmem>>, %arg13: memref<3x1x128xf32, #tpu.memory_space<vmem>>, %arg14: memref<3x128x32xbf16, #tpu.memory_space<vmem>>, %arg15: memref<3x1x32xf32, #tpu.memory_space<vmem>>, %arg16: memref<3x1x32xf32, #tpu.memory_space<vmem>>, %arg17: memref<3x1x32xf32, #tpu.memory_space<vmem>>, %arg18: memref<2x8x32xf32, #tpu.memory_space<vmem>>) attributes {dimension_semantics = [#tpu.dimension_semantics<parallel>], iteration_bounds = array<i64: 1>, scalar_prefetch = 0 : i64, scratch_operands = 0 : i64, tpu.core_type = #tpu.core_type<tc>, window_params = [{transform_indices = @transform_0, window_bounds = array<i64: 2, 8, 32>}, {pipeline_mode = #tpu.pipeline_mode<synchronous>, transform_indices = @transform_1, window_bounds = array<i64: 3, 32, 32>}, {pipeline_mode = #tpu.pipeline_mode<synchronous>, transform_indices = @transform_2, window_bounds = array<i64: 3, 1, 32>}, {pipeline_mode = #tpu.pipeline_mode<synchronous>, transform_indices = @transform_3, window_bounds = array<i64: 3, 32, 32>}, {pipeline_mode = #tpu.pipeline_mode<synchronous>, transform_indices = @transform_4, window_bounds = array<i64: 3, 1, 32>}, {pipeline_mode = #tpu.pipeline_mode<synchronous>, transform_indices = @transform_5, window_bounds = array<i64: 3, 32, 32>}, {pipeline_mode = #tpu.pipeline_mode<synchronous>, transform_indices = @transform_6, window_bounds = array<i64: 3, 1, 32>}, {pipeline_mode = #tpu.pipeline_mode<synchronous>, transform_indices = @transform_7, window_bounds = array<i64: 3, 32, 32>}, {pipeline_mode = #tpu.pipeline_mode<synchronous>, transform_indices = @transform_8, window_bounds = array<i64: 3, 1, 32>}, {pipeline_mode = #tpu.pipeline_mode<synchronous>, transform_indices = @transform_9, window_bounds = array<i64: 3, 1, 32>}, {pipeline_mode = #tpu.pipeline_mode<synchronous>, transform_indices = @transform_10, window_bounds = array<i64: 3, 1, 32>}, {pipeline_mode = #tpu.pipeline_mode<synchronous>, transform_indices = @transform_11, window_bounds = array<i64: 3, 32, 128>}, {pipeline_mode = #tpu.pipeline_mode<synchronous>, transform_indices = @transform_12, window_bounds = array<i64: 3, 1, 128>}, {pipeline_mode = #tpu.pipeline_mode<synchronous>, transform_indices = @transform_13, window_bounds = array<i64: 3, 128, 32>}, {pipeline_mode = #tpu.pipeline_mode<synchronous>, transform_indices = @transform_14, window_bounds = array<i64: 3, 1, 32>}, {pipeline_mode = #tpu.pipeline_mode<synchronous>, transform_indices = @transform_15, window_bounds = array<i64: 3, 1, 32>}, {pipeline_mode = #tpu.pipeline_mode<synchronous>, transform_indices = @transform_16, window_bounds = array<i64: 3, 1, 32>}, {transform_indices = @transform_17, window_bounds = array<i64: 2, 8, 32>}]} {
    %c0 = arith.constant 0 : index
    %c0_0 = arith.constant 0 : index
    %c0_1 = arith.constant 0 : index
    %0 = vector.load %arg1[%c0, %c0_0, %c0_1] : memref<2x8x32xf32, #tpu.memory_space<vmem>>, vector<2x8x32xf32>
    %1 = vector.shape_cast %0 : vector<2x8x32xf32> to vector<16x32xf32>
    %2 = arith.truncf %1 : vector<16x32xf32> to vector<16x32xbf16>
    %c0_2 = arith.constant 0 : index
    %c0_3 = arith.constant 0 : index
    %c0_4 = arith.constant 0 : index
    %3 = vector.load %arg2[%c0_2, %c0_3, %c0_4] : memref<3x32x32xbf16, #tpu.memory_space<vmem>>, vector<1x32x32xbf16>
    %4 = vector.shape_cast %3 : vector<1x32x32xbf16> to vector<32x32xbf16>
    %cst = arith.constant dense<0.000000e+00> : vector<16x32xf32>
    %5 = tpu.matmul %2, %4, %cst {dimension_numbers = #tpu.dot_dimension_numbers<[1], [0], [0], [1], [0, 0, 1, 1], [], []>} : vector<16x32xbf16>, vector<32x32xbf16>, vector<16x32xf32> -> vector<16x32xf32>
    %c0_5 = arith.constant 0 : index
    %c0_6 = arith.constant 0 : index
    %c0_7 = arith.constant 0 : index
    %6 = vector.load %arg3[%c0_5, %c0_6, %c0_7] : memref<3x1x32xf32, #tpu.memory_space<vmem>>, vector<1x1x32xf32>
    %7 = vector.shape_cast %6 : vector<1x1x32xf32> to vector<1x32xf32>
    %8 = vector.broadcast %7 : vector<1x32xf32> to vector<16x32xf32>
    %9 = arith.addf %5, %8 : vector<16x32xf32>
    %c0_8 = arith.constant 0 : index
    %c0_9 = arith.constant 0 : index
    %c0_10 = arith.constant 0 : index
    %10 = vector.load %arg4[%c0_8, %c0_9, %c0_10] : memref<3x32x32xbf16, #tpu.memory_space<vmem>>, vector<1x32x32xbf16>
    %11 = vector.shape_cast %10 : vector<1x32x32xbf16> to vector<32x32xbf16>
    %cst_11 = arith.constant dense<0.000000e+00> : vector<16x32xf32>
    %12 = tpu.matmul %2, %11, %cst_11 {dimension_numbers = #tpu.dot_dimension_numbers<[1], [0], [0], [1], [0, 0, 1, 1], [], []>} : vector<16x32xbf16>, vector<32x32xbf16>, vector<16x32xf32> -> vector<16x32xf32>
    %c0_12 = arith.constant 0 : index
    %c0_13 = arith.constant 0 : index
    %c0_14 = arith.constant 0 : index
    %13 = vector.load %arg5[%c0_12, %c0_13, %c0_14] : memref<3x1x32xf32, #tpu.memory_space<vmem>>, vector<1x1x32xf32>
    %14 = vector.shape_cast %13 : vector<1x1x32xf32> to vector<1x32xf32>
    %15 = vector.broadcast %14 : vector<1x32xf32> to vector<16x32xf32>
    %16 = arith.addf %12, %15 : vector<16x32xf32>
    %c0_15 = arith.constant 0 : index
    %c0_16 = arith.constant 0 : index
    %c0_17 = arith.constant 0 : index
    %17 = vector.load %arg6[%c0_15, %c0_16, %c0_17] : memref<3x32x32xbf16, #tpu.memory_space<vmem>>, vector<1x32x32xbf16>
    %18 = vector.shape_cast %17 : vector<1x32x32xbf16> to vector<32x32xbf16>
    %cst_18 = arith.constant dense<0.000000e+00> : vector<16x32xf32>
    %19 = tpu.matmul %2, %18, %cst_18 {dimension_numbers = #tpu.dot_dimension_numbers<[1], [0], [0], [1], [0, 0, 1, 1], [], []>} : vector<16x32xbf16>, vector<32x32xbf16>, vector<16x32xf32> -> vector<16x32xf32>
    %c0_19 = arith.constant 0 : index
    %c0_20 = arith.constant 0 : index
    %c0_21 = arith.constant 0 : index
    %20 = vector.load %arg7[%c0_19, %c0_20, %c0_21] : memref<3x1x32xf32, #tpu.memory_space<vmem>>, vector<1x1x32xf32>
    %21 = vector.shape_cast %20 : vector<1x1x32xf32> to vector<1x32xf32>
    %22 = vector.broadcast %21 : vector<1x32xf32> to vector<16x32xf32>
    %23 = arith.addf %19, %22 : vector<16x32xf32>
    %24 = vector.shape_cast %9 : vector<16x32xf32> to vector<2x8x32xf32>
    %25 = vector.shape_cast %16 : vector<16x32xf32> to vector<2x8x32xf32>
    %26 = vector.shape_cast %23 : vector<16x32xf32> to vector<2x8x32xf32>
    %27 = vector.extract_strided_slice %24 {offsets = [0, 0, 0], sizes = [2, 8, 8], strides = [1, 1, 1]} : vector<2x8x32xf32> to vector<2x8x8xf32>
    %28 = arith.truncf %27 : vector<2x8x8xf32> to vector<2x8x8xbf16>
    %29 = vector.extract_strided_slice %25 {offsets = [0, 0, 0], sizes = [2, 8, 8], strides = [1, 1, 1]} : vector<2x8x32xf32> to vector<2x8x8xf32>
    %30 = arith.truncf %29 : vector<2x8x8xf32> to vector<2x8x8xbf16>
    %31 = vector.extract_strided_slice %26 {offsets = [0, 0, 0], sizes = [2, 8, 8], strides = [1, 1, 1]} : vector<2x8x32xf32> to vector<2x8x8xf32>
    %32 = arith.truncf %31 : vector<2x8x8xf32> to vector<2x8x8xbf16>
    "tpu.trace_start"() <{level = 10 : i32, message = "bqd,bkd->bqk"}> : () -> ()
    %cst_22 = arith.constant dense<0.000000e+00> : vector<2x8x8xf32>
    %33 = tpu.matmul %28, %30, %cst_22 {dimension_numbers = #tpu.dot_dimension_numbers<[2], [2], [1], [1], [0, 0, 0, 1, 1, 1], [0], [0]>} : vector<2x8x8xbf16>, vector<2x8x8xbf16>, vector<2x8x8xf32> -> vector<2x8x8xf32>
    "tpu.trace_stop"() : () -> ()
    %cst_23 = arith.constant 0.353553385 : f32
    %34 = vector.broadcast %cst_23 : f32 to vector<2x8x8xf32>
    %35 = arith.mulf %33, %34 : vector<2x8x8xf32>
    %cst_24 = arith.constant dense<0xFF800000> : vector<2x8xf32>
    %36 = vector.multi_reduction <maximumf>, %35, %cst_24 [2] : vector<2x8x8xf32> to vector<2x8xf32>
    %37 = vector.shape_cast %36 : vector<2x8xf32> to vector<2x8x1xf32>
    %38 = vector.broadcast %37 : vector<2x8x1xf32> to vector<2x8x8xf32>
    %39 = arith.subf %35, %38 : vector<2x8x8xf32>
    %40 = math.exp %39 : vector<2x8x8xf32>
    %cst_25 = arith.constant dense<0.000000e+00> : vector<2x8xf32>
    %41 = vector.multi_reduction <add>, %40, %cst_25 [2] : vector<2x8x8xf32> to vector<2x8xf32>
    %42 = vector.shape_cast %41 : vector<2x8xf32> to vector<2x8x1xf32>
    %43 = tpu.reciprocal %42 {approx = true} : vector<2x8x1xf32> -> vector<2x8x1xf32>
    %44 = vector.broadcast %43 : vector<2x8x1xf32> to vector<2x8x8xf32>
    %45 = arith.mulf %40, %44 : vector<2x8x8xf32>
    %46 = arith.truncf %45 : vector<2x8x8xf32> to vector<2x8x8xbf16>
    "tpu.trace_start"() <{level = 10 : i32, message = "bqk,bkd->bqd"}> : () -> ()
    %cst_26 = arith.constant dense<0.000000e+00> : vector<2x8x8xf32>
    %47 = tpu.matmul %46, %32, %cst_26 {dimension_numbers = #tpu.dot_dimension_numbers<[2], [1], [1], [2], [0, 0, 0, 1, 1, 2], [0], [0]>} : vector<2x8x8xbf16>, vector<2x8x8xbf16>, vector<2x8x8xf32> -> vector<2x8x8xf32>
    "tpu.trace_stop"() : () -> ()
    %48 = vector.extract_strided_slice %24 {offsets = [0, 0, 8], sizes = [2, 8, 8], strides = [1, 1, 1]} : vector<2x8x32xf32> to vector<2x8x8xf32>
    %49 = arith.truncf %48 : vector<2x8x8xf32> to vector<2x8x8xbf16>
    %50 = vector.extract_strided_slice %25 {offsets = [0, 0, 8], sizes = [2, 8, 8], strides = [1, 1, 1]} : vector<2x8x32xf32> to vector<2x8x8xf32>
    %51 = arith.truncf %50 : vector<2x8x8xf32> to vector<2x8x8xbf16>
    %52 = vector.extract_strided_slice %26 {offsets = [0, 0, 8], sizes = [2, 8, 8], strides = [1, 1, 1]} : vector<2x8x32xf32> to vector<2x8x8xf32>
    %53 = arith.truncf %52 : vector<2x8x8xf32> to vector<2x8x8xbf16>
    "tpu.trace_start"() <{level = 10 : i32, message = "bqd,bkd->bqk"}> : () -> ()
    %cst_27 = arith.constant dense<0.000000e+00> : vector<2x8x8xf32>
    %54 = tpu.matmul %49, %51, %cst_27 {dimension_numbers = #tpu.dot_dimension_numbers<[2], [2], [1], [1], [0, 0, 0, 1, 1, 1], [0], [0]>} : vector<2x8x8xbf16>, vector<2x8x8xbf16>, vector<2x8x8xf32> -> vector<2x8x8xf32>
    "tpu.trace_stop"() : () -> ()
    %cst_28 = arith.constant 0.353553385 : f32
    %55 = vector.broadcast %cst_28 : f32 to vector<2x8x8xf32>
    %56 = arith.mulf %54, %55 : vector<2x8x8xf32>
    %cst_29 = arith.constant dense<0xFF800000> : vector<2x8xf32>
    %57 = vector.multi_reduction <maximumf>, %56, %cst_29 [2] : vector<2x8x8xf32> to vector<2x8xf32>
    %58 = vector.shape_cast %57 : vector<2x8xf32> to vector<2x8x1xf32>
    %59 = vector.broadcast %58 : vector<2x8x1xf32> to vector<2x8x8xf32>
    %60 = arith.subf %56, %59 : vector<2x8x8xf32>
    %61 = math.exp %60 : vector<2x8x8xf32>
    %cst_30 = arith.constant dense<0.000000e+00> : vector<2x8xf32>
    %62 = vector.multi_reduction <add>, %61, %cst_30 [2] : vector<2x8x8xf32> to vector<2x8xf32>
    %63 = vector.shape_cast %62 : vector<2x8xf32> to vector<2x8x1xf32>
    %64 = tpu.reciprocal %63 {approx = true} : vector<2x8x1xf32> -> vector<2x8x1xf32>
    %65 = vector.broadcast %64 : vector<2x8x1xf32> to vector<2x8x8xf32>
    %66 = arith.mulf %61, %65 : vector<2x8x8xf32>
    %67 = arith.truncf %66 : vector<2x8x8xf32> to vector<2x8x8xbf16>
    "tpu.trace_start"() <{level = 10 : i32, message = "bqk,bkd->bqd"}> : () -> ()
    %cst_31 = arith.constant dense<0.000000e+00> : vector<2x8x8xf32>
    %68 = tpu.matmul %67, %53, %cst_31 {dimension_numbers = #tpu.dot_dimension_numbers<[2], [1], [1], [2], [0, 0, 0, 1, 1, 2], [0], [0]>} : vector<2x8x8xbf16>, vector<2x8x8xbf16>, vector<2x8x8xf32> -> vector<2x8x8xf32>
    "tpu.trace_stop"() : () -> ()
    %69 = vector.extract_strided_slice %24 {offsets = [0, 0, 16], sizes = [2, 8, 8], strides = [1, 1, 1]} : vector<2x8x32xf32> to vector<2x8x8xf32>
    %70 = arith.truncf %69 : vector<2x8x8xf32> to vector<2x8x8xbf16>
    %71 = vector.extract_strided_slice %25 {offsets = [0, 0, 16], sizes = [2, 8, 8], strides = [1, 1, 1]} : vector<2x8x32xf32> to vector<2x8x8xf32>
    %72 = arith.truncf %71 : vector<2x8x8xf32> to vector<2x8x8xbf16>
    %73 = vector.extract_strided_slice %26 {offsets = [0, 0, 16], sizes = [2, 8, 8], strides = [1, 1, 1]} : vector<2x8x32xf32> to vector<2x8x8xf32>
    %74 = arith.truncf %73 : vector<2x8x8xf32> to vector<2x8x8xbf16>
    "tpu.trace_start"() <{level = 10 : i32, message = "bqd,bkd->bqk"}> : () -> ()
    %cst_32 = arith.constant dense<0.000000e+00> : vector<2x8x8xf32>
    %75 = tpu.matmul %70, %72, %cst_32 {dimension_numbers = #tpu.dot_dimension_numbers<[2], [2], [1], [1], [0, 0, 0, 1, 1, 1], [0], [0]>} : vector<2x8x8xbf16>, vector<2x8x8xbf16>, vector<2x8x8xf32> -> vector<2x8x8xf32>
    "tpu.trace_stop"() : () -> ()
    %cst_33 = arith.constant 0.353553385 : f32
    %76 = vector.broadcast %cst_33 : f32 to vector<2x8x8xf32>
    %77 = arith.mulf %75, %76 : vector<2x8x8xf32>
    %cst_34 = arith.constant dense<0xFF800000> : vector<2x8xf32>
    %78 = vector.multi_reduction <maximumf>, %77, %cst_34 [2] : vector<2x8x8xf32> to vector<2x8xf32>
    %79 = vector.shape_cast %78 : vector<2x8xf32> to vector<2x8x1xf32>
    %80 = vector.broadcast %79 : vector<2x8x1xf32> to vector<2x8x8xf32>
    %81 = arith.subf %77, %80 : vector<2x8x8xf32>
    %82 = math.exp %81 : vector<2x8x8xf32>
    %cst_35 = arith.constant dense<0.000000e+00> : vector<2x8xf32>
    %83 = vector.multi_reduction <add>, %82, %cst_35 [2] : vector<2x8x8xf32> to vector<2x8xf32>
    %84 = vector.shape_cast %83 : vector<2x8xf32> to vector<2x8x1xf32>
    %85 = tpu.reciprocal %84 {approx = true} : vector<2x8x1xf32> -> vector<2x8x1xf32>
    %86 = vector.broadcast %85 : vector<2x8x1xf32> to vector<2x8x8xf32>
    %87 = arith.mulf %82, %86 : vector<2x8x8xf32>
    %88 = arith.truncf %87 : vector<2x8x8xf32> to vector<2x8x8xbf16>
    "tpu.trace_start"() <{level = 10 : i32, message = "bqk,bkd->bqd"}> : () -> ()
    %cst_36 = arith.constant dense<0.000000e+00> : vector<2x8x8xf32>
    %89 = tpu.matmul %88, %74, %cst_36 {dimension_numbers = #tpu.dot_dimension_numbers<[2], [1], [1], [2], [0, 0, 0, 1, 1, 2], [0], [0]>} : vector<2x8x8xbf16>, vector<2x8x8xbf16>, vector<2x8x8xf32> -> vector<2x8x8xf32>
    "tpu.trace_stop"() : () -> ()
    %90 = vector.extract_strided_slice %24 {offsets = [0, 0, 24], sizes = [2, 8, 8], strides = [1, 1, 1]} : vector<2x8x32xf32> to vector<2x8x8xf32>
    %91 = arith.truncf %90 : vector<2x8x8xf32> to vector<2x8x8xbf16>
    %92 = vector.extract_strided_slice %25 {offsets = [0, 0, 24], sizes = [2, 8, 8], strides = [1, 1, 1]} : vector<2x8x32xf32> to vector<2x8x8xf32>
    %93 = arith.truncf %92 : vector<2x8x8xf32> to vector<2x8x8xbf16>
    %94 = vector.extract_strided_slice %26 {offsets = [0, 0, 24], sizes = [2, 8, 8], strides = [1, 1, 1]} : vector<2x8x32xf32> to vector<2x8x8xf32>
    %95 = arith.truncf %94 : vector<2x8x8xf32> to vector<2x8x8xbf16>
    "tpu.trace_start"() <{level = 10 : i32, message = "bqd,bkd->bqk"}> : () -> ()
    %cst_37 = arith.constant dense<0.000000e+00> : vector<2x8x8xf32>
    %96 = tpu.matmul %91, %93, %cst_37 {dimension_numbers = #tpu.dot_dimension_numbers<[2], [2], [1], [1], [0, 0, 0, 1, 1, 1], [0], [0]>} : vector<2x8x8xbf16>, vector<2x8x8xbf16>, vector<2x8x8xf32> -> vector<2x8x8xf32>
    "tpu.trace_stop"() : () -> ()
    %cst_38 = arith.constant 0.353553385 : f32
    %97 = vector.broadcast %cst_38 : f32 to vector<2x8x8xf32>
    %98 = arith.mulf %96, %97 : vector<2x8x8xf32>
    %cst_39 = arith.constant dense<0xFF800000> : vector<2x8xf32>
    %99 = vector.multi_reduction <maximumf>, %98, %cst_39 [2] : vector<2x8x8xf32> to vector<2x8xf32>
    %100 = vector.shape_cast %99 : vector<2x8xf32> to vector<2x8x1xf32>
    %101 = vector.broadcast %100 : vector<2x8x1xf32> to vector<2x8x8xf32>
    %102 = arith.subf %98, %101 : vector<2x8x8xf32>
    %103 = math.exp %102 : vector<2x8x8xf32>
    %cst_40 = arith.constant dense<0.000000e+00> : vector<2x8xf32>
    %104 = vector.multi_reduction <add>, %103, %cst_40 [2] : vector<2x8x8xf32> to vector<2x8xf32>
    %105 = vector.shape_cast %104 : vector<2x8xf32> to vector<2x8x1xf32>
    %106 = tpu.reciprocal %105 {approx = true} : vector<2x8x1xf32> -> vector<2x8x1xf32>
    %107 = vector.broadcast %106 : vector<2x8x1xf32> to vector<2x8x8xf32>
    %108 = arith.mulf %103, %107 : vector<2x8x8xf32>
    %109 = arith.truncf %108 : vector<2x8x8xf32> to vector<2x8x8xbf16>
    "tpu.trace_start"() <{level = 10 : i32, message = "bqk,bkd->bqd"}> : () -> ()
    %cst_41 = arith.constant dense<0.000000e+00> : vector<2x8x8xf32>
    %110 = tpu.matmul %109, %95, %cst_41 {dimension_numbers = #tpu.dot_dimension_numbers<[2], [1], [1], [2], [0, 0, 0, 1, 1, 2], [0], [0]>} : vector<2x8x8xbf16>, vector<2x8x8xbf16>, vector<2x8x8xf32> -> vector<2x8x8xf32>
    "tpu.trace_stop"() : () -> ()
    %111 = tpu.concatenate %47, %68, %89, %110 in 2 : vector<2x8x8xf32>, vector<2x8x8xf32>, vector<2x8x8xf32>, vector<2x8x8xf32> -> vector<2x8x32xf32>
    %112 = vector.shape_cast %111 : vector<2x8x32xf32> to vector<16x32xf32>
    %113 = arith.truncf %112 : vector<16x32xf32> to vector<16x32xbf16>
    %c0_42 = arith.constant 0 : index
    %c0_43 = arith.constant 0 : index
    %c0_44 = arith.constant 0 : index
    %114 = vector.load %arg8[%c0_42, %c0_43, %c0_44] : memref<3x32x32xbf16, #tpu.memory_space<vmem>>, vector<1x32x32xbf16>
    %115 = vector.shape_cast %114 : vector<1x32x32xbf16> to vector<32x32xbf16>
    %cst_45 = arith.constant dense<0.000000e+00> : vector<16x32xf32>
    %116 = tpu.matmul %113, %115, %cst_45 {dimension_numbers = #tpu.dot_dimension_numbers<[1], [0], [0], [1], [0, 0, 1, 1], [], []>} : vector<16x32xbf16>, vector<32x32xbf16>, vector<16x32xf32> -> vector<16x32xf32>
    %c0_46 = arith.constant 0 : index
    %c0_47 = arith.constant 0 : index
    %c0_48 = arith.constant 0 : index
    %117 = vector.load %arg9[%c0_46, %c0_47, %c0_48] : memref<3x1x32xf32, #tpu.memory_space<vmem>>, vector<1x1x32xf32>
    %118 = vector.shape_cast %117 : vector<1x1x32xf32> to vector<1x32xf32>
    %119 = vector.broadcast %118 : vector<1x32xf32> to vector<16x32xf32>
    %120 = arith.addf %116, %119 : vector<16x32xf32>
    %121 = arith.addf %1, %120 : vector<16x32xf32>
    %c0_49 = arith.constant 0 : index
    %c0_50 = arith.constant 0 : index
    %c0_51 = arith.constant 0 : index
    %122 = vector.load %arg10[%c0_49, %c0_50, %c0_51] : memref<3x1x32xf32, #tpu.memory_space<vmem>>, vector<1x1x32xf32>
    %123 = vector.shape_cast %122 : vector<1x1x32xf32> to vector<1x32xf32>
    %c0_52 = arith.constant 0 : index
    %c0_53 = arith.constant 0 : index
    %c0_54 = arith.constant 0 : index
    %124 = vector.load %arg11[%c0_52, %c0_53, %c0_54] : memref<3x1x32xf32, #tpu.memory_space<vmem>>, vector<1x1x32xf32>
    %125 = vector.shape_cast %124 : vector<1x1x32xf32> to vector<1x32xf32>
    %cst_55 = arith.constant dense<0.000000e+00> : vector<16xf32>
    %126 = vector.multi_reduction <add>, %121, %cst_55 [1] : vector<16x32xf32> to vector<16xf32>
    %127 = vector.shape_cast %126 : vector<16xf32> to vector<16x1xf32>
    %cst_56 = arith.constant 3.200000e+01 : f32
    %128 = vector.broadcast %cst_56 : f32 to vector<16x1xf32>
    %129 = arith.divf %127, %128 : vector<16x1xf32>
    %130 = vector.broadcast %129 : vector<16x1xf32> to vector<16x32xf32>
    %131 = arith.subf %121, %130 : vector<16x32xf32>
    %132 = arith.mulf %131, %131 : vector<16x32xf32>
    %cst_57 = arith.constant dense<0.000000e+00> : vector<16xf32>
    %133 = vector.multi_reduction <add>, %132, %cst_57 [1] : vector<16x32xf32> to vector<16xf32>
    %134 = vector.shape_cast %133 : vector<16xf32> to vector<16x1xf32>
    %cst_58 = arith.constant 3.200000e+01 : f32
    %135 = vector.broadcast %cst_58 : f32 to vector<16x1xf32>
    %136 = arith.divf %134, %135 : vector<16x1xf32>
    %137 = vector.broadcast %129 : vector<16x1xf32> to vector<16x32xf32>
    %138 = arith.subf %121, %137 : vector<16x32xf32>
    %cst_59 = arith.constant 9.99999974E-6 : f32
    %139 = vector.broadcast %cst_59 : f32 to vector<16x1xf32>
    %140 = arith.addf %136, %139 : vector<16x1xf32>
    %141 = math.rsqrt %140 : vector<16x1xf32>
    %142 = vector.broadcast %141 : vector<16x1xf32> to vector<16x32xf32>
    %143 = arith.mulf %138, %142 : vector<16x32xf32>
    %144 = vector.broadcast %123 : vector<1x32xf32> to vector<16x32xf32>
    %145 = arith.mulf %143, %144 : vector<16x32xf32>
    %146 = vector.broadcast %125 : vector<1x32xf32> to vector<16x32xf32>
    %147 = arith.addf %145, %146 : vector<16x32xf32>
    %148 = arith.truncf %147 : vector<16x32xf32> to vector<16x32xbf16>
    %c0_60 = arith.constant 0 : index
    %c0_61 = arith.constant 0 : index
    %c0_62 = arith.constant 0 : index
    %149 = vector.load %arg12[%c0_60, %c0_61, %c0_62] : memref<3x32x128xbf16, #tpu.memory_space<vmem>>, vector<1x32x128xbf16>
    %150 = vector.shape_cast %149 : vector<1x32x128xbf16> to vector<32x128xbf16>
    %cst_63 = arith.constant dense<0.000000e+00> : vector<16x128xf32>
    %151 = tpu.matmul %148, %150, %cst_63 {dimension_numbers = #tpu.dot_dimension_numbers<[1], [0], [0], [1], [0, 0, 1, 1], [], []>} : vector<16x32xbf16>, vector<32x128xbf16>, vector<16x128xf32> -> vector<16x128xf32>
    %c0_64 = arith.constant 0 : index
    %c0_65 = arith.constant 0 : index
    %c0_66 = arith.constant 0 : index
    %152 = vector.load %arg13[%c0_64, %c0_65, %c0_66] : memref<3x1x128xf32, #tpu.memory_space<vmem>>, vector<1x1x128xf32>
    %153 = vector.shape_cast %152 : vector<1x1x128xf32> to vector<1x128xf32>
    %154 = vector.broadcast %153 : vector<1x128xf32> to vector<16x128xf32>
    %155 = arith.addf %151, %154 : vector<16x128xf32>
    %cst_67 = arith.constant 0.000000e+00 : f32
    %156 = vector.broadcast %cst_67 : f32 to vector<16x128xf32>
    %157 = arith.maximumf %155, %156 : vector<16x128xf32>
    %158 = arith.truncf %157 : vector<16x128xf32> to vector<16x128xbf16>
    %c0_68 = arith.constant 0 : index
    %c0_69 = arith.constant 0 : index
    %c0_70 = arith.constant 0 : index
    %159 = vector.load %arg14[%c0_68, %c0_69, %c0_70] : memref<3x128x32xbf16, #tpu.memory_space<vmem>>, vector<1x128x32xbf16>
    %160 = vector.shape_cast %159 : vector<1x128x32xbf16> to vector<128x32xbf16>
    %cst_71 = arith.constant dense<0.000000e+00> : vector<16x32xf32>
    %161 = tpu.matmul %158, %160, %cst_71 {dimension_numbers = #tpu.dot_dimension_numbers<[1], [0], [0], [1], [0, 0, 1, 1], [], []>} : vector<16x128xbf16>, vector<128x32xbf16>, vector<16x32xf32> -> vector<16x32xf32>
    %c0_72 = arith.constant 0 : index
    %c0_73 = arith.constant 0 : index
    %c0_74 = arith.constant 0 : index
    %162 = vector.load %arg15[%c0_72, %c0_73, %c0_74] : memref<3x1x32xf32, #tpu.memory_space<vmem>>, vector<1x1x32xf32>
    %163 = vector.shape_cast %162 : vector<1x1x32xf32> to vector<1x32xf32>
    %164 = vector.broadcast %163 : vector<1x32xf32> to vector<16x32xf32>
    %165 = arith.addf %161, %164 : vector<16x32xf32>
    %166 = arith.addf %147, %165 : vector<16x32xf32>
    %c0_75 = arith.constant 0 : index
    %c0_76 = arith.constant 0 : index
    %c0_77 = arith.constant 0 : index
    %167 = vector.load %arg16[%c0_75, %c0_76, %c0_77] : memref<3x1x32xf32, #tpu.memory_space<vmem>>, vector<1x1x32xf32>
    %168 = vector.shape_cast %167 : vector<1x1x32xf32> to vector<1x32xf32>
    %c0_78 = arith.constant 0 : index
    %c0_79 = arith.constant 0 : index
    %c0_80 = arith.constant 0 : index
    %169 = vector.load %arg17[%c0_78, %c0_79, %c0_80] : memref<3x1x32xf32, #tpu.memory_space<vmem>>, vector<1x1x32xf32>
    %170 = vector.shape_cast %169 : vector<1x1x32xf32> to vector<1x32xf32>
    %cst_81 = arith.constant dense<0.000000e+00> : vector<16xf32>
    %171 = vector.multi_reduction <add>, %166, %cst_81 [1] : vector<16x32xf32> to vector<16xf32>
    %172 = vector.shape_cast %171 : vector<16xf32> to vector<16x1xf32>
    %cst_82 = arith.constant 3.200000e+01 : f32
    %173 = vector.broadcast %cst_82 : f32 to vector<16x1xf32>
    %174 = arith.divf %172, %173 : vector<16x1xf32>
    %175 = vector.broadcast %174 : vector<16x1xf32> to vector<16x32xf32>
    %176 = arith.subf %166, %175 : vector<16x32xf32>
    %177 = arith.mulf %176, %176 : vector<16x32xf32>
    %cst_83 = arith.constant dense<0.000000e+00> : vector<16xf32>
    %178 = vector.multi_reduction <add>, %177, %cst_83 [1] : vector<16x32xf32> to vector<16xf32>
    %179 = vector.shape_cast %178 : vector<16xf32> to vector<16x1xf32>
    %cst_84 = arith.constant 3.200000e+01 : f32
    %180 = vector.broadcast %cst_84 : f32 to vector<16x1xf32>
    %181 = arith.divf %179, %180 : vector<16x1xf32>
    %182 = vector.broadcast %174 : vector<16x1xf32> to vector<16x32xf32>
    %183 = arith.subf %166, %182 : vector<16x32xf32>
    %cst_85 = arith.constant 9.99999974E-6 : f32
    %184 = vector.broadcast %cst_85 : f32 to vector<16x1xf32>
    %185 = arith.addf %181, %184 : vector<16x1xf32>
    %186 = math.rsqrt %185 : vector<16x1xf32>
    %187 = vector.broadcast %186 : vector<16x1xf32> to vector<16x32xf32>
    %188 = arith.mulf %183, %187 : vector<16x32xf32>
    %189 = vector.broadcast %168 : vector<1x32xf32> to vector<16x32xf32>
    %190 = arith.mulf %188, %189 : vector<16x32xf32>
    %191 = vector.broadcast %170 : vector<1x32xf32> to vector<16x32xf32>
    %192 = arith.addf %190, %191 : vector<16x32xf32>
    %193 = arith.truncf %192 : vector<16x32xf32> to vector<16x32xbf16>
    %c1 = arith.constant 1 : index
    %c0_86 = arith.constant 0 : index
    %c0_87 = arith.constant 0 : index
    %194 = vector.load %arg2[%c1, %c0_86, %c0_87] : memref<3x32x32xbf16, #tpu.memory_space<vmem>>, vector<1x32x32xbf16>
    %195 = vector.shape_cast %194 : vector<1x32x32xbf16> to vector<32x32xbf16>
    %cst_88 = arith.constant dense<0.000000e+00> : vector<16x32xf32>
    %196 = tpu.matmul %193, %195, %cst_88 {dimension_numbers = #tpu.dot_dimension_numbers<[1], [0], [0], [1], [0, 0, 1, 1], [], []>} : vector<16x32xbf16>, vector<32x32xbf16>, vector<16x32xf32> -> vector<16x32xf32>
    %c1_89 = arith.constant 1 : index
    %c0_90 = arith.constant 0 : index
    %c0_91 = arith.constant 0 : index
    %197 = vector.load %arg3[%c1_89, %c0_90, %c0_91] : memref<3x1x32xf32, #tpu.memory_space<vmem>>, vector<1x1x32xf32>
    %198 = vector.shape_cast %197 : vector<1x1x32xf32> to vector<1x32xf32>
    %199 = vector.broadcast %198 : vector<1x32xf32> to vector<16x32xf32>
    %200 = arith.addf %196, %199 : vector<16x32xf32>
    %c1_92 = arith.constant 1 : index
    %c0_93 = arith.constant 0 : index
    %c0_94 = arith.constant 0 : index
    %201 = vector.load %arg4[%c1_92, %c0_93, %c0_94] : memref<3x32x32xbf16, #tpu.memory_space<vmem>>, vector<1x32x32xbf16>
    %202 = vector.shape_cast %201 : vector<1x32x32xbf16> to vector<32x32xbf16>
    %cst_95 = arith.constant dense<0.000000e+00> : vector<16x32xf32>
    %203 = tpu.matmul %193, %202, %cst_95 {dimension_numbers = #tpu.dot_dimension_numbers<[1], [0], [0], [1], [0, 0, 1, 1], [], []>} : vector<16x32xbf16>, vector<32x32xbf16>, vector<16x32xf32> -> vector<16x32xf32>
    %c1_96 = arith.constant 1 : index
    %c0_97 = arith.constant 0 : index
    %c0_98 = arith.constant 0 : index
    %204 = vector.load %arg5[%c1_96, %c0_97, %c0_98] : memref<3x1x32xf32, #tpu.memory_space<vmem>>, vector<1x1x32xf32>
    %205 = vector.shape_cast %204 : vector<1x1x32xf32> to vector<1x32xf32>
    %206 = vector.broadcast %205 : vector<1x32xf32> to vector<16x32xf32>
    %207 = arith.addf %203, %206 : vector<16x32xf32>
    %c1_99 = arith.constant 1 : index
    %c0_100 = arith.constant 0 : index
    %c0_101 = arith.constant 0 : index
    %208 = vector.load %arg6[%c1_99, %c0_100, %c0_101] : memref<3x32x32xbf16, #tpu.memory_space<vmem>>, vector<1x32x32xbf16>
    %209 = vector.shape_cast %208 : vector<1x32x32xbf16> to vector<32x32xbf16>
    %cst_102 = arith.constant dense<0.000000e+00> : vector<16x32xf32>
    %210 = tpu.matmul %193, %209, %cst_102 {dimension_numbers = #tpu.dot_dimension_numbers<[1], [0], [0], [1], [0, 0, 1, 1], [], []>} : vector<16x32xbf16>, vector<32x32xbf16>, vector<16x32xf32> -> vector<16x32xf32>
    %c1_103 = arith.constant 1 : index
    %c0_104 = arith.constant 0 : index
    %c0_105 = arith.constant 0 : index
    %211 = vector.load %arg7[%c1_103, %c0_104, %c0_105] : memref<3x1x32xf32, #tpu.memory_space<vmem>>, vector<1x1x32xf32>
    %212 = vector.shape_cast %211 : vector<1x1x32xf32> to vector<1x32xf32>
    %213 = vector.broadcast %212 : vector<1x32xf32> to vector<16x32xf32>
    %214 = arith.addf %210, %213 : vector<16x32xf32>
    %215 = vector.shape_cast %200 : vector<16x32xf32> to vector<2x8x32xf32>
    %216 = vector.shape_cast %207 : vector<16x32xf32> to vector<2x8x32xf32>
    %217 = vector.shape_cast %214 : vector<16x32xf32> to vector<2x8x32xf32>
    %218 = vector.extract_strided_slice %215 {offsets = [0, 0, 0], sizes = [2, 8, 8], strides = [1, 1, 1]} : vector<2x8x32xf32> to vector<2x8x8xf32>
    %219 = arith.truncf %218 : vector<2x8x8xf32> to vector<2x8x8xbf16>
    %220 = vector.extract_strided_slice %216 {offsets = [0, 0, 0], sizes = [2, 8, 8], strides = [1, 1, 1]} : vector<2x8x32xf32> to vector<2x8x8xf32>
    %221 = arith.truncf %220 : vector<2x8x8xf32> to vector<2x8x8xbf16>
    %222 = vector.extract_strided_slice %217 {offsets = [0, 0, 0], sizes = [2, 8, 8], strides = [1, 1, 1]} : vector<2x8x32xf32> to vector<2x8x8xf32>
    %223 = arith.truncf %222 : vector<2x8x8xf32> to vector<2x8x8xbf16>
    "tpu.trace_start"() <{level = 10 : i32, message = "bqd,bkd->bqk"}> : () -> ()
    %cst_106 = arith.constant dense<0.000000e+00> : vector<2x8x8xf32>
    %224 = tpu.matmul %219, %221, %cst_106 {dimension_numbers = #tpu.dot_dimension_numbers<[2], [2], [1], [1], [0, 0, 0, 1, 1, 1], [0], [0]>} : vector<2x8x8xbf16>, vector<2x8x8xbf16>, vector<2x8x8xf32> -> vector<2x8x8xf32>
    "tpu.trace_stop"() : () -> ()
    %cst_107 = arith.constant 0.353553385 : f32
    %225 = vector.broadcast %cst_107 : f32 to vector<2x8x8xf32>
    %226 = arith.mulf %224, %225 : vector<2x8x8xf32>
    %cst_108 = arith.constant dense<0xFF800000> : vector<2x8xf32>
    %227 = vector.multi_reduction <maximumf>, %226, %cst_108 [2] : vector<2x8x8xf32> to vector<2x8xf32>
    %228 = vector.shape_cast %227 : vector<2x8xf32> to vector<2x8x1xf32>
    %229 = vector.broadcast %228 : vector<2x8x1xf32> to vector<2x8x8xf32>
    %230 = arith.subf %226, %229 : vector<2x8x8xf32>
    %231 = math.exp %230 : vector<2x8x8xf32>
    %cst_109 = arith.constant dense<0.000000e+00> : vector<2x8xf32>
    %232 = vector.multi_reduction <add>, %231, %cst_109 [2] : vector<2x8x8xf32> to vector<2x8xf32>
    %233 = vector.shape_cast %232 : vector<2x8xf32> to vector<2x8x1xf32>
    %234 = tpu.reciprocal %233 {approx = true} : vector<2x8x1xf32> -> vector<2x8x1xf32>
    %235 = vector.broadcast %234 : vector<2x8x1xf32> to vector<2x8x8xf32>
    %236 = arith.mulf %231, %235 : vector<2x8x8xf32>
    %237 = arith.truncf %236 : vector<2x8x8xf32> to vector<2x8x8xbf16>
    "tpu.trace_start"() <{level = 10 : i32, message = "bqk,bkd->bqd"}> : () -> ()
    %cst_110 = arith.constant dense<0.000000e+00> : vector<2x8x8xf32>
    %238 = tpu.matmul %237, %223, %cst_110 {dimension_numbers = #tpu.dot_dimension_numbers<[2], [1], [1], [2], [0, 0, 0, 1, 1, 2], [0], [0]>} : vector<2x8x8xbf16>, vector<2x8x8xbf16>, vector<2x8x8xf32> -> vector<2x8x8xf32>
    "tpu.trace_stop"() : () -> ()
    %239 = vector.extract_strided_slice %215 {offsets = [0, 0, 8], sizes = [2, 8, 8], strides = [1, 1, 1]} : vector<2x8x32xf32> to vector<2x8x8xf32>
    %240 = arith.truncf %239 : vector<2x8x8xf32> to vector<2x8x8xbf16>
    %241 = vector.extract_strided_slice %216 {offsets = [0, 0, 8], sizes = [2, 8, 8], strides = [1, 1, 1]} : vector<2x8x32xf32> to vector<2x8x8xf32>
    %242 = arith.truncf %241 : vector<2x8x8xf32> to vector<2x8x8xbf16>
    %243 = vector.extract_strided_slice %217 {offsets = [0, 0, 8], sizes = [2, 8, 8], strides = [1, 1, 1]} : vector<2x8x32xf32> to vector<2x8x8xf32>
    %244 = arith.truncf %243 : vector<2x8x8xf32> to vector<2x8x8xbf16>
    "tpu.trace_start"() <{level = 10 : i32, message = "bqd,bkd->bqk"}> : () -> ()
    %cst_111 = arith.constant dense<0.000000e+00> : vector<2x8x8xf32>
    %245 = tpu.matmul %240, %242, %cst_111 {dimension_numbers = #tpu.dot_dimension_numbers<[2], [2], [1], [1], [0, 0, 0, 1, 1, 1], [0], [0]>} : vector<2x8x8xbf16>, vector<2x8x8xbf16>, vector<2x8x8xf32> -> vector<2x8x8xf32>
    "tpu.trace_stop"() : () -> ()
    %cst_112 = arith.constant 0.353553385 : f32
    %246 = vector.broadcast %cst_112 : f32 to vector<2x8x8xf32>
    %247 = arith.mulf %245, %246 : vector<2x8x8xf32>
    %cst_113 = arith.constant dense<0xFF800000> : vector<2x8xf32>
    %248 = vector.multi_reduction <maximumf>, %247, %cst_113 [2] : vector<2x8x8xf32> to vector<2x8xf32>
    %249 = vector.shape_cast %248 : vector<2x8xf32> to vector<2x8x1xf32>
    %250 = vector.broadcast %249 : vector<2x8x1xf32> to vector<2x8x8xf32>
    %251 = arith.subf %247, %250 : vector<2x8x8xf32>
    %252 = math.exp %251 : vector<2x8x8xf32>
    %cst_114 = arith.constant dense<0.000000e+00> : vector<2x8xf32>
    %253 = vector.multi_reduction <add>, %252, %cst_114 [2] : vector<2x8x8xf32> to vector<2x8xf32>
    %254 = vector.shape_cast %253 : vector<2x8xf32> to vector<2x8x1xf32>
    %255 = tpu.reciprocal %254 {approx = true} : vector<2x8x1xf32> -> vector<2x8x1xf32>
    %256 = vector.broadcast %255 : vector<2x8x1xf32> to vector<2x8x8xf32>
    %257 = arith.mulf %252, %256 : vector<2x8x8xf32>
    %258 = arith.truncf %257 : vector<2x8x8xf32> to vector<2x8x8xbf16>
    "tpu.trace_start"() <{level = 10 : i32, message = "bqk,bkd->bqd"}> : () -> ()
    %cst_115 = arith.constant dense<0.000000e+00> : vector<2x8x8xf32>
    %259 = tpu.matmul %258, %244, %cst_115 {dimension_numbers = #tpu.dot_dimension_numbers<[2], [1], [1], [2], [0, 0, 0, 1, 1, 2], [0], [0]>} : vector<2x8x8xbf16>, vector<2x8x8xbf16>, vector<2x8x8xf32> -> vector<2x8x8xf32>
    "tpu.trace_stop"() : () -> ()
    %260 = vector.extract_strided_slice %215 {offsets = [0, 0, 16], sizes = [2, 8, 8], strides = [1, 1, 1]} : vector<2x8x32xf32> to vector<2x8x8xf32>
    %261 = arith.truncf %260 : vector<2x8x8xf32> to vector<2x8x8xbf16>
    %262 = vector.extract_strided_slice %216 {offsets = [0, 0, 16], sizes = [2, 8, 8], strides = [1, 1, 1]} : vector<2x8x32xf32> to vector<2x8x8xf32>
    %263 = arith.truncf %262 : vector<2x8x8xf32> to vector<2x8x8xbf16>
    %264 = vector.extract_strided_slice %217 {offsets = [0, 0, 16], sizes = [2, 8, 8], strides = [1, 1, 1]} : vector<2x8x32xf32> to vector<2x8x8xf32>
    %265 = arith.truncf %264 : vector<2x8x8xf32> to vector<2x8x8xbf16>
    "tpu.trace_start"() <{level = 10 : i32, message = "bqd,bkd->bqk"}> : () -> ()
    %cst_116 = arith.constant dense<0.000000e+00> : vector<2x8x8xf32>
    %266 = tpu.matmul %261, %263, %cst_116 {dimension_numbers = #tpu.dot_dimension_numbers<[2], [2], [1], [1], [0, 0, 0, 1, 1, 1], [0], [0]>} : vector<2x8x8xbf16>, vector<2x8x8xbf16>, vector<2x8x8xf32> -> vector<2x8x8xf32>
    "tpu.trace_stop"() : () -> ()
    %cst_117 = arith.constant 0.353553385 : f32
    %267 = vector.broadcast %cst_117 : f32 to vector<2x8x8xf32>
    %268 = arith.mulf %266, %267 : vector<2x8x8xf32>
    %cst_118 = arith.constant dense<0xFF800000> : vector<2x8xf32>
    %269 = vector.multi_reduction <maximumf>, %268, %cst_118 [2] : vector<2x8x8xf32> to vector<2x8xf32>
    %270 = vector.shape_cast %269 : vector<2x8xf32> to vector<2x8x1xf32>
    %271 = vector.broadcast %270 : vector<2x8x1xf32> to vector<2x8x8xf32>
    %272 = arith.subf %268, %271 : vector<2x8x8xf32>
    %273 = math.exp %272 : vector<2x8x8xf32>
    %cst_119 = arith.constant dense<0.000000e+00> : vector<2x8xf32>
    %274 = vector.multi_reduction <add>, %273, %cst_119 [2] : vector<2x8x8xf32> to vector<2x8xf32>
    %275 = vector.shape_cast %274 : vector<2x8xf32> to vector<2x8x1xf32>
    %276 = tpu.reciprocal %275 {approx = true} : vector<2x8x1xf32> -> vector<2x8x1xf32>
    %277 = vector.broadcast %276 : vector<2x8x1xf32> to vector<2x8x8xf32>
    %278 = arith.mulf %273, %277 : vector<2x8x8xf32>
    %279 = arith.truncf %278 : vector<2x8x8xf32> to vector<2x8x8xbf16>
    "tpu.trace_start"() <{level = 10 : i32, message = "bqk,bkd->bqd"}> : () -> ()
    %cst_120 = arith.constant dense<0.000000e+00> : vector<2x8x8xf32>
    %280 = tpu.matmul %279, %265, %cst_120 {dimension_numbers = #tpu.dot_dimension_numbers<[2], [1], [1], [2], [0, 0, 0, 1, 1, 2], [0], [0]>} : vector<2x8x8xbf16>, vector<2x8x8xbf16>, vector<2x8x8xf32> -> vector<2x8x8xf32>
    "tpu.trace_stop"() : () -> ()
    %281 = vector.extract_strided_slice %215 {offsets = [0, 0, 24], sizes = [2, 8, 8], strides = [1, 1, 1]} : vector<2x8x32xf32> to vector<2x8x8xf32>
    %282 = arith.truncf %281 : vector<2x8x8xf32> to vector<2x8x8xbf16>
    %283 = vector.extract_strided_slice %216 {offsets = [0, 0, 24], sizes = [2, 8, 8], strides = [1, 1, 1]} : vector<2x8x32xf32> to vector<2x8x8xf32>
    %284 = arith.truncf %283 : vector<2x8x8xf32> to vector<2x8x8xbf16>
    %285 = vector.extract_strided_slice %217 {offsets = [0, 0, 24], sizes = [2, 8, 8], strides = [1, 1, 1]} : vector<2x8x32xf32> to vector<2x8x8xf32>
    %286 = arith.truncf %285 : vector<2x8x8xf32> to vector<2x8x8xbf16>
    "tpu.trace_start"() <{level = 10 : i32, message = "bqd,bkd->bqk"}> : () -> ()
    %cst_121 = arith.constant dense<0.000000e+00> : vector<2x8x8xf32>
    %287 = tpu.matmul %282, %284, %cst_121 {dimension_numbers = #tpu.dot_dimension_numbers<[2], [2], [1], [1], [0, 0, 0, 1, 1, 1], [0], [0]>} : vector<2x8x8xbf16>, vector<2x8x8xbf16>, vector<2x8x8xf32> -> vector<2x8x8xf32>
    "tpu.trace_stop"() : () -> ()
    %cst_122 = arith.constant 0.353553385 : f32
    %288 = vector.broadcast %cst_122 : f32 to vector<2x8x8xf32>
    %289 = arith.mulf %287, %288 : vector<2x8x8xf32>
    %cst_123 = arith.constant dense<0xFF800000> : vector<2x8xf32>
    %290 = vector.multi_reduction <maximumf>, %289, %cst_123 [2] : vector<2x8x8xf32> to vector<2x8xf32>
    %291 = vector.shape_cast %290 : vector<2x8xf32> to vector<2x8x1xf32>
    %292 = vector.broadcast %291 : vector<2x8x1xf32> to vector<2x8x8xf32>
    %293 = arith.subf %289, %292 : vector<2x8x8xf32>
    %294 = math.exp %293 : vector<2x8x8xf32>
    %cst_124 = arith.constant dense<0.000000e+00> : vector<2x8xf32>
    %295 = vector.multi_reduction <add>, %294, %cst_124 [2] : vector<2x8x8xf32> to vector<2x8xf32>
    %296 = vector.shape_cast %295 : vector<2x8xf32> to vector<2x8x1xf32>
    %297 = tpu.reciprocal %296 {approx = true} : vector<2x8x1xf32> -> vector<2x8x1xf32>
    %298 = vector.broadcast %297 : vector<2x8x1xf32> to vector<2x8x8xf32>
    %299 = arith.mulf %294, %298 : vector<2x8x8xf32>
    %300 = arith.truncf %299 : vector<2x8x8xf32> to vector<2x8x8xbf16>
    "tpu.trace_start"() <{level = 10 : i32, message = "bqk,bkd->bqd"}> : () -> ()
    %cst_125 = arith.constant dense<0.000000e+00> : vector<2x8x8xf32>
    %301 = tpu.matmul %300, %286, %cst_125 {dimension_numbers = #tpu.dot_dimension_numbers<[2], [1], [1], [2], [0, 0, 0, 1, 1, 2], [0], [0]>} : vector<2x8x8xbf16>, vector<2x8x8xbf16>, vector<2x8x8xf32> -> vector<2x8x8xf32>
    "tpu.trace_stop"() : () -> ()
    %302 = tpu.concatenate %238, %259, %280, %301 in 2 : vector<2x8x8xf32>, vector<2x8x8xf32>, vector<2x8x8xf32>, vector<2x8x8xf32> -> vector<2x8x32xf32>
    %303 = vector.shape_cast %302 : vector<2x8x32xf32> to vector<16x32xf32>
    %304 = arith.truncf %303 : vector<16x32xf32> to vector<16x32xbf16>
    %c1_126 = arith.constant 1 : index
    %c0_127 = arith.constant 0 : index
    %c0_128 = arith.constant 0 : index
    %305 = vector.load %arg8[%c1_126, %c0_127, %c0_128] : memref<3x32x32xbf16, #tpu.memory_space<vmem>>, vector<1x32x32xbf16>
    %306 = vector.shape_cast %305 : vector<1x32x32xbf16> to vector<32x32xbf16>
    %cst_129 = arith.constant dense<0.000000e+00> : vector<16x32xf32>
    %307 = tpu.matmul %304, %306, %cst_129 {dimension_numbers = #tpu.dot_dimension_numbers<[1], [0], [0], [1], [0, 0, 1, 1], [], []>} : vector<16x32xbf16>, vector<32x32xbf16>, vector<16x32xf32> -> vector<16x32xf32>
    %c1_130 = arith.constant 1 : index
    %c0_131 = arith.constant 0 : index
    %c0_132 = arith.constant 0 : index
    %308 = vector.load %arg9[%c1_130, %c0_131, %c0_132] : memref<3x1x32xf32, #tpu.memory_space<vmem>>, vector<1x1x32xf32>
    %309 = vector.shape_cast %308 : vector<1x1x32xf32> to vector<1x32xf32>
    %310 = vector.broadcast %309 : vector<1x32xf32> to vector<16x32xf32>
    %311 = arith.addf %307, %310 : vector<16x32xf32>
    %312 = arith.addf %192, %311 : vector<16x32xf32>
    %c1_133 = arith.constant 1 : index
    %c0_134 = arith.constant 0 : index
    %c0_135 = arith.constant 0 : index
    %313 = vector.load %arg10[%c1_133, %c0_134, %c0_135] : memref<3x1x32xf32, #tpu.memory_space<vmem>>, vector<1x1x32xf32>
    %314 = vector.shape_cast %313 : vector<1x1x32xf32> to vector<1x32xf32>
    %c1_136 = arith.constant 1 : index
    %c0_137 = arith.constant 0 : index
    %c0_138 = arith.constant 0 : index
    %315 = vector.load %arg11[%c1_136, %c0_137, %c0_138] : memref<3x1x32xf32, #tpu.memory_space<vmem>>, vector<1x1x32xf32>
    %316 = vector.shape_cast %315 : vector<1x1x32xf32> to vector<1x32xf32>
    %cst_139 = arith.constant dense<0.000000e+00> : vector<16xf32>
    %317 = vector.multi_reduction <add>, %312, %cst_139 [1] : vector<16x32xf32> to vector<16xf32>
    %318 = vector.shape_cast %317 : vector<16xf32> to vector<16x1xf32>
    %cst_140 = arith.constant 3.200000e+01 : f32
    %319 = vector.broadcast %cst_140 : f32 to vector<16x1xf32>
    %320 = arith.divf %318, %319 : vector<16x1xf32>
    %321 = vector.broadcast %320 : vector<16x1xf32> to vector<16x32xf32>
    %322 = arith.subf %312, %321 : vector<16x32xf32>
    %323 = arith.mulf %322, %322 : vector<16x32xf32>
    %cst_141 = arith.constant dense<0.000000e+00> : vector<16xf32>
    %324 = vector.multi_reduction <add>, %323, %cst_141 [1] : vector<16x32xf32> to vector<16xf32>
    %325 = vector.shape_cast %324 : vector<16xf32> to vector<16x1xf32>
    %cst_142 = arith.constant 3.200000e+01 : f32
    %326 = vector.broadcast %cst_142 : f32 to vector<16x1xf32>
    %327 = arith.divf %325, %326 : vector<16x1xf32>
    %328 = vector.broadcast %320 : vector<16x1xf32> to vector<16x32xf32>
    %329 = arith.subf %312, %328 : vector<16x32xf32>
    %cst_143 = arith.constant 9.99999974E-6 : f32
    %330 = vector.broadcast %cst_143 : f32 to vector<16x1xf32>
    %331 = arith.addf %327, %330 : vector<16x1xf32>
    %332 = math.rsqrt %331 : vector<16x1xf32>
    %333 = vector.broadcast %332 : vector<16x1xf32> to vector<16x32xf32>
    %334 = arith.mulf %329, %333 : vector<16x32xf32>
    %335 = vector.broadcast %314 : vector<1x32xf32> to vector<16x32xf32>
    %336 = arith.mulf %334, %335 : vector<16x32xf32>
    %337 = vector.broadcast %316 : vector<1x32xf32> to vector<16x32xf32>
    %338 = arith.addf %336, %337 : vector<16x32xf32>
    %339 = arith.truncf %338 : vector<16x32xf32> to vector<16x32xbf16>
    %c1_144 = arith.constant 1 : index
    %c0_145 = arith.constant 0 : index
    %c0_146 = arith.constant 0 : index
    %340 = vector.load %arg12[%c1_144, %c0_145, %c0_146] : memref<3x32x128xbf16, #tpu.memory_space<vmem>>, vector<1x32x128xbf16>
    %341 = vector.shape_cast %340 : vector<1x32x128xbf16> to vector<32x128xbf16>
    %cst_147 = arith.constant dense<0.000000e+00> : vector<16x128xf32>
    %342 = tpu.matmul %339, %341, %cst_147 {dimension_numbers = #tpu.dot_dimension_numbers<[1], [0], [0], [1], [0, 0, 1, 1], [], []>} : vector<16x32xbf16>, vector<32x128xbf16>, vector<16x128xf32> -> vector<16x128xf32>
    %c1_148 = arith.constant 1 : index
    %c0_149 = arith.constant 0 : index
    %c0_150 = arith.constant 0 : index
    %343 = vector.load %arg13[%c1_148, %c0_149, %c0_150] : memref<3x1x128xf32, #tpu.memory_space<vmem>>, vector<1x1x128xf32>
    %344 = vector.shape_cast %343 : vector<1x1x128xf32> to vector<1x128xf32>
    %345 = vector.broadcast %344 : vector<1x128xf32> to vector<16x128xf32>
    %346 = arith.addf %342, %345 : vector<16x128xf32>
    %cst_151 = arith.constant 0.000000e+00 : f32
    %347 = vector.broadcast %cst_151 : f32 to vector<16x128xf32>
    %348 = arith.maximumf %346, %347 : vector<16x128xf32>
    %349 = arith.truncf %348 : vector<16x128xf32> to vector<16x128xbf16>
    %c1_152 = arith.constant 1 : index
    %c0_153 = arith.constant 0 : index
    %c0_154 = arith.constant 0 : index
    %350 = vector.load %arg14[%c1_152, %c0_153, %c0_154] : memref<3x128x32xbf16, #tpu.memory_space<vmem>>, vector<1x128x32xbf16>
    %351 = vector.shape_cast %350 : vector<1x128x32xbf16> to vector<128x32xbf16>
    %cst_155 = arith.constant dense<0.000000e+00> : vector<16x32xf32>
    %352 = tpu.matmul %349, %351, %cst_155 {dimension_numbers = #tpu.dot_dimension_numbers<[1], [0], [0], [1], [0, 0, 1, 1], [], []>} : vector<16x128xbf16>, vector<128x32xbf16>, vector<16x32xf32> -> vector<16x32xf32>
    %c1_156 = arith.constant 1 : index
    %c0_157 = arith.constant 0 : index
    %c0_158 = arith.constant 0 : index
    %353 = vector.load %arg15[%c1_156, %c0_157, %c0_158] : memref<3x1x32xf32, #tpu.memory_space<vmem>>, vector<1x1x32xf32>
    %354 = vector.shape_cast %353 : vector<1x1x32xf32> to vector<1x32xf32>
    %355 = vector.broadcast %354 : vector<1x32xf32> to vector<16x32xf32>
    %356 = arith.addf %352, %355 : vector<16x32xf32>
    %357 = arith.addf %338, %356 : vector<16x32xf32>
    %c1_159 = arith.constant 1 : index
    %c0_160 = arith.constant 0 : index
    %c0_161 = arith.constant 0 : index
    %358 = vector.load %arg16[%c1_159, %c0_160, %c0_161] : memref<3x1x32xf32, #tpu.memory_space<vmem>>, vector<1x1x32xf32>
    %359 = vector.shape_cast %358 : vector<1x1x32xf32> to vector<1x32xf32>
    %c1_162 = arith.constant 1 : index
    %c0_163 = arith.constant 0 : index
    %c0_164 = arith.constant 0 : index
    %360 = vector.load %arg17[%c1_162, %c0_163, %c0_164] : memref<3x1x32xf32, #tpu.memory_space<vmem>>, vector<1x1x32xf32>
    %361 = vector.shape_cast %360 : vector<1x1x32xf32> to vector<1x32xf32>
    %cst_165 = arith.constant dense<0.000000e+00> : vector<16xf32>
    %362 = vector.multi_reduction <add>, %357, %cst_165 [1] : vector<16x32xf32> to vector<16xf32>
    %363 = vector.shape_cast %362 : vector<16xf32> to vector<16x1xf32>
    %cst_166 = arith.constant 3.200000e+01 : f32
    %364 = vector.broadcast %cst_166 : f32 to vector<16x1xf32>
    %365 = arith.divf %363, %364 : vector<16x1xf32>
    %366 = vector.broadcast %365 : vector<16x1xf32> to vector<16x32xf32>
    %367 = arith.subf %357, %366 : vector<16x32xf32>
    %368 = arith.mulf %367, %367 : vector<16x32xf32>
    %cst_167 = arith.constant dense<0.000000e+00> : vector<16xf32>
    %369 = vector.multi_reduction <add>, %368, %cst_167 [1] : vector<16x32xf32> to vector<16xf32>
    %370 = vector.shape_cast %369 : vector<16xf32> to vector<16x1xf32>
    %cst_168 = arith.constant 3.200000e+01 : f32
    %371 = vector.broadcast %cst_168 : f32 to vector<16x1xf32>
    %372 = arith.divf %370, %371 : vector<16x1xf32>
    %373 = vector.broadcast %365 : vector<16x1xf32> to vector<16x32xf32>
    %374 = arith.subf %357, %373 : vector<16x32xf32>
    %cst_169 = arith.constant 9.99999974E-6 : f32
    %375 = vector.broadcast %cst_169 : f32 to vector<16x1xf32>
    %376 = arith.addf %372, %375 : vector<16x1xf32>
    %377 = math.rsqrt %376 : vector<16x1xf32>
    %378 = vector.broadcast %377 : vector<16x1xf32> to vector<16x32xf32>
    %379 = arith.mulf %374, %378 : vector<16x32xf32>
    %380 = vector.broadcast %359 : vector<1x32xf32> to vector<16x32xf32>
    %381 = arith.mulf %379, %380 : vector<16x32xf32>
    %382 = vector.broadcast %361 : vector<1x32xf32> to vector<16x32xf32>
    %383 = arith.addf %381, %382 : vector<16x32xf32>
    %384 = arith.truncf %383 : vector<16x32xf32> to vector<16x32xbf16>
    %c2 = arith.constant 2 : index
    %c0_170 = arith.constant 0 : index
    %c0_171 = arith.constant 0 : index
    %385 = vector.load %arg2[%c2, %c0_170, %c0_171] : memref<3x32x32xbf16, #tpu.memory_space<vmem>>, vector<1x32x32xbf16>
    %386 = vector.shape_cast %385 : vector<1x32x32xbf16> to vector<32x32xbf16>
    %cst_172 = arith.constant dense<0.000000e+00> : vector<16x32xf32>
    %387 = tpu.matmul %384, %386, %cst_172 {dimension_numbers = #tpu.dot_dimension_numbers<[1], [0], [0], [1], [0, 0, 1, 1], [], []>} : vector<16x32xbf16>, vector<32x32xbf16>, vector<16x32xf32> -> vector<16x32xf32>
    %c2_173 = arith.constant 2 : index
    %c0_174 = arith.constant 0 : index
    %c0_175 = arith.constant 0 : index
    %388 = vector.load %arg3[%c2_173, %c0_174, %c0_175] : memref<3x1x32xf32, #tpu.memory_space<vmem>>, vector<1x1x32xf32>
    %389 = vector.shape_cast %388 : vector<1x1x32xf32> to vector<1x32xf32>
    %390 = vector.broadcast %389 : vector<1x32xf32> to vector<16x32xf32>
    %391 = arith.addf %387, %390 : vector<16x32xf32>
    %c2_176 = arith.constant 2 : index
    %c0_177 = arith.constant 0 : index
    %c0_178 = arith.constant 0 : index
    %392 = vector.load %arg4[%c2_176, %c0_177, %c0_178] : memref<3x32x32xbf16, #tpu.memory_space<vmem>>, vector<1x32x32xbf16>
    %393 = vector.shape_cast %392 : vector<1x32x32xbf16> to vector<32x32xbf16>
    %cst_179 = arith.constant dense<0.000000e+00> : vector<16x32xf32>
    %394 = tpu.matmul %384, %393, %cst_179 {dimension_numbers = #tpu.dot_dimension_numbers<[1], [0], [0], [1], [0, 0, 1, 1], [], []>} : vector<16x32xbf16>, vector<32x32xbf16>, vector<16x32xf32> -> vector<16x32xf32>
    %c2_180 = arith.constant 2 : index
    %c0_181 = arith.constant 0 : index
    %c0_182 = arith.constant 0 : index
    %395 = vector.load %arg5[%c2_180, %c0_181, %c0_182] : memref<3x1x32xf32, #tpu.memory_space<vmem>>, vector<1x1x32xf32>
    %396 = vector.shape_cast %395 : vector<1x1x32xf32> to vector<1x32xf32>
    %397 = vector.broadcast %396 : vector<1x32xf32> to vector<16x32xf32>
    %398 = arith.addf %394, %397 : vector<16x32xf32>
    %c2_183 = arith.constant 2 : index
    %c0_184 = arith.constant 0 : index
    %c0_185 = arith.constant 0 : index
    %399 = vector.load %arg6[%c2_183, %c0_184, %c0_185] : memref<3x32x32xbf16, #tpu.memory_space<vmem>>, vector<1x32x32xbf16>
    %400 = vector.shape_cast %399 : vector<1x32x32xbf16> to vector<32x32xbf16>
    %cst_186 = arith.constant dense<0.000000e+00> : vector<16x32xf32>
    %401 = tpu.matmul %384, %400, %cst_186 {dimension_numbers = #tpu.dot_dimension_numbers<[1], [0], [0], [1], [0, 0, 1, 1], [], []>} : vector<16x32xbf16>, vector<32x32xbf16>, vector<16x32xf32> -> vector<16x32xf32>
    %c2_187 = arith.constant 2 : index
    %c0_188 = arith.constant 0 : index
    %c0_189 = arith.constant 0 : index
    %402 = vector.load %arg7[%c2_187, %c0_188, %c0_189] : memref<3x1x32xf32, #tpu.memory_space<vmem>>, vector<1x1x32xf32>
    %403 = vector.shape_cast %402 : vector<1x1x32xf32> to vector<1x32xf32>
    %404 = vector.broadcast %403 : vector<1x32xf32> to vector<16x32xf32>
    %405 = arith.addf %401, %404 : vector<16x32xf32>
    %406 = vector.shape_cast %391 : vector<16x32xf32> to vector<2x8x32xf32>
    %407 = vector.shape_cast %398 : vector<16x32xf32> to vector<2x8x32xf32>
    %408 = vector.shape_cast %405 : vector<16x32xf32> to vector<2x8x32xf32>
    %409 = vector.extract_strided_slice %406 {offsets = [0, 0, 0], sizes = [2, 8, 8], strides = [1, 1, 1]} : vector<2x8x32xf32> to vector<2x8x8xf32>
    %410 = arith.truncf %409 : vector<2x8x8xf32> to vector<2x8x8xbf16>
    %411 = vector.extract_strided_slice %407 {offsets = [0, 0, 0], sizes = [2, 8, 8], strides = [1, 1, 1]} : vector<2x8x32xf32> to vector<2x8x8xf32>
    %412 = arith.truncf %411 : vector<2x8x8xf32> to vector<2x8x8xbf16>
    %413 = vector.extract_strided_slice %408 {offsets = [0, 0, 0], sizes = [2, 8, 8], strides = [1, 1, 1]} : vector<2x8x32xf32> to vector<2x8x8xf32>
    %414 = arith.truncf %413 : vector<2x8x8xf32> to vector<2x8x8xbf16>
    "tpu.trace_start"() <{level = 10 : i32, message = "bqd,bkd->bqk"}> : () -> ()
    %cst_190 = arith.constant dense<0.000000e+00> : vector<2x8x8xf32>
    %415 = tpu.matmul %410, %412, %cst_190 {dimension_numbers = #tpu.dot_dimension_numbers<[2], [2], [1], [1], [0, 0, 0, 1, 1, 1], [0], [0]>} : vector<2x8x8xbf16>, vector<2x8x8xbf16>, vector<2x8x8xf32> -> vector<2x8x8xf32>
    "tpu.trace_stop"() : () -> ()
    %cst_191 = arith.constant 0.353553385 : f32
    %416 = vector.broadcast %cst_191 : f32 to vector<2x8x8xf32>
    %417 = arith.mulf %415, %416 : vector<2x8x8xf32>
    %cst_192 = arith.constant dense<0xFF800000> : vector<2x8xf32>
    %418 = vector.multi_reduction <maximumf>, %417, %cst_192 [2] : vector<2x8x8xf32> to vector<2x8xf32>
    %419 = vector.shape_cast %418 : vector<2x8xf32> to vector<2x8x1xf32>
    %420 = vector.broadcast %419 : vector<2x8x1xf32> to vector<2x8x8xf32>
    %421 = arith.subf %417, %420 : vector<2x8x8xf32>
    %422 = math.exp %421 : vector<2x8x8xf32>
    %cst_193 = arith.constant dense<0.000000e+00> : vector<2x8xf32>
    %423 = vector.multi_reduction <add>, %422, %cst_193 [2] : vector<2x8x8xf32> to vector<2x8xf32>
    %424 = vector.shape_cast %423 : vector<2x8xf32> to vector<2x8x1xf32>
    %425 = tpu.reciprocal %424 {approx = true} : vector<2x8x1xf32> -> vector<2x8x1xf32>
    %426 = vector.broadcast %425 : vector<2x8x1xf32> to vector<2x8x8xf32>
    %427 = arith.mulf %422, %426 : vector<2x8x8xf32>
    %428 = arith.truncf %427 : vector<2x8x8xf32> to vector<2x8x8xbf16>
    "tpu.trace_start"() <{level = 10 : i32, message = "bqk,bkd->bqd"}> : () -> ()
    %cst_194 = arith.constant dense<0.000000e+00> : vector<2x8x8xf32>
    %429 = tpu.matmul %428, %414, %cst_194 {dimension_numbers = #tpu.dot_dimension_numbers<[2], [1], [1], [2], [0, 0, 0, 1, 1, 2], [0], [0]>} : vector<2x8x8xbf16>, vector<2x8x8xbf16>, vector<2x8x8xf32> -> vector<2x8x8xf32>
    "tpu.trace_stop"() : () -> ()
    %430 = vector.extract_strided_slice %406 {offsets = [0, 0, 8], sizes = [2, 8, 8], strides = [1, 1, 1]} : vector<2x8x32xf32> to vector<2x8x8xf32>
    %431 = arith.truncf %430 : vector<2x8x8xf32> to vector<2x8x8xbf16>
    %432 = vector.extract_strided_slice %407 {offsets = [0, 0, 8], sizes = [2, 8, 8], strides = [1, 1, 1]} : vector<2x8x32xf32> to vector<2x8x8xf32>
    %433 = arith.truncf %432 : vector<2x8x8xf32> to vector<2x8x8xbf16>
    %434 = vector.extract_strided_slice %408 {offsets = [0, 0, 8], sizes = [2, 8, 8], strides = [1, 1, 1]} : vector<2x8x32xf32> to vector<2x8x8xf32>
    %435 = arith.truncf %434 : vector<2x8x8xf32> to vector<2x8x8xbf16>
    "tpu.trace_start"() <{level = 10 : i32, message = "bqd,bkd->bqk"}> : () -> ()
    %cst_195 = arith.constant dense<0.000000e+00> : vector<2x8x8xf32>
    %436 = tpu.matmul %431, %433, %cst_195 {dimension_numbers = #tpu.dot_dimension_numbers<[2], [2], [1], [1], [0, 0, 0, 1, 1, 1], [0], [0]>} : vector<2x8x8xbf16>, vector<2x8x8xbf16>, vector<2x8x8xf32> -> vector<2x8x8xf32>
    "tpu.trace_stop"() : () -> ()
    %cst_196 = arith.constant 0.353553385 : f32
    %437 = vector.broadcast %cst_196 : f32 to vector<2x8x8xf32>
    %438 = arith.mulf %436, %437 : vector<2x8x8xf32>
    %cst_197 = arith.constant dense<0xFF800000> : vector<2x8xf32>
    %439 = vector.multi_reduction <maximumf>, %438, %cst_197 [2] : vector<2x8x8xf32> to vector<2x8xf32>
    %440 = vector.shape_cast %439 : vector<2x8xf32> to vector<2x8x1xf32>
    %441 = vector.broadcast %440 : vector<2x8x1xf32> to vector<2x8x8xf32>
    %442 = arith.subf %438, %441 : vector<2x8x8xf32>
    %443 = math.exp %442 : vector<2x8x8xf32>
    %cst_198 = arith.constant dense<0.000000e+00> : vector<2x8xf32>
    %444 = vector.multi_reduction <add>, %443, %cst_198 [2] : vector<2x8x8xf32> to vector<2x8xf32>
    %445 = vector.shape_cast %444 : vector<2x8xf32> to vector<2x8x1xf32>
    %446 = tpu.reciprocal %445 {approx = true} : vector<2x8x1xf32> -> vector<2x8x1xf32>
    %447 = vector.broadcast %446 : vector<2x8x1xf32> to vector<2x8x8xf32>
    %448 = arith.mulf %443, %447 : vector<2x8x8xf32>
    %449 = arith.truncf %448 : vector<2x8x8xf32> to vector<2x8x8xbf16>
    "tpu.trace_start"() <{level = 10 : i32, message = "bqk,bkd->bqd"}> : () -> ()
    %cst_199 = arith.constant dense<0.000000e+00> : vector<2x8x8xf32>
    %450 = tpu.matmul %449, %435, %cst_199 {dimension_numbers = #tpu.dot_dimension_numbers<[2], [1], [1], [2], [0, 0, 0, 1, 1, 2], [0], [0]>} : vector<2x8x8xbf16>, vector<2x8x8xbf16>, vector<2x8x8xf32> -> vector<2x8x8xf32>
    "tpu.trace_stop"() : () -> ()
    %451 = vector.extract_strided_slice %406 {offsets = [0, 0, 16], sizes = [2, 8, 8], strides = [1, 1, 1]} : vector<2x8x32xf32> to vector<2x8x8xf32>
    %452 = arith.truncf %451 : vector<2x8x8xf32> to vector<2x8x8xbf16>
    %453 = vector.extract_strided_slice %407 {offsets = [0, 0, 16], sizes = [2, 8, 8], strides = [1, 1, 1]} : vector<2x8x32xf32> to vector<2x8x8xf32>
    %454 = arith.truncf %453 : vector<2x8x8xf32> to vector<2x8x8xbf16>
    %455 = vector.extract_strided_slice %408 {offsets = [0, 0, 16], sizes = [2, 8, 8], strides = [1, 1, 1]} : vector<2x8x32xf32> to vector<2x8x8xf32>
    %456 = arith.truncf %455 : vector<2x8x8xf32> to vector<2x8x8xbf16>
    "tpu.trace_start"() <{level = 10 : i32, message = "bqd,bkd->bqk"}> : () -> ()
    %cst_200 = arith.constant dense<0.000000e+00> : vector<2x8x8xf32>
    %457 = tpu.matmul %452, %454, %cst_200 {dimension_numbers = #tpu.dot_dimension_numbers<[2], [2], [1], [1], [0, 0, 0, 1, 1, 1], [0], [0]>} : vector<2x8x8xbf16>, vector<2x8x8xbf16>, vector<2x8x8xf32> -> vector<2x8x8xf32>
    "tpu.trace_stop"() : () -> ()
    %cst_201 = arith.constant 0.353553385 : f32
    %458 = vector.broadcast %cst_201 : f32 to vector<2x8x8xf32>
    %459 = arith.mulf %457, %458 : vector<2x8x8xf32>
    %cst_202 = arith.constant dense<0xFF800000> : vector<2x8xf32>
    %460 = vector.multi_reduction <maximumf>, %459, %cst_202 [2] : vector<2x8x8xf32> to vector<2x8xf32>
    %461 = vector.shape_cast %460 : vector<2x8xf32> to vector<2x8x1xf32>
    %462 = vector.broadcast %461 : vector<2x8x1xf32> to vector<2x8x8xf32>
    %463 = arith.subf %459, %462 : vector<2x8x8xf32>
    %464 = math.exp %463 : vector<2x8x8xf32>
    %cst_203 = arith.constant dense<0.000000e+00> : vector<2x8xf32>
    %465 = vector.multi_reduction <add>, %464, %cst_203 [2] : vector<2x8x8xf32> to vector<2x8xf32>
    %466 = vector.shape_cast %465 : vector<2x8xf32> to vector<2x8x1xf32>
    %467 = tpu.reciprocal %466 {approx = true} : vector<2x8x1xf32> -> vector<2x8x1xf32>
    %468 = vector.broadcast %467 : vector<2x8x1xf32> to vector<2x8x8xf32>
    %469 = arith.mulf %464, %468 : vector<2x8x8xf32>
    %470 = arith.truncf %469 : vector<2x8x8xf32> to vector<2x8x8xbf16>
    "tpu.trace_start"() <{level = 10 : i32, message = "bqk,bkd->bqd"}> : () -> ()
    %cst_204 = arith.constant dense<0.000000e+00> : vector<2x8x8xf32>
    %471 = tpu.matmul %470, %456, %cst_204 {dimension_numbers = #tpu.dot_dimension_numbers<[2], [1], [1], [2], [0, 0, 0, 1, 1, 2], [0], [0]>} : vector<2x8x8xbf16>, vector<2x8x8xbf16>, vector<2x8x8xf32> -> vector<2x8x8xf32>
    "tpu.trace_stop"() : () -> ()
    %472 = vector.extract_strided_slice %406 {offsets = [0, 0, 24], sizes = [2, 8, 8], strides = [1, 1, 1]} : vector<2x8x32xf32> to vector<2x8x8xf32>
    %473 = arith.truncf %472 : vector<2x8x8xf32> to vector<2x8x8xbf16>
    %474 = vector.extract_strided_slice %407 {offsets = [0, 0, 24], sizes = [2, 8, 8], strides = [1, 1, 1]} : vector<2x8x32xf32> to vector<2x8x8xf32>
    %475 = arith.truncf %474 : vector<2x8x8xf32> to vector<2x8x8xbf16>
    %476 = vector.extract_strided_slice %408 {offsets = [0, 0, 24], sizes = [2, 8, 8], strides = [1, 1, 1]} : vector<2x8x32xf32> to vector<2x8x8xf32>
    %477 = arith.truncf %476 : vector<2x8x8xf32> to vector<2x8x8xbf16>
    "tpu.trace_start"() <{level = 10 : i32, message = "bqd,bkd->bqk"}> : () -> ()
    %cst_205 = arith.constant dense<0.000000e+00> : vector<2x8x8xf32>
    %478 = tpu.matmul %473, %475, %cst_205 {dimension_numbers = #tpu.dot_dimension_numbers<[2], [2], [1], [1], [0, 0, 0, 1, 1, 1], [0], [0]>} : vector<2x8x8xbf16>, vector<2x8x8xbf16>, vector<2x8x8xf32> -> vector<2x8x8xf32>
    "tpu.trace_stop"() : () -> ()
    %cst_206 = arith.constant 0.353553385 : f32
    %479 = vector.broadcast %cst_206 : f32 to vector<2x8x8xf32>
    %480 = arith.mulf %478, %479 : vector<2x8x8xf32>
    %cst_207 = arith.constant dense<0xFF800000> : vector<2x8xf32>
    %481 = vector.multi_reduction <maximumf>, %480, %cst_207 [2] : vector<2x8x8xf32> to vector<2x8xf32>
    %482 = vector.shape_cast %481 : vector<2x8xf32> to vector<2x8x1xf32>
    %483 = vector.broadcast %482 : vector<2x8x1xf32> to vector<2x8x8xf32>
    %484 = arith.subf %480, %483 : vector<2x8x8xf32>
    %485 = math.exp %484 : vector<2x8x8xf32>
    %cst_208 = arith.constant dense<0.000000e+00> : vector<2x8xf32>
    %486 = vector.multi_reduction <add>, %485, %cst_208 [2] : vector<2x8x8xf32> to vector<2x8xf32>
    %487 = vector.shape_cast %486 : vector<2x8xf32> to vector<2x8x1xf32>
    %488 = tpu.reciprocal %487 {approx = true} : vector<2x8x1xf32> -> vector<2x8x1xf32>
    %489 = vector.broadcast %488 : vector<2x8x1xf32> to vector<2x8x8xf32>
    %490 = arith.mulf %485, %489 : vector<2x8x8xf32>
    %491 = arith.truncf %490 : vector<2x8x8xf32> to vector<2x8x8xbf16>
    "tpu.trace_start"() <{level = 10 : i32, message = "bqk,bkd->bqd"}> : () -> ()
    %cst_209 = arith.constant dense<0.000000e+00> : vector<2x8x8xf32>
    %492 = tpu.matmul %491, %477, %cst_209 {dimension_numbers = #tpu.dot_dimension_numbers<[2], [1], [1], [2], [0, 0, 0, 1, 1, 2], [0], [0]>} : vector<2x8x8xbf16>, vector<2x8x8xbf16>, vector<2x8x8xf32> -> vector<2x8x8xf32>
    "tpu.trace_stop"() : () -> ()
    %493 = tpu.concatenate %429, %450, %471, %492 in 2 : vector<2x8x8xf32>, vector<2x8x8xf32>, vector<2x8x8xf32>, vector<2x8x8xf32> -> vector<2x8x32xf32>
    %494 = vector.shape_cast %493 : vector<2x8x32xf32> to vector<16x32xf32>
    %495 = arith.truncf %494 : vector<16x32xf32> to vector<16x32xbf16>
    %c2_210 = arith.constant 2 : index
    %c0_211 = arith.constant 0 : index
    %c0_212 = arith.constant 0 : index
    %496 = vector.load %arg8[%c2_210, %c0_211, %c0_212] : memref<3x32x32xbf16, #tpu.memory_space<vmem>>, vector<1x32x32xbf16>
    %497 = vector.shape_cast %496 : vector<1x32x32xbf16> to vector<32x32xbf16>
    %cst_213 = arith.constant dense<0.000000e+00> : vector<16x32xf32>
    %498 = tpu.matmul %495, %497, %cst_213 {dimension_numbers = #tpu.dot_dimension_numbers<[1], [0], [0], [1], [0, 0, 1, 1], [], []>} : vector<16x32xbf16>, vector<32x32xbf16>, vector<16x32xf32> -> vector<16x32xf32>
    %c2_214 = arith.constant 2 : index
    %c0_215 = arith.constant 0 : index
    %c0_216 = arith.constant 0 : index
    %499 = vector.load %arg9[%c2_214, %c0_215, %c0_216] : memref<3x1x32xf32, #tpu.memory_space<vmem>>, vector<1x1x32xf32>
    %500 = vector.shape_cast %499 : vector<1x1x32xf32> to vector<1x32xf32>
    %501 = vector.broadcast %500 : vector<1x32xf32> to vector<16x32xf32>
    %502 = arith.addf %498, %501 : vector<16x32xf32>
    %503 = arith.addf %383, %502 : vector<16x32xf32>
    %c2_217 = arith.constant 2 : index
    %c0_218 = arith.constant 0 : index
    %c0_219 = arith.constant 0 : index
    %504 = vector.load %arg10[%c2_217, %c0_218, %c0_219] : memref<3x1x32xf32, #tpu.memory_space<vmem>>, vector<1x1x32xf32>
    %505 = vector.shape_cast %504 : vector<1x1x32xf32> to vector<1x32xf32>
    %c2_220 = arith.constant 2 : index
    %c0_221 = arith.constant 0 : index
    %c0_222 = arith.constant 0 : index
    %506 = vector.load %arg11[%c2_220, %c0_221, %c0_222] : memref<3x1x32xf32, #tpu.memory_space<vmem>>, vector<1x1x32xf32>
    %507 = vector.shape_cast %506 : vector<1x1x32xf32> to vector<1x32xf32>
    %cst_223 = arith.constant dense<0.000000e+00> : vector<16xf32>
    %508 = vector.multi_reduction <add>, %503, %cst_223 [1] : vector<16x32xf32> to vector<16xf32>
    %509 = vector.shape_cast %508 : vector<16xf32> to vector<16x1xf32>
    %cst_224 = arith.constant 3.200000e+01 : f32
    %510 = vector.broadcast %cst_224 : f32 to vector<16x1xf32>
    %511 = arith.divf %509, %510 : vector<16x1xf32>
    %512 = vector.broadcast %511 : vector<16x1xf32> to vector<16x32xf32>
    %513 = arith.subf %503, %512 : vector<16x32xf32>
    %514 = arith.mulf %513, %513 : vector<16x32xf32>
    %cst_225 = arith.constant dense<0.000000e+00> : vector<16xf32>
    %515 = vector.multi_reduction <add>, %514, %cst_225 [1] : vector<16x32xf32> to vector<16xf32>
    %516 = vector.shape_cast %515 : vector<16xf32> to vector<16x1xf32>
    %cst_226 = arith.constant 3.200000e+01 : f32
    %517 = vector.broadcast %cst_226 : f32 to vector<16x1xf32>
    %518 = arith.divf %516, %517 : vector<16x1xf32>
    %519 = vector.broadcast %511 : vector<16x1xf32> to vector<16x32xf32>
    %520 = arith.subf %503, %519 : vector<16x32xf32>
    %cst_227 = arith.constant 9.99999974E-6 : f32
    %521 = vector.broadcast %cst_227 : f32 to vector<16x1xf32>
    %522 = arith.addf %518, %521 : vector<16x1xf32>
    %523 = math.rsqrt %522 : vector<16x1xf32>
    %524 = vector.broadcast %523 : vector<16x1xf32> to vector<16x32xf32>
    %525 = arith.mulf %520, %524 : vector<16x32xf32>
    %526 = vector.broadcast %505 : vector<1x32xf32> to vector<16x32xf32>
    %527 = arith.mulf %525, %526 : vector<16x32xf32>
    %528 = vector.broadcast %507 : vector<1x32xf32> to vector<16x32xf32>
    %529 = arith.addf %527, %528 : vector<16x32xf32>
    %530 = arith.truncf %529 : vector<16x32xf32> to vector<16x32xbf16>
    %c2_228 = arith.constant 2 : index
    %c0_229 = arith.constant 0 : index
    %c0_230 = arith.constant 0 : index
    %531 = vector.load %arg12[%c2_228, %c0_229, %c0_230] : memref<3x32x128xbf16, #tpu.memory_space<vmem>>, vector<1x32x128xbf16>
    %532 = vector.shape_cast %531 : vector<1x32x128xbf16> to vector<32x128xbf16>
    %cst_231 = arith.constant dense<0.000000e+00> : vector<16x128xf32>
    %533 = tpu.matmul %530, %532, %cst_231 {dimension_numbers = #tpu.dot_dimension_numbers<[1], [0], [0], [1], [0, 0, 1, 1], [], []>} : vector<16x32xbf16>, vector<32x128xbf16>, vector<16x128xf32> -> vector<16x128xf32>
    %c2_232 = arith.constant 2 : index
    %c0_233 = arith.constant 0 : index
    %c0_234 = arith.constant 0 : index
    %534 = vector.load %arg13[%c2_232, %c0_233, %c0_234] : memref<3x1x128xf32, #tpu.memory_space<vmem>>, vector<1x1x128xf32>
    %535 = vector.shape_cast %534 : vector<1x1x128xf32> to vector<1x128xf32>
    %536 = vector.broadcast %535 : vector<1x128xf32> to vector<16x128xf32>
    %537 = arith.addf %533, %536 : vector<16x128xf32>
    %cst_235 = arith.constant 0.000000e+00 : f32
    %538 = vector.broadcast %cst_235 : f32 to vector<16x128xf32>
    %539 = arith.maximumf %537, %538 : vector<16x128xf32>
    %540 = arith.truncf %539 : vector<16x128xf32> to vector<16x128xbf16>
    %c2_236 = arith.constant 2 : index
    %c0_237 = arith.constant 0 : index
    %c0_238 = arith.constant 0 : index
    %541 = vector.load %arg14[%c2_236, %c0_237, %c0_238] : memref<3x128x32xbf16, #tpu.memory_space<vmem>>, vector<1x128x32xbf16>
    %542 = vector.shape_cast %541 : vector<1x128x32xbf16> to vector<128x32xbf16>
    %cst_239 = arith.constant dense<0.000000e+00> : vector<16x32xf32>
    %543 = tpu.matmul %540, %542, %cst_239 {dimension_numbers = #tpu.dot_dimension_numbers<[1], [0], [0], [1], [0, 0, 1, 1], [], []>} : vector<16x128xbf16>, vector<128x32xbf16>, vector<16x32xf32> -> vector<16x32xf32>
    %c2_240 = arith.constant 2 : index
    %c0_241 = arith.constant 0 : index
    %c0_242 = arith.constant 0 : index
    %544 = vector.load %arg15[%c2_240, %c0_241, %c0_242] : memref<3x1x32xf32, #tpu.memory_space<vmem>>, vector<1x1x32xf32>
    %545 = vector.shape_cast %544 : vector<1x1x32xf32> to vector<1x32xf32>
    %546 = vector.broadcast %545 : vector<1x32xf32> to vector<16x32xf32>
    %547 = arith.addf %543, %546 : vector<16x32xf32>
    %548 = arith.addf %529, %547 : vector<16x32xf32>
    %c2_243 = arith.constant 2 : index
    %c0_244 = arith.constant 0 : index
    %c0_245 = arith.constant 0 : index
    %549 = vector.load %arg16[%c2_243, %c0_244, %c0_245] : memref<3x1x32xf32, #tpu.memory_space<vmem>>, vector<1x1x32xf32>
    %550 = vector.shape_cast %549 : vector<1x1x32xf32> to vector<1x32xf32>
    %c2_246 = arith.constant 2 : index
    %c0_247 = arith.constant 0 : index
    %c0_248 = arith.constant 0 : index
    %551 = vector.load %arg17[%c2_246, %c0_247, %c0_248] : memref<3x1x32xf32, #tpu.memory_space<vmem>>, vector<1x1x32xf32>
    %552 = vector.shape_cast %551 : vector<1x1x32xf32> to vector<1x32xf32>
    %cst_249 = arith.constant dense<0.000000e+00> : vector<16xf32>
    %553 = vector.multi_reduction <add>, %548, %cst_249 [1] : vector<16x32xf32> to vector<16xf32>
    %554 = vector.shape_cast %553 : vector<16xf32> to vector<16x1xf32>
    %cst_250 = arith.constant 3.200000e+01 : f32
    %555 = vector.broadcast %cst_250 : f32 to vector<16x1xf32>
    %556 = arith.divf %554, %555 : vector<16x1xf32>
    %557 = vector.broadcast %556 : vector<16x1xf32> to vector<16x32xf32>
    %558 = arith.subf %548, %557 : vector<16x32xf32>
    %559 = arith.mulf %558, %558 : vector<16x32xf32>
    %cst_251 = arith.constant dense<0.000000e+00> : vector<16xf32>
    %560 = vector.multi_reduction <add>, %559, %cst_251 [1] : vector<16x32xf32> to vector<16xf32>
    %561 = vector.shape_cast %560 : vector<16xf32> to vector<16x1xf32>
    %cst_252 = arith.constant 3.200000e+01 : f32
    %562 = vector.broadcast %cst_252 : f32 to vector<16x1xf32>
    %563 = arith.divf %561, %562 : vector<16x1xf32>
    %564 = vector.broadcast %556 : vector<16x1xf32> to vector<16x32xf32>
    %565 = arith.subf %548, %564 : vector<16x32xf32>
    %cst_253 = arith.constant 9.99999974E-6 : f32
    %566 = vector.broadcast %cst_253 : f32 to vector<16x1xf32>
    %567 = arith.addf %563, %566 : vector<16x1xf32>
    %568 = math.rsqrt %567 : vector<16x1xf32>
    %569 = vector.broadcast %568 : vector<16x1xf32> to vector<16x32xf32>
    %570 = arith.mulf %565, %569 : vector<16x32xf32>
    %571 = vector.broadcast %550 : vector<1x32xf32> to vector<16x32xf32>
    %572 = arith.mulf %570, %571 : vector<16x32xf32>
    %573 = vector.broadcast %552 : vector<1x32xf32> to vector<16x32xf32>
    %574 = arith.addf %572, %573 : vector<16x32xf32>
    %575 = vector.shape_cast %574 : vector<16x32xf32> to vector<2x8x32xf32>
    %c0_254 = arith.constant 0 : index
    %c0_255 = arith.constant 0 : index
    %c0_256 = arith.constant 0 : index
    %576 = vector.load %arg18[%c0_254, %c0_255, %c0_256] : memref<2x8x32xf32, #tpu.memory_space<vmem>>, vector<2x8x32xf32>
    tpu.vector_store %arg18[%c0_254, %c0_255, %c0_256], %575 {strides = array<i32>} : memref<2x8x32xf32, #tpu.memory_space<vmem>>, vector<2x8x32xf32>,
    return
  }
  func.func @transform_0(%arg0: i32) -> (i32, i32, i32) {
    %c0_i32 = arith.constant 0 : i32
    %c0_i32_0 = arith.constant 0 : i32
    %c0_i32_1 = arith.constant 0 : i32
    return %arg0, %c0_i32, %c0_i32_0 : i32, i32, i32
  }
  func.func @transform_1(%arg0: i32) -> (i32, i32, i32) {
    %c0_i32 = arith.constant 0 : i32
    %c0_i32_0 = arith.constant 0 : i32
    %c0_i32_1 = arith.constant 0 : i32
    %c0_i32_2 = arith.constant 0 : i32
    return %c0_i32, %c0_i32_0, %c0_i32_1 : i32, i32, i32
  }
  func.func @transform_2(%arg0: i32) -> (i32, i32, i32) {
    %c0_i32 = arith.constant 0 : i32
    %c0_i32_0 = arith.constant 0 : i32
    %c0_i32_1 = arith.constant 0 : i32
    %c0_i32_2 = arith.constant 0 : i32
    return %c0_i32, %c0_i32_0, %c0_i32_1 : i32, i32, i32
  }
  func.func @transform_3(%arg0: i32) -> (i32, i32, i32) {
    %c0_i32 = arith.constant 0 : i32
    %c0_i32_0 = arith.constant 0 : i32
    %c0_i32_1 = arith.constant 0 : i32
    %c0_i32_2 = arith.constant 0 : i32
    return %c0_i32, %c0_i32_0, %c0_i32_1 : i32, i32, i32
  }
  func.func @transform_4(%arg0: i32) -> (i32, i32, i32) {
    %c0_i32 = arith.constant 0 : i32
    %c0_i32_0 = arith.constant 0 : i32
    %c0_i32_1 = arith.constant 0 : i32
    %c0_i32_2 = arith.constant 0 : i32
    return %c0_i32, %c0_i32_0, %c0_i32_1 : i32, i32, i32
  }
  func.func @transform_5(%arg0: i32) -> (i32, i32, i32) {
    %c0_i32 = arith.constant 0 : i32
    %c0_i32_0 = arith.constant 0 : i32
    %c0_i32_1 = arith.constant 0 : i32
    %c0_i32_2 = arith.constant 0 : i32
    return %c0_i32, %c0_i32_0, %c0_i32_1 : i32, i32, i32
  }
  func.func @transform_6(%arg0: i32) -> (i32, i32, i32) {
    %c0_i32 = arith.constant 0 : i32
    %c0_i32_0 = arith.constant 0 : i32
    %c0_i32_1 = arith.constant 0 : i32
    %c0_i32_2 = arith.constant 0 : i32
    return %c0_i32, %c0_i32_0, %c0_i32_1 : i32, i32, i32
  }
  func.func @transform_7(%arg0: i32) -> (i32, i32, i32) {
    %c0_i32 = arith.constant 0 : i32
    %c0_i32_0 = arith.constant 0 : i32
    %c0_i32_1 = arith.constant 0 : i32
    %c0_i32_2 = arith.constant 0 : i32
    return %c0_i32, %c0_i32_0, %c0_i32_1 : i32, i32, i32
  }
  func.func @transform_8(%arg0: i32) -> (i32, i32, i32) {
    %c0_i32 = arith.constant 0 : i32
    %c0_i32_0 = arith.constant 0 : i32
    %c0_i32_1 = arith.constant 0 : i32
    %c0_i32_2 = arith.constant 0 : i32
    return %c0_i32, %c0_i32_0, %c0_i32_1 : i32, i32, i32
  }
  func.func @transform_9(%arg0: i32) -> (i32, i32, i32) {
    %c0_i32 = arith.constant 0 : i32
    %c0_i32_0 = arith.constant 0 : i32
    %c0_i32_1 = arith.constant 0 : i32
    %c0_i32_2 = arith.constant 0 : i32
    return %c0_i32, %c0_i32_0, %c0_i32_1 : i32, i32, i32
  }
  func.func @transform_10(%arg0: i32) -> (i32, i32, i32) {
    %c0_i32 = arith.constant 0 : i32
    %c0_i32_0 = arith.constant 0 : i32
    %c0_i32_1 = arith.constant 0 : i32
    %c0_i32_2 = arith.constant 0 : i32
    return %c0_i32, %c0_i32_0, %c0_i32_1 : i32, i32, i32
  }
  func.func @transform_11(%arg0: i32) -> (i32, i32, i32) {
    %c0_i32 = arith.constant 0 : i32
    %c0_i32_0 = arith.constant 0 : i32
    %c0_i32_1 = arith.constant 0 : i32
    %c0_i32_2 = arith.constant 0 : i32
    return %c0_i32, %c0_i32_0, %c0_i32_1 : i32, i32, i32
  }
  func.func @transform_12(%arg0: i32) -> (i32, i32, i32) {
    %c0_i32 = arith.constant 0 : i32
    %c0_i32_0 = arith.constant 0 : i32
    %c0_i32_1 = arith.constant 0 : i32
    %c0_i32_2 = arith.constant 0 : i32
    return %c0_i32, %c0_i32_0, %c0_i32_1 : i32, i32, i32
  }
  func.func @transform_13(%arg0: i32) -> (i32, i32, i32) {
    %c0_i32 = arith.constant 0 : i32
    %c0_i32_0 = arith.constant 0 : i32
    %c0_i32_1 = arith.constant 0 : i32
    %c0_i32_2 = arith.constant 0 : i32
    return %c0_i32, %c0_i32_0, %c0_i32_1 : i32, i32, i32
  }
  func.func @transform_14(%arg0: i32) -> (i32, i32, i32) {
    %c0_i32 = arith.constant 0 : i32
    %c0_i32_0 = arith.constant 0 : i32
    %c0_i32_1 = arith.constant 0 : i32
    %c0_i32_2 = arith.constant 0 : i32
    return %c0_i32, %c0_i32_0, %c0_i32_1 : i32, i32, i32
  }
  func.func @transform_15(%arg0: i32) -> (i32, i32, i32) {
    %c0_i32 = arith.constant 0 : i32
    %c0_i32_0 = arith.constant 0 : i32
    %c0_i32_1 = arith.constant 0 : i32
    %c0_i32_2 = arith.constant 0 : i32
    return %c0_i32, %c0_i32_0, %c0_i32_1 : i32, i32, i32
  }
  func.func @transform_16(%arg0: i32) -> (i32, i32, i32) {
    %c0_i32 = arith.constant 0 : i32
    %c0_i32_0 = arith.constant 0 : i32
    %c0_i32_1 = arith.constant 0 : i32
    %c0_i32_2 = arith.constant 0 : i32
    return %c0_i32, %c0_i32_0, %c0_i32_1 : i32, i32, i32
  }
  func.func @transform_17(%arg0: i32) -> (i32, i32, i32) {
    %c0_i32 = arith.constant 0 : i32
    %c0_i32_0 = arith.constant 0 : i32
    %c0_i32_1 = arith.constant 0 : i32
    return %arg0, %c0_i32, %c0_i32_0 : i32, i32, i32
  }
}

</mosaic_0001>

<bundles_post_ra>
// kernel: tpu_custom_call.1
= control target key start
LH: loop header
LB: loop body
LE: loop exit
PB: predicated region body
PF: predicated region fallthrough
CT: control target
= control target key end

     0   :  { %s7036_s0 = inlined_call_operand.hbm [shape: f32[2,8,32], index: 0, kind: input, shape index: {}]   ;;  %s7037_s1 = inlined_call_operand.vmem [shape: bf16[3,32,32], index: 1, kind: input, shape index: {}]   ;;  %s7038_s2 = inlined_call_operand.hbm [shape: f32[3,1,32], index: 2, kind: input, shape index: {}]   ;;  %s7039_s3 = inlined_call_operand.vmem [shape: bf16[3,32,32], index: 3, kind: input, shape index: {}]   ;;  %s7040_s4 = inlined_call_operand.hbm [shape: f32[3,1,32], index: 4, kind: input, shape index: {}]   ;;  %s7041_s5 = inlined_call_operand.vmem [shape: bf16[3,32,32], index: 5, kind: input, shape index: {}]   ;;  %s7042_s6 = inlined_call_operand.hbm [shape: f32[3,1,32], index: 6, kind: input, shape index: {}]   ;;  %s7043_s7 = inlined_call_operand.vmem [shape: bf16[3,32,32], index: 7, kind: input, shape index: {}]   ;;  %s7044_s8 = inlined_call_operand.hbm [shape: f32[3,1,32], index: 8, kind: input, shape index: {}]   ;;  %s7045_s9 = inlined_call_operand.hbm [shape: f32[3,1,32], index: 9, kind: input, shape index: {}]   ;;  %s7046_s10 = inlined_call_operand.hbm [shape: f32[3,1,32], index: 10, kind: input, shape index: {}]   ;;  %s7047_s11 = inlined_call_operand.vmem [shape: bf16[3,32,128], index: 11, kind: input, shape index: {}]   ;;  %s7048_s12 = inlined_call_operand.hbm [shape: f32[3,1,128], index: 12, kind: input, shape index: {}]   ;;  %s7049_s13 = inlined_call_operand.vmem [shape: bf16[3,128,32], index: 13, kind: input, shape index: {}]   ;;  %s7050_s14 = inlined_call_operand.vmem [shape: f32[3,1,32], index: 14, kind: input, shape index: {}]   ;;  %s7051_s15 = inlined_call_operand.vmem [shape: f32[3,1,32], index: 15, kind: input, shape index: {}]   ;;  %s7052_s16 = inlined_call_operand.vmem [shape: f32[3,1,32], index: 16, kind: input, shape index: {}]   ;;  %s7053_s17 = inlined_call_operand.hbm [shape: f32[2,8,32], index: 17, kind: output, shape index: {}]  }
   0x1   :  { %7057 = sst [smem:[#allocation23_spill]] %s7036_s0 }
   0x2   :  { %7058 = sst [smem:[#allocation24_spill]] %s7037_s1 }
   0x3   :  { %7059 = sst [smem:[#allocation25_spill]] %s7053_s17 }
   0x4   :  { %22 = vsyncpa [#allocation3], 0 }
   0x5   :  { %23 = vsyncpa [#allocation6], 0 }
   0x6   :  { %24 = vsyncpa [#allocation9], 0 }
   0x7   :  { %25 = vsyncpa [#allocation12], 0 }
   0x8   :  { %26 = vsyncpa [#allocation15], 0 }
   0x9   :  { %27 = vsyncpa [#allocation4], 0  ;;  %s5910_s24 = smov [#allocation5]   ;;  %s5700_s28 = scalar_lea.hbm %s7038_s2, 48 }
   0xa   :  { %s47_s25 = sshll.u32 %s5910_s24, 4  ;;  %p5701_p0 = scmp.ne.s32.totalorder %s7038_s2, %s5700_s28  ;;  %s48_s25 = int_to_ptr.vmem [resolvable:$true] %s47_s25 }
   0xb   :  { %p5704_p1 = scmp.lt.u32.totalorder %s5700_s28, %s7038_s2 }
   0xd   :  { %p5706_p2 = pnand %p5704_p1, %p5701_p0 }
   0xf   :  { %5709 = shalt.err (!%p5706_p2)
}
  0x10   :  { %s5710_s19 = scalar_lea.vmem %s48_s25, 48  ;;  %s5714_s1 = scalar_lea.vmem %s48_s25, 64 }
  0x11   :  { %p5711_p3 = scmp.ne.s32.totalorder %s48_s25, %s5710_s19  ;;  %p5715_p4 = scmp.lt.s32.totalorder %s48_s25, %s48_s25 }
  0x12   :  { %p5716_p5 = scmp.lt.s32.totalorder %s5714_s1, %s5710_s19 }
  0x14   :  { %p5717_p6 = por %p5716_p5, %p5715_p4 }
  0x16   :  { %p5718_p7 = pnand %p5717_p6, %p5711_p3 }
  0x18   :  { %5721 = shalt.err (!%p5718_p7)
}
  0x19   :  { %s5911_s20 = smov 16   ;;  %s5912_s21 = smov 1  }
  0x1a   :  { %53 = dma.hbm_to_vmem [thread:$0]  %s7038_s2, 48, %s48_s25, [#allocation6], %s5911_s20, %s5911_s20, %s5912_s21  }
  0x1b   :  { %s5913_s24 = smov [#allocation8]   ;;  %s5914_s27 = smov [#allocation11]  }
  0x1c   :  { %s75_s26 = sshll.u32 %s5913_s24, 4  ;;  %s101_s28 = sshll.u32 %s5914_s27, 4  ;;  %s76_s26 = int_to_ptr.vmem [resolvable:$true] %s75_s26  ;;  %s102_s28 = int_to_ptr.vmem [resolvable:$true] %s101_s28 }
  0x1d   :  { %s5722_s30 = scalar_lea.hbm %s7042_s6, 48 }
  0x1e   :  { %p5723_p8 = scmp.ne.s32.totalorder %s7042_s6, %s5722_s30  ;;  %p5726_p9 = scmp.lt.u32.totalorder %s5722_s30, %s7042_s6 }
  0x20   :  { %p5728_p10 = pnand %p5726_p9, %p5723_p8 }
  0x22   :  { %5731 = shalt.err (!%p5728_p10)
}
  0x23   :  { %s5732_s2 = scalar_lea.vmem %s76_s26, 48  ;;  %s5736_s25 = scalar_lea.vmem %s76_s26, 64 }
  0x24   :  { %p5733_p11 = scmp.ne.s32.totalorder %s76_s26, %s5732_s2  ;;  %p5737_p12 = scmp.lt.s32.totalorder %s76_s26, %s76_s26 }
  0x25   :  { %p5738_p13 = scmp.lt.s32.totalorder %s5736_s25, %s5732_s2 }
  0x27   :  { %p5739_p0 = por %p5738_p13, %p5737_p12 }
  0x29   :  { %p5740_p1 = pnand %p5739_p0, %p5733_p11 }
  0x2b   :  { %5743 = shalt.err (!%p5740_p1)
}
  0x2c   :  { %81 = dma.hbm_to_vmem [thread:$0]  %s7042_s6, 48, %s76_s26, [#allocation9], %s5911_s20, %s5911_s20, %s5912_s21  }
  0x2d   :  { %s5744_s27 = scalar_lea.hbm %s7045_s9, 48 }
  0x2e   :  { %p5745_p2 = scmp.ne.s32.totalorder %s7045_s9, %s5744_s27  ;;  %p5748_p3 = scmp.lt.u32.totalorder %s5744_s27, %s7045_s9 }
  0x30   :  { %p5750_p4 = pnand %p5748_p3, %p5745_p2 }
  0x32   :  { %5753 = shalt.err (!%p5750_p4)
}
  0x33   :  { %s5754_s19 = scalar_lea.vmem %s102_s28, 48  ;;  %s5758_s1 = scalar_lea.vmem %s102_s28, 64 }
  0x34   :  { %p5755_p5 = scmp.ne.s32.totalorder %s102_s28, %s5754_s19  ;;  %p5759_p6 = scmp.lt.s32.totalorder %s102_s28, %s102_s28 }
  0x35   :  { %p5760_p7 = scmp.lt.s32.totalorder %s5758_s1, %s5754_s19 }
  0x37   :  { %p5761_p8 = por %p5760_p7, %p5759_p6 }
  0x39   :  { %p5762_p9 = pnand %p5761_p8, %p5755_p5 }
  0x3b   :  { %5765 = shalt.err (!%p5762_p9)
}
  0x3c   :  { %107 = dma.hbm_to_vmem [thread:$0]  %s7045_s9, 48, %s102_s28, [#allocation12], %s5911_s20, %s5911_s20, %s5912_s21  }
  0x3d   :  { %s5915_s2 = smov [#allocation2]   ;;  %s7060_s17 = sld [smem:[#allocation23_spill]] }
  0x3e   :  { %s33_s25 = sshll.u32 %s5915_s2, 4  ;;  %s34_s25 = int_to_ptr.vmem [resolvable:$true] %s33_s25 }
  0x43   :  { %s5766_s24 = scalar_lea.hbm %s7060_s17, 256 }
  0x44   :  { %p5767_p10 = scmp.ne.s32.totalorder %s7060_s17, %s5766_s24  ;;  %p5770_p11 = scmp.lt.u32.totalorder %s5766_s24, %s7060_s17 }
  0x46   :  { %p5772_p12 = pnand %p5770_p11, %p5767_p10 }
  0x48   :  { %5775 = shalt.err (!%p5772_p12)
}
  0x49   :  { %s5776_s18 = scalar_lea.vmem %s34_s25, 256  ;;  %p5781_p0 = scmp.lt.s32.totalorder %s34_s25, %s34_s25 }
  0x4a   :  { %p5777_p13 = scmp.ne.s32.totalorder %s34_s25, %s5776_s18  ;;  %p5782_p1 = scmp.lt.s32.totalorder %s5776_s18, %s5776_s18 }
  0x4c   :  { %p5783_p2 = por %p5782_p1, %p5781_p0 }
  0x4e   :  { %p5784_p3 = pnand %p5783_p2, %p5777_p13 }
  0x50   :  { %5787 = shalt.err (!%p5784_p3)
}
  0x51   :  { %s5916_s9 = smov 128   ;;  %s5917_s28 = smov 8  }
  0x52   :  { %39 = dma.hbm_to_vmem [thread:$0]  %s7060_s17, 256, %s34_s25, [#allocation3], %s5916_s9, %s5916_s9, %s5917_s28  }
  0x53   :  { %s5918_s6 = smov [#allocation7]   ;;  %s5919_s2 = smov [#allocation10]  }
  0x54   :  { %s61_s26 = sshll.u32 %s5918_s6, 4  ;;  %s89_s22 = sshll.u32 %s5919_s2, 4  ;;  %s62_s26 = int_to_ptr.vmem [resolvable:$true] %s61_s26  ;;  %s6079_s22 = int_to_ptr.vmem [resolvable:$true] %s89_s22 }
  0x55   :  { %s5788_s27 = scalar_lea.hbm %s7040_s4, 48 }
  0x56   :  { %p5789_p4 = scmp.ne.s32.totalorder %s7040_s4, %s5788_s27  ;;  %p5792_p5 = scmp.lt.u32.totalorder %s5788_s27, %s7040_s4 }
  0x58   :  { %p5794_p6 = pnand %p5792_p5, %p5789_p4 }
  0x5a   :  { %5797 = shalt.err (!%p5794_p6)
}
  0x5b   :  { %s5798_s25 = scalar_lea.vmem %s62_s26, 48  ;;  %s5802_s17 = scalar_lea.vmem %s62_s26, 64 }
  0x5c   :  { %p5799_p7 = scmp.ne.s32.totalorder %s62_s26, %s5798_s25  ;;  %p5803_p8 = scmp.lt.s32.totalorder %s62_s26, %s62_s26 }
  0x5d   :  { %p5804_p9 = scmp.lt.s32.totalorder %s5802_s17, %s5798_s25 }
  0x5f   :  { %p5805_p10 = por %p5804_p9, %p5803_p8 }
  0x61   :  { %p5806_p11 = pnand %p5805_p10, %p5799_p7 }
  0x63   :  { %5809 = shalt.err (!%p5806_p11)
}
  0x64   :  { %67 = dma.hbm_to_vmem [thread:$0]  %s7040_s4, 48, %s62_s26, [#allocation6], %s5911_s20, %s5911_s20, %s5912_s21  }
  0x65   :  { %s5810_s23 = scalar_lea.hbm %s7044_s8, 48 }
  0x66   :  { %p5811_p12 = scmp.ne.s32.totalorder %s7044_s8, %s5810_s23  ;;  %p5814_p13 = scmp.lt.u32.totalorder %s5810_s23, %s7044_s8 }
  0x68   :  { %p5816_p0 = pnand %p5814_p13, %p5811_p12 }
  0x6a   :  { %5819 = shalt.err (!%p5816_p0)
}
  0x6b   :  { %s5820_s30 = scalar_lea.vmem %s6079_s22, 48  ;;  %s5824_s4 = scalar_lea.vmem %s6079_s22, 64 }
  0x6c   :  { %p5821_p1 = scmp.ne.s32.totalorder %s6079_s22, %s5820_s30  ;;  %p5825_p2 = scmp.lt.s32.totalorder %s6079_s22, %s6079_s22 }
  0x6d   :  { %p5826_p3 = scmp.lt.s32.totalorder %s5824_s4, %s5820_s30 }
  0x6f   :  { %p5827_p4 = por %p5826_p3, %p5825_p2 }
  0x71   :  { %p5828_p5 = pnand %p5827_p4, %p5821_p1 }
  0x73   :  { %5831 = shalt.err (!%p5828_p5)
}
  0x74   :  { %95 = dma.hbm_to_vmem [thread:$0]  %s7044_s8, 48, %s6079_s22, [#allocation9], %s5911_s20, %s5911_s20, %s5912_s21  }
  0x75   :  { %s5920_s25 = smov [#allocation13]   ;;  %s5921_s19 = smov [#allocation14]  }
  0x76   :  { %s113_s17 = sshll.u32 %s5920_s25, 4  ;;  %s127_s1 = sshll.u32 %s5921_s19, 4  ;;  %s114_s17 = int_to_ptr.vmem [resolvable:$true] %s113_s17  ;;  %s6117_s1 = int_to_ptr.vmem [resolvable:$true] %s127_s1 }
  0x77   :  { %s5832_s23 = scalar_lea.hbm %s7046_s10, 48 }
  0x78   :  { %p5833_p6 = scmp.ne.s32.totalorder %s7046_s10, %s5832_s23  ;;  %p5836_p7 = scmp.lt.u32.totalorder %s5832_s23, %s7046_s10 }
  0x7a   :  { %p5838_p8 = pnand %p5836_p7, %p5833_p6 }
  0x7c   :  { %5841 = shalt.err (!%p5838_p8)
}
  0x7d   :  { %s5842_s8 = scalar_lea.vmem %s114_s17, 48  ;;  %s5846_s22 = scalar_lea.vmem %s114_s17, 64 }
  0x7e   :  { %p5843_p9 = scmp.ne.s32.totalorder %s114_s17, %s5842_s8  ;;  %p5847_p10 = scmp.lt.s32.totalorder %s114_s17, %s114_s17 }
  0x7f   :  { %p5848_p11 = scmp.lt.s32.totalorder %s5846_s22, %s5842_s8 }
  0x81   :  { %p5849_p12 = por %p5848_p11, %p5847_p10 }
  0x83   :  { %p5850_p13 = pnand %p5849_p12, %p5843_p9 }
  0x85   :  { %5853 = shalt.err (!%p5850_p13)
}
  0x86   :  { %119 = dma.hbm_to_vmem [thread:$0]  %s7046_s10, 48, %s114_s17, [#allocation12], %s5911_s20, %s5911_s20, %s5912_s21  }
  0x87   :  { %s5854_s25 = scalar_lea.hbm %s7048_s12, 48 }
  0x88   :  { %p5855_p0 = scmp.ne.s32.totalorder %s7048_s12, %s5854_s25  ;;  %p5858_p1 = scmp.lt.u32.totalorder %s5854_s25, %s7048_s12 }
  0x8a   :  { %p5860_p2 = pnand %p5858_p1, %p5855_p0 }
  0x8c   :  { %5863 = shalt.err (!%p5860_p2)
}
  0x8d   :  { %s5864_s24 = scalar_lea.vmem %s6117_s1, 48  ;;  %s5868_s10 = scalar_lea.vmem %s6117_s1, 64 }
  0x8e   :  { %p5865_p3 = scmp.ne.s32.totalorder %s6117_s1, %s5864_s24  ;;  %p5869_p4 = scmp.lt.s32.totalorder %s6117_s1, %s6117_s1 }
  0x8f   :  { %p5870_p5 = scmp.lt.s32.totalorder %s5868_s10, %s5864_s24 }
  0x91   :  { %p5871_p6 = por %p5870_p5, %p5869_p4 }
  0x93   :  { %p5872_p7 = pnand %p5871_p6, %p5865_p3 }
  0x95   :  { %5875 = shalt.err (!%p5872_p7)
}
  0x96   :  { %133 = dma.hbm_to_vmem [thread:$0]  %s7048_s12, 48, %s6117_s1, [#allocation15], %s5911_s20, %s5911_s20, %s5912_s21  }
  0x97   :  { %5898 = dma.done.wait [#allocation3], 256  }
  0x98   :  { %5899 = vsyncadd [#allocation3], 4294967040 }
  0x99   :  { %5900 = dma.done.wait [#allocation6], 96  }
  0x9a   :  { %5901 = vsyncadd [#allocation6], 4294967200 }
  0x9b   :  { %5902 = dma.done.wait [#allocation9], 96  }
  0x9c   :  { %5903 = vsyncadd [#allocation9], 4294967200 }
  0x9d   :  { %5904 = dma.done.wait [#allocation12], 96  }
  0x9e   :  { %5905 = vsyncadd [#allocation12], 4294967200 }
  0x9f   :  { %5906 = dma.done.wait [#allocation15], 48  }
  0xa0   :  { %5907 = vsyncadd [#allocation15], 4294967248  ;;  %v5922_v0 = vmov 0.0   ;;  %vm5923_vm0 = vmmov 0   ;;  %s7061_s1 = sld [smem:[#allocation24_spill]]  ;;  %v6167_v3 = vld [vmem:[#allocation2] sm:$0xff] }
  0xa1   :  { %4994 = vmatprep.subr.bf16.mxu0 %v5922_v0  ;;  %4998 = vmatprep.mubr.msk.bf16.mxu0 %vm5923_vm0, %v5922_v0  ;;  %v6169_v4 = vld [vmem:[#allocation2 + $0x8] sm:$0xff]  ;;  %vm193_vm1 = vcmask 261120   ;;  %v5528_v5 = vld [vmem:[%s7039_s3] sm:$0xff]   ;;  %v4605_v14 = vld [vmem:[#allocation7] ss:$0 sm:$0xff]  ;;  %vm372_vm2 = vcmask 64512  }
  0xa2   :  { %5018 = vmatprep.subr.bf16.mxu1 %v5922_v0  ;;  %5020 = vmatprep.mubr.msk.bf16.mxu1 %vm5923_vm0, %v5922_v0  ;;  %v169_v6 = vpack.c.bf16 %v6169_v4, %v6167_v3  ;;  %v5529_v7 = vld [vmem:[%s7039_s3 + $0x8] sm:$0xff]   ;;  %v5530_v8 = vld [vmem:[%s7041_s5] sm:$0xff]   ;;  %v4601_v22 = vld [vmem:[#allocation5] ss:$0 sm:$0xff]  ;;  %s5924_s6 = smov 120   ;;  %vm494_vm3 = vcmask 1043456  }
  0xa3   :  { %v5531_v9 = vld [vmem:[%s7041_s5 + $0x8] sm:$0xff]   ;;  %v4609_v31 = vld [vmem:[#allocation8] ss:$0 sm:$0xff]  ;;  %s5925_s2 = smov 112   ;;  %s5926_s23 = smov 104   ;;  %vm1282_vm4 = vcmask 130048  }
  0xa4   :  { %s5927_s12 = smov 24   ;;  %vm1285_vm5 = vcmask 195584  }
  0xa6   :  { %v5526_v1 = vld [vmem:[%s7061_s1] sm:$0xff]   ;;  %v5527_v2 = vld [vmem:[%s7061_s1 + $0x8] sm:$0xff]  }
  0xa7   :  { %4995 = vmatpush3.bf16.msra.mxu0 %v5526_v1 }
  0xa8   :  { %4996 = vmatprep.subr.bf16.mxu0 %v5922_v0 }
  0xab   :  { %4997 = vmatpush3.bf16.msra.mxu0 %v5527_v2 }
  0xac   :  { %5002 = vmatprep.subr.bf16.mxu0 %v5922_v0 }
  0xae   :  { %4999 = vmatmul.mubr.msk.bf16.vlgmr.msra.gmra.mrb[0].mxu0 %vm193_vm1, %v169_v6 }
  0xaf   :  { %5003 = vmatpush3.bf16.msra.mxu0 %v5528_v5  ;;  %5006 = vmatprep.mubr.msk.bf16.mxu0 %vm5923_vm0, %v5922_v0 }
  0xb0   :  { %5004 = vmatprep.subr.bf16.mxu0 %v5922_v0 }
  0xb3   :  { %5005 = vmatpush3.bf16.msra.mxu0 %v5529_v7 }
  0xb4   :  { %5010 = vmatprep.subr.bf16.mxu0 %v5922_v0 }
  0xb6   :  { %5007 = vmatmul.mubr.msk.bf16.vlgmr.msra.gmra.mrb[4].mxu0 %vm193_vm1, %v169_v6 }
  0xb7   :  { %5014 = vmatprep.mubr.msk.bf16.mxu0 %vm5923_vm0, %v5922_v0  ;;  %5011 = vmatpush3.bf16.msra.mxu0 %v5530_v8 }
  0xb8   :  { %5012 = vmatprep.subr.bf16.mxu0 %v5922_v0 }
  0xbb   :  { %5013 = vmatpush3.bf16.msra.mxu0 %v5531_v9 }
  0xbc   :  { %5024 = vmatprep.subr.bf16.mxu0 %v5922_v0 }
  0xbe   :  { %5015 = vmatmul.mubr.msk.bf16.vlgmr.msra.gmra.mrb[8].mxu0 %vm193_vm1, %v169_v6 }
  0xbf   :  { %5026 = vmatprep.mubr.msk.bf16.mxu0 %vm5923_vm0, %v5922_v0 }
 0x181   :  { %v231_v10 = vpop.f32.mrb[0].mxu0 }
 0x182   :  { %v5000_v11 = vpop.f32.mrb[1].mxu0  ;;  %v232_v25 = vadd.f32 %v4601_v22, %v231_v10 }
 0x183   :  { %v234_v12 = vpop.f32.mrb[2].mxu0 }
 0x184   :  { %v5001_v13 = vpop.f32.mrb[3].mxu0  ;;  %v235_v27 = vadd.f32 %v4601_v22, %v234_v12  ;;  %v6212_v28 = vpack.c.bf16 %v232_v25, %v232_v25 }
 0x186   :  { %v6214_v29 = vpack.c.bf16 %v235_v27, %v235_v27 }
 0x189   :  { %v295_v15 = vpop.f32.mrb[4].mxu0 }
 0x18a   :  { %v296_v16 = vadd.f32 %v4605_v14, %v295_v15  ;;  %v5008_v17 = vpop.f32.mrb[5].mxu0 }
 0x18b   :  { %v298_v18 = vpop.f32.mrb[6].mxu0 }
 0x18c   :  { %v6200_v19 = vpack.c.bf16 %v296_v16, %v296_v16  ;;  %v299_v20 = vadd.f32 %v4605_v14, %v298_v18  ;;  %v5009_v21 = vpop.f32.mrb[7].mxu0 }
 0x18e   :  { %v6202_v23 = vpack.c.bf16 %v299_v20, %v299_v20  ;;  %v377_v24 = vsel %vm372_vm2, %v6200_v19, 0 }
 0x18f   :  { %5019 = vmatpush3.bf16.xpose.msra.mxu1 %v377_v24 }
 0x190   :  { %640 = vrot.lane.b32.xlu1 %v6202_v23, %s5924_s6  ;;  %v423_v26 = vsel %vm372_vm2, %v6202_v23, 0  ;;  %5030 = vmatprep.subr.bf16.mxu1 %v5922_v0 }
 0x191   :  { %5025 = vmatpush3.bf16.xpose.msra.mxu0 %v423_v26  ;;  %v359_v30 = vpop.f32.mrb[8].mxu0 }
 0x192   :  { %5036 = vmatprep.subr.bf16.mxu0 %v5922_v0  ;;  %v5016_v32 = vpop.f32.mrb[9].mxu0  ;;  %v360_v35 = vadd.f32 %v4609_v31, %v359_v30 }
 0x193   :  { %v362_v33 = vpop.f32.mrb[10].mxu0 }
 0x194   :  { %v5017_v34 = vpop.f32.mrb[11].mxu0  ;;  %v363_v36 = vadd.f32 %v4609_v31, %v362_v33  ;;  %v6224_v37 = vpack.c.bf16 %v360_v35, %v360_v35 }
 0x196   :  { %5021 = vmatmul.mubr.msk.bf16.vlgmr.msra.gmra.mrb[0].mxu1 %vm372_vm2, %v6212_v28  ;;  %v6226_v38 = vpack.c.bf16 %v363_v36, %v363_v36  ;;  %v496_v39 = vsel %vm494_vm3, %v6224_v37, 0 }
 0x197   :  { %5032 = vmatprep.mubr.msk.bf16.mxu1 %vm5923_vm0, %v5922_v0  ;;  %5031 = vmatpush3.bf16.msra.mxu1 %v496_v39 }
 0x198   :  { %5027 = vmatmul.mubr.msk.bf16.vlgmr.msra.gmra.mrb[12].mxu0 %vm372_vm2, %v6214_v29  ;;  %v542_v40 = vsel %vm494_vm3, %v6226_v38, 0  ;;  %5042 = vmatprep.subr.bf16.mxu1 %v5922_v0 }
 0x199   :  { %5038 = vmatprep.mubr.msk.bf16.mxu0 %vm5923_vm0, %v5922_v0  ;;  %5037 = vmatpush3.bf16.msra.mxu0 %v542_v40 }
 0x19a   :  { %5048 = vmatprep.subr.bf16.mxu0 %v5922_v0 }
 0x202   :  { %v641_v63 = vpop.permute.xlu1 %640 }
 0x203   :  { %v646_v13 = vsel %vm372_vm2, %v641_v63, 0 }
 0x269   :  { %v413_v41 = vpop.f32.mrb[0].mxu1 }
 0x26a   :  { %v465_v42 = vmul.f32 0.35355338, %v413_v41  ;;  %v5022_v43 = vpop.f32.mrb[1].mxu1 }
 0x26b   :  { %v416_v44 = vpop.f32.mrb[2].mxu1  ;;  %v459_v45 = vpop.f32.mrb[12].mxu0 }
 0x26c   :  { %v466_v46 = vmul.f32 0.35355338, %v459_v45  ;;  %v5023_v47 = vpop.f32.mrb[3].mxu1  ;;  %v5028_v48 = vpop.f32.mrb[13].mxu0  ;;  %v467_v49 = vsel %vm372_vm2, %v465_v42, -inf }
 0x26d   :  { %468 = vmax.xlane.f32.xlu0 %v467_v49  ;;  %v462_v50 = vpop.f32.mrb[14].mxu0 }
 0x26e   :  { %v5029_v51 = vpop.f32.mrb[15].mxu0  ;;  %v470_v52 = vsel %vm372_vm2, %v466_v46, -inf }
 0x271   :  { %471 = vmax.xlane.f32.xlu0 %v470_v52 }
 0x287   :  { %588 = vrot.lane.b32.xlu0 %v6200_v19, %s5924_s6 }
 0x2fa   :  { %v469_v53 = vpop.xlane.xlu0 %468 }
 0x2fb   :  { %v473_v54 = vsub.f32 %v465_v42, %v469_v53 }
 0x2fd   :  { %v475_v55 = vmul.f32 1.442695, %v473_v54 }
 0x2fe   :  { %v472_v56 = vpop.xlane.xlu0 %471 }
 0x2ff   :  { %5580 = vpow2.f32 %v475_v55  ;;  %v474_v57 = vsub.f32 %v466_v46, %v472_v56 }
 0x301   :  { %v477_v58 = vmul.f32 1.442695, %v474_v57 }
 0x302   :  { %v589_v7 = vpop.permute.xlu0 %588 }
 0x303   :  { %5582 = vpow2.f32 %v477_v58  ;;  %v594_v10 = vsel %vm372_vm2, %v589_v7, 0 }
 0x309   :  { %v5581_v59 = vpop.eup %5580 }
 0x30a   :  { %v479_v60 = vsel %vm372_vm2, %v5581_v59, 0.0 }
 0x30b   :  { %480 = vadd.xlane.f32.xlu1 %v479_v60 }
 0x30d   :  { %v5583_v61 = vpop.eup %5582 }
 0x30e   :  { %v482_v62 = vsel %vm372_vm2, %v5583_v61, 0.0 }
 0x30f   :  { %483 = vadd.xlane.f32.xlu1 %v482_v62 }
 0x320   :  { %585 = vrot.lane.b32.xlu1 %v6212_v28, %s5924_s6 }
 0x324   :  { %637 = vrot.lane.b32.xlu1 %v6214_v29, %s5924_s6 }
 0x398   :  { %v481_v1 = vpop.xlane.xlu1 %480 }
 0x399   :  { %5584 = vrcp.f32 %v481_v1 }
 0x39c   :  { %v484_v2 = vpop.xlane.xlu1 %483 }
 0x39d   :  { %5586 = vrcp.f32 %v484_v2 }
 0x3a0   :  { %v586_v14 = vpop.permute.xlu1 %585 }
 0x3a3   :  { %v5585_v5 = vpop.eup %5584 }
 0x3a4   :  { %v487_v6 = vmul.f32 %v5585_v5, %v5581_v59  ;;  %v638_v15 = vpop.permute.xlu1 %637 }
 0x3a6   :  { %v489_v8 = vpack.c.bf16 %v487_v6, %v487_v6 }
 0x3a7   :  { %v5587_v9 = vpop.eup %5586 }
 0x3a8   :  { %5033 = vmatmul.mubr.msk.bf16.vlgmr.msra.gmra.mrb[4].mxu1 %vm372_vm2, %v489_v8  ;;  %v488_v11 = vmul.f32 %v5587_v9, %v5583_v61 }
 0x3a9   :  { %5043 = vmatpush3.bf16.xpose.msra.mxu1 %v594_v10  ;;  %5044 = vmatprep.mubr.msk.bf16.mxu1 %vm5923_vm0, %v5922_v0 }
 0x3aa   :  { %v490_v12 = vpack.c.bf16 %v488_v11, %v488_v11  ;;  %5054 = vmatprep.subr.bf16.mxu1 %v5922_v0 }
 0x3ac   :  { %5039 = vmatmul.mubr.msk.bf16.vlgmr.msra.gmra.mrb[16].mxu0 %vm372_vm2, %v490_v12 }
 0x3ad   :  { %5049 = vmatpush3.bf16.xpose.msra.mxu0 %v646_v13  ;;  %5050 = vmatprep.mubr.msk.bf16.mxu0 %vm5923_vm0, %v5922_v0 }
 0x3ae   :  { %5060 = vmatprep.subr.bf16.mxu0 %v5922_v0 }
 0x3b0   :  { %5045 = vmatmul.mubr.msk.bf16.vlgmr.msra.gmra.mrb[8].mxu1 %vm372_vm2, %v586_v14 }
 0x3b1   :  { %5056 = vmatprep.mubr.msk.bf16.mxu1 %vm5923_vm0, %v5922_v0 }
 0x3b4   :  { %5051 = vmatmul.mubr.msk.bf16.vlgmr.msra.gmra.mrb[20].mxu0 %vm372_vm2, %v638_v15 }
 0x3b5   :  { %5062 = vmatprep.mubr.msk.bf16.mxu0 %vm5923_vm0, %v5922_v0 }
 0x47b   :  { %v6260_v16 = vpop.f32.mrb[4].mxu1 }
 0x47c   :  { %v5034_v17 = vpop.f32.mrb[5].mxu1 }
 0x47d   :  { %v535_v18 = vpop.f32.mrb[6].mxu1 }
 0x47e   :  { %v5035_v20 = vpop.f32.mrb[7].mxu1 }
 0x47f   :  { %v6262_v21 = vpop.f32.mrb[16].mxu0 }
 0x480   :  { %v5040_v22 = vpop.f32.mrb[17].mxu0 }
 0x481   :  { %v581_v24 = vpop.f32.mrb[18].mxu0 }
 0x482   :  { %v5041_v25 = vpop.f32.mrb[19].mxu0 }
 0x483   :  { %v630_v26 = vpop.f32.mrb[8].mxu1 }
 0x484   :  { %v688_v27 = vmul.f32 0.35355338, %v630_v26  ;;  %v5046_v30 = vpop.f32.mrb[9].mxu1 }
 0x485   :  { %v633_v31 = vpop.f32.mrb[10].mxu1 }
 0x486   :  { %v5047_v32 = vpop.f32.mrb[11].mxu1  ;;  %v690_v33 = vsel %vm372_vm2, %v688_v27, -inf }
 0x487   :  { %691 = vmax.xlane.f32.xlu0 %v690_v33  ;;  %v682_v34 = vpop.f32.mrb[20].mxu0 }
 0x488   :  { %v689_v35 = vmul.f32 0.35355338, %v682_v34  ;;  %v5052_v36 = vpop.f32.mrb[21].mxu0 }
 0x489   :  { %v685_v39 = vpop.f32.mrb[22].mxu0 }
 0x48a   :  { %v5053_v40 = vpop.f32.mrb[23].mxu0  ;;  %v693_v41 = vsel %vm372_vm2, %v689_v35, -inf }
 0x48b   :  { %694 = vmax.xlane.f32.xlu1 %v693_v41 }
 0x49c   :  { %764 = vrot.lane.b32.xlu1 %v6226_v38, %s5924_s6 }
 0x4a0   :  { %814 = vrot.lane.b32.xlu1 %v6200_v19, %s5925_s2 }
 0x4a4   :  { %864 = vrot.lane.b32.xlu1 %v6202_v23, %s5925_s2 }
 0x4a8   :  { %862 = vrot.lane.b32.xlu1 %v6214_v29, %s5925_s2 }
 0x514   :  { %v692_v42 = vpop.xlane.xlu0 %691 }
 0x515   :  { %v696_v43 = vsub.f32 %v688_v27, %v692_v42 }
 0x517   :  { %v698_v44 = vmul.f32 1.442695, %v696_v43 }
 0x518   :  { %v695_v45 = vpop.xlane.xlu1 %694 }
 0x519   :  { %5588 = vpow2.f32 %v698_v44  ;;  %v697_v46 = vsub.f32 %v689_v35, %v695_v45 }
 0x51b   :  { %v700_v47 = vmul.f32 1.442695, %v697_v46 }
 0x51c   :  { %v765_v48 = vpop.permute.xlu1 %764 }
 0x51d   :  { %5590 = vpow2.f32 %v700_v47  ;;  %v770_v49 = vsel %vm494_vm3, %v765_v48, 0 }
 0x51e   :  { %5061 = vmatpush3.bf16.msra.mxu0 %v770_v49 }
 0x51f   :  { %5072 = vmatprep.subr.bf16.mxu0 %v5922_v0 }
 0x520   :  { %v815_v59 = vpop.permute.xlu1 %814 }
 0x521   :  { %v820_v2 = vsel %vm372_vm2, %v815_v59, 0 }
 0x523   :  { %v5589_v50 = vpop.eup %5588 }
 0x524   :  { %v702_v51 = vsel %vm372_vm2, %v5589_v50, 0.0  ;;  %v865_v1 = vpop.permute.xlu1 %864 }
 0x525   :  { %703 = vadd.xlane.f32.xlu0 %v702_v51  ;;  %v870_v6 = vsel %vm372_vm2, %v865_v1, 0 }
 0x527   :  { %v5591_v52 = vpop.eup %5590 }
 0x528   :  { %v705_v53 = vsel %vm372_vm2, %v5591_v52, 0.0  ;;  %v863_v8 = vpop.permute.xlu1 %862 }
 0x529   :  { %706 = vadd.xlane.f32.xlu0 %v705_v53 }
 0x53f   :  { %715 = vrot.lane.b32.xlu0 %v6224_v37, %s5924_s6 }
 0x543   :  { %812 = vrot.lane.b32.xlu0 %v6212_v28, %s5925_s2 }
 0x5b2   :  { %v704_v54 = vpop.xlane.xlu0 %703 }
 0x5b3   :  { %5592 = vrcp.f32 %v704_v54 }
 0x5b6   :  { %v707_v55 = vpop.xlane.xlu0 %706 }
 0x5b7   :  { %5594 = vrcp.f32 %v707_v55 }
 0x5ba   :  { %v716_v56 = vpop.permute.xlu0 %715 }
 0x5bb   :  { %v721_v57 = vsel %vm494_vm3, %v716_v56, 0 }
 0x5bc   :  { %5055 = vmatpush3.bf16.msra.mxu1 %v721_v57 }
 0x5bd   :  { %v5593_v58 = vpop.eup %5592  ;;  %5066 = vmatprep.subr.bf16.mxu1 %v5922_v0 }
 0x5be   :  { %v710_v60 = vmul.f32 %v5593_v58, %v5589_v50  ;;  %v813_v7 = vpop.permute.xlu0 %812 }
 0x5c0   :  { %v712_v61 = vpack.c.bf16 %v710_v60, %v710_v60 }
 0x5c1   :  { %v5595_v62 = vpop.eup %5594 }
 0x5c2   :  { %5057 = vmatmul.mubr.msk.bf16.vlgmr.msra.gmra.mrb[12].mxu1 %vm372_vm2, %v712_v61  ;;  %v711_v63 = vmul.f32 %v5595_v62, %v5591_v52 }
 0x5c3   :  { %5068 = vmatprep.mubr.msk.bf16.mxu1 %vm5923_vm0, %v5922_v0 }
 0x5c4   :  { %v713_v5 = vpack.c.bf16 %v711_v63, %v711_v63 }
 0x5c5   :  { %5067 = vmatpush3.bf16.xpose.msra.mxu1 %v820_v2 }
 0x5c6   :  { %5063 = vmatmul.mubr.msk.bf16.vlgmr.msra.gmra.mrb[24].mxu0 %vm372_vm2, %v713_v5  ;;  %5078 = vmatprep.subr.bf16.mxu1 %v5922_v0 }
 0x5c7   :  { %5073 = vmatpush3.bf16.xpose.msra.mxu0 %v870_v6  ;;  %5074 = vmatprep.mubr.msk.bf16.mxu0 %vm5923_vm0, %v5922_v0 }
 0x5c8   :  { %5084 = vmatprep.subr.bf16.mxu0 %v5922_v0 }
 0x5cc   :  { %5069 = vmatmul.mubr.msk.bf16.vlgmr.msra.gmra.mrb[16].mxu1 %vm372_vm2, %v813_v7 }
 0x5cd   :  { %5080 = vmatprep.mubr.msk.bf16.mxu1 %vm5923_vm0, %v5922_v0 }
 0x5ce   :  { %5075 = vmatmul.mubr.msk.bf16.vlgmr.msra.gmra.mrb[28].mxu0 %vm372_vm2, %v863_v8 }
 0x5cf   :  { %5086 = vmatprep.mubr.msk.bf16.mxu0 %vm5923_vm0, %v5922_v0 }
 0x695   :  { %v6300_v9 = vpop.f32.mrb[12].mxu1 }
 0x696   :  { %v5058_v10 = vpop.f32.mrb[13].mxu1 }
 0x697   :  { %v760_v11 = vpop.f32.mrb[14].mxu1 }
 0x698   :  { %v5059_v12 = vpop.f32.mrb[15].mxu1 }
 0x699   :  { %v6302_v13 = vpop.f32.mrb[24].mxu0 }
 0x69a   :  { %v5481_v14 = vpack.i.bf16 %v6302_v13, %v6300_v9  ;;  %v5064_v15 = vpop.f32.mrb[25].mxu0 }
 0x69b   :  { %v809_v17 = vpop.f32.mrb[26].mxu0 }
 0x69c   :  { %v5065_v18 = vpop.f32.mrb[27].mxu0 }
 0x69f   :  { %v856_v20 = vpop.f32.mrb[16].mxu1 }
 0x6a0   :  { %v912_v22 = vmul.f32 0.35355338, %v856_v20  ;;  %v5070_v24 = vpop.f32.mrb[17].mxu1 }
 0x6a1   :  { %v859_v25 = vpop.f32.mrb[18].mxu1  ;;  %v906_v26 = vpop.f32.mrb[28].mxu0 }
 0x6a2   :  { %v913_v27 = vmul.f32 0.35355338, %v906_v26  ;;  %v5071_v30 = vpop.f32.mrb[19].mxu1  ;;  %v5076_v31 = vpop.f32.mrb[29].mxu0  ;;  %v914_v32 = vsel %vm372_vm2, %v912_v22, -inf }
 0x6a3   :  { %915 = vmax.xlane.f32.xlu0 %v914_v32  ;;  %v909_v33 = vpop.f32.mrb[30].mxu0 }
 0x6a4   :  { %v5077_v34 = vpop.f32.mrb[31].mxu0  ;;  %v917_v35 = vsel %vm372_vm2, %v913_v27, -inf }
 0x6a5   :  { %918 = vmax.xlane.f32.xlu1 %v917_v35 }
 0x6b6   :  { %986 = vrot.lane.b32.xlu1 %v6226_v38, %s5925_s2 }
 0x6ba   :  { %1036 = vrot.lane.b32.xlu1 %v6200_v19, %s5926_s23 }
 0x6be   :  { %1086 = vrot.lane.b32.xlu1 %v6202_v23, %s5926_s23 }
 0x6c2   :  { %1084 = vrot.lane.b32.xlu1 %v6214_v29, %s5926_s23 }
 0x730   :  { %v916_v36 = vpop.xlane.xlu0 %915 }
 0x731   :  { %v920_v39 = vsub.f32 %v912_v22, %v916_v36 }
 0x732   :  { %v919_v40 = vpop.xlane.xlu1 %918 }
 0x733   :  { %v922_v41 = vmul.f32 1.442695, %v920_v39  ;;  %v921_v42 = vsub.f32 %v913_v27, %v919_v40 }
 0x735   :  { %5596 = vpow2.f32 %v922_v41  ;;  %v924_v43 = vmul.f32 1.442695, %v921_v42 }
 0x736   :  { %v987_v44 = vpop.permute.xlu1 %986 }
 0x737   :  { %5598 = vpow2.f32 %v924_v43  ;;  %v992_v45 = vsel %vm494_vm3, %v987_v44, 0 }
 0x738   :  { %5085 = vmatpush3.bf16.msra.mxu0 %v992_v45 }
 0x739   :  { %5096 = vmatprep.subr.bf16.mxu0 %v5922_v0 }
 0x73a   :  { %v1037_v52 = vpop.permute.xlu1 %1036 }
 0x73e   :  { %v1087_v57 = vpop.permute.xlu1 %1086 }
 0x73f   :  { %v5597_v19 = vpop.eup %5596  ;;  %v1092_v59 = vsel %vm372_vm2, %v1087_v57, 0 }
 0x740   :  { %v926_v23 = vsel %vm372_vm2, %v5597_v19, 0.0 }
 0x741   :  { %v5599_v46 = vpop.eup %5598  ;;  %927 = vadd.xlane.f32.xlu0 %v926_v23 }
 0x742   :  { %v929_v29 = vsel %vm372_vm2, %v5599_v46, 0.0  ;;  %v1085_v61 = vpop.permute.xlu1 %1084 }
 0x745   :  { %930 = vadd.xlane.f32.xlu0 %v929_v29 }
 0x75b   :  { %938 = vrot.lane.b32.xlu0 %v6224_v37, %s5925_s2 }
 0x75f   :  { %1034 = vrot.lane.b32.xlu0 %v6212_v28, %s5926_s23  ;;  %v1042_v28 = vsel %vm372_vm2, %v1037_v52, 0 }
 0x7ce   :  { %v928_v47 = vpop.xlane.xlu0 %927 }
 0x7cf   :  { %5600 = vrcp.f32 %v928_v47  ;;  %v5532_v47 = vld [vmem:[%s7043_s7] sm:$0xff]  }
 0x7d2   :  { %v931_v48 = vpop.xlane.xlu0 %930 }
 0x7d3   :  { %5602 = vrcp.f32 %v931_v48  ;;  %v5533_v48 = vld [vmem:[%s7043_s7 + $0x8] sm:$0xff]  }
 0x7d6   :  { %v939_v49 = vpop.permute.xlu0 %938 }
 0x7d7   :  { %v944_v50 = vsel %vm494_vm3, %v939_v49, 0 }
 0x7d8   :  { %5079 = vmatpush3.bf16.msra.mxu1 %v944_v50 }
 0x7d9   :  { %v5601_v51 = vpop.eup %5600  ;;  %5090 = vmatprep.subr.bf16.mxu1 %v5922_v0 }
 0x7da   :  { %v934_v53 = vmul.f32 %v5601_v51, %v5597_v19  ;;  %v1035_v60 = vpop.permute.xlu0 %1034 }
 0x7dc   :  { %v936_v54 = vpack.c.bf16 %v934_v53, %v934_v53 }
 0x7dd   :  { %v5603_v55 = vpop.eup %5602 }
 0x7de   :  { %5081 = vmatmul.mubr.msk.bf16.vlgmr.msra.gmra.mrb[20].mxu1 %vm372_vm2, %v936_v54  ;;  %v935_v56 = vmul.f32 %v5603_v55, %v5599_v46 }
 0x7df   :  { %5092 = vmatprep.mubr.msk.bf16.mxu1 %vm5923_vm0, %v5922_v0 }
 0x7e0   :  { %v937_v58 = vpack.c.bf16 %v935_v56, %v935_v56 }
 0x7e1   :  { %5091 = vmatpush3.bf16.xpose.msra.mxu1 %v1042_v28 }
 0x7e2   :  { %5087 = vmatmul.mubr.msk.bf16.vlgmr.msra.gmra.mrb[32].mxu0 %vm372_vm2, %v937_v58  ;;  %5102 = vmatprep.subr.bf16.mxu1 %v5922_v0 }
 0x7e3   :  { %5097 = vmatpush3.bf16.xpose.msra.mxu0 %v1092_v59  ;;  %5098 = vmatprep.mubr.msk.bf16.mxu0 %vm5923_vm0, %v5922_v0 }
 0x7e4   :  { %5108 = vmatprep.subr.bf16.mxu0 %v5922_v0 }
 0x7e8   :  { %5093 = vmatmul.mubr.msk.bf16.vlgmr.msra.gmra.mrb[24].mxu1 %vm372_vm2, %v1035_v60 }
 0x7e9   :  { %5104 = vmatprep.mubr.msk.bf16.mxu1 %vm5923_vm0, %v5922_v0 }
 0x7ea   :  { %5099 = vmatmul.mubr.msk.bf16.vlgmr.msra.gmra.mrb[36].mxu0 %vm372_vm2, %v1085_v61 }
 0x7eb   :  { %5110 = vmatprep.mubr.msk.bf16.mxu0 %vm5923_vm0, %v5922_v0 }
 0x8b1   :  { %v980_v62 = vpop.f32.mrb[20].mxu1 }
 0x8b2   :  { %v5082_v63 = vpop.f32.mrb[21].mxu1 }
 0x8b3   :  { %v983_v1 = vpop.f32.mrb[22].mxu1 }
 0x8b4   :  { %v5083_v2 = vpop.f32.mrb[23].mxu1 }
 0x8b5   :  { %v1028_v5 = vpop.f32.mrb[32].mxu0 }
 0x8b6   :  { %v5486_v6 = vpack.i.bf16 %v1028_v5, %v980_v62  ;;  %v5088_v7 = vpop.f32.mrb[33].mxu0 }
 0x8b7   :  { %v1031_v8 = vpop.f32.mrb[34].mxu0 }
 0x8b8   :  { %v5089_v10 = vpop.f32.mrb[35].mxu0 }
 0x8bb   :  { %v1078_v11 = vpop.f32.mrb[24].mxu1 }
 0x8bc   :  { %v1134_v12 = vmul.f32 0.35355338, %v1078_v11  ;;  %v5094_v15 = vpop.f32.mrb[25].mxu1 }
 0x8bd   :  { %v1081_v17 = vpop.f32.mrb[26].mxu1  ;;  %v1128_v18 = vpop.f32.mrb[36].mxu0 }
 0x8be   :  { %v1135_v20 = vmul.f32 0.35355338, %v1128_v18  ;;  %v5095_v22 = vpop.f32.mrb[27].mxu1  ;;  %v5100_v24 = vpop.f32.mrb[37].mxu0  ;;  %v1136_v25 = vsel %vm372_vm2, %v1134_v12, -inf }
 0x8bf   :  { %1137 = vmax.xlane.f32.xlu0 %v1136_v25  ;;  %v1131_v26 = vpop.f32.mrb[38].mxu0 }
 0x8c0   :  { %v5101_v27 = vpop.f32.mrb[39].mxu0  ;;  %v1139_v30 = vsel %vm372_vm2, %v1135_v20, -inf }
 0x8c1   :  { %1140 = vmax.xlane.f32.xlu1 %v1139_v30 }
 0x8d2   :  { %1208 = vrot.lane.b32.xlu1 %v6226_v38, %s5926_s23 }
 0x8d6   :  { %5482 = vrot.lane.b32.xlu1 %v5481_v14, %s5917_s28 }
 0x8da   :  { %5487 = vrot.lane.b32.xlu1 %v5486_v6, %s5911_s20 }
 0x94c   :  { %v1138_v31 = vpop.xlane.xlu0 %1137 }
 0x94d   :  { %v1142_v32 = vsub.f32 %v1134_v12, %v1138_v31 }
 0x94e   :  { %v1141_v33 = vpop.xlane.xlu1 %1140 }
 0x94f   :  { %v1144_v34 = vmul.f32 1.442695, %v1142_v32  ;;  %v1143_v35 = vsub.f32 %v1135_v20, %v1141_v33 }
 0x951   :  { %5604 = vpow2.f32 %v1144_v34  ;;  %v1146_v36 = vmul.f32 1.442695, %v1143_v35 }
 0x952   :  { %v1209_v39 = vpop.permute.xlu1 %1208 }
 0x953   :  { %5606 = vpow2.f32 %v1146_v36  ;;  %v1214_v40 = vsel %vm494_vm3, %v1209_v39, 0 }
 0x954   :  { %5109 = vmatpush3.bf16.msra.mxu0 %v1214_v40 }
 0x955   :  { %5122 = vmatprep.subr.bf16.mxu0 %v5922_v0 }
 0x956   :  { %v5483_v28 = vpop.permute.xlu1 %5482 }
 0x957   :  { %v5485_v59 = vunpack.i.h.bf16 %v5483_v28  ;;  %v5484_v60 = vunpack.i.l.bf16 %v5483_v28  ;;  %v5543_v28 = vld [vmem:[%s7049_s13 + $0x38] sm:$0xff]  }
 0x959   :  { %v1281_v1 = vsel %vm372_vm2, %v6262_v21, %v5485_v59  ;;  %v1280_v2 = vsel %vm372_vm2, %v6260_v16, %v5484_v60  ;;  %v4629_v21 = vld [vmem:[#allocation10] ss:$0 sm:$0xff] }
 0x95a   :  { %v5488_v58 = vpop.permute.xlu1 %5487 }
 0x95b   :  { %v5605_v38 = vpop.eup %5604  ;;  %v5490_v61 = vunpack.i.h.bf16 %v5488_v58  ;;  %v5489_v62 = vunpack.i.l.bf16 %v5488_v58  ;;  %v4635_v58 = vld [vmem:[#allocation14] ss:$0 sm:$0xff] }
 0x95c   :  { %v1148_v9 = vsel %vm372_vm2, %v5605_v38, 0.0 }
 0x95d   :  { %v5607_v13 = vpop.eup %5606  ;;  %1149 = vadd.xlane.f32.xlu0 %v1148_v9  ;;  %v1283_v7 = vsel %vm1282_vm4, %v1280_v2, %v5489_v62  ;;  %v1284_v8 = vsel %vm1282_vm4, %v1281_v1, %v5490_v61  ;;  %v5536_v9 = vld [vmem:[%s7049_s13] sm:$0xff]  }
 0x95e   :  { %v1151_v14 = vsel %vm372_vm2, %v5607_v13, 0.0 }
 0x961   :  { %1152 = vadd.xlane.f32.xlu0 %v1151_v14  ;;  %v5538_v14 = vld [vmem:[%s7049_s13 + $0x10] sm:$0xff]  }
 0x977   :  { %1160 = vrot.lane.b32.xlu0 %v6224_v37, %s5926_s23 }
 0x9ea   :  { %v1150_v41 = vpop.xlane.xlu0 %1149 }
 0x9eb   :  { %5608 = vrcp.f32 %v1150_v41  ;;  %v5539_v41 = vld [vmem:[%s7049_s13 + $0x18] sm:$0xff]  }
 0x9ee   :  { %v1153_v42 = vpop.xlane.xlu0 %1152 }
 0x9ef   :  { %5610 = vrcp.f32 %v1153_v42  ;;  %v5540_v42 = vld [vmem:[%s7049_s13 + $0x20] sm:$0xff]  }
 0x9f2   :  { %v1161_v43 = vpop.permute.xlu0 %1160 }
 0x9f3   :  { %v1166_v44 = vsel %vm494_vm3, %v1161_v43, 0  ;;  %v5541_v43 = vld [vmem:[%s7049_s13 + $0x28] sm:$0xff]  }
 0x9f4   :  { %5103 = vmatpush3.bf16.msra.mxu1 %v1166_v44 }
 0x9f5   :  { %v5609_v45 = vpop.eup %5608  ;;  %5114 = vmatprep.subr.bf16.mxu1 %v5922_v0 }
 0x9f6   :  { %v1156_v19 = vmul.f32 %v5609_v45, %v5605_v38  ;;  %v5535_v38 = vld [vmem:[%s7047_s11 + $0x8] sm:$0xff]  }
 0x9f8   :  { %v1158_v23 = vpack.c.bf16 %v1156_v19, %v1156_v19 }
 0x9f9   :  { %v5611_v46 = vpop.eup %5610 }
 0x9fa   :  { %5105 = vmatmul.mubr.msk.bf16.vlgmr.msra.gmra.mrb[28].mxu1 %vm372_vm2, %v1158_v23  ;;  %v1157_v29 = vmul.f32 %v5611_v46, %v5607_v13  ;;  %v5537_v13 = vld [vmem:[%s7049_s13 + $0x8] sm:$0xff]  }
 0x9fb   :  { %5118 = vmatprep.mubr.msk.bf16.mxu1 %vm5923_vm0, %v5922_v0  ;;  %5115 = vmatpush3.bf16.msra.mxu1 %v5532_v47 }
 0x9fc   :  { %v1159_v37 = vpack.c.bf16 %v1157_v29, %v1157_v29  ;;  %5116 = vmatprep.subr.bf16.mxu1 %v5922_v0 }
 0x9fe   :  { %5111 = vmatmul.mubr.msk.bf16.vlgmr.msra.gmra.mrb[40].mxu0 %vm372_vm2, %v1159_v37 }
 0x9ff   :  { %5126 = vmatprep.mubr.msk.bf16.mxu0 %vm5923_vm0, %v5922_v0  ;;  %5117 = vmatpush3.bf16.msra.mxu1 %v5533_v48  ;;  %v4633_v48 = vld [vmem:[#allocation11] ss:$0 sm:$0xff] }
 0xa00   :  { %5130 = vmatprep.subr.bf16.mxu1 %v5922_v0 }
 0xacd   :  { %v1202_v49 = vpop.f32.mrb[28].mxu1 }
 0xace   :  { %v5106_v50 = vpop.f32.mrb[29].mxu1 }
 0xacf   :  { %v1205_v51 = vpop.f32.mrb[30].mxu1 }
 0xad0   :  { %v5107_v52 = vpop.f32.mrb[31].mxu1 }
 0xad1   :  { %v1250_v53 = vpop.f32.mrb[40].mxu0  ;;  %v4634_v52 = vld [vmem:[#allocation13] ss:$0 sm:$0xff] }
 0xad2   :  { %v5491_v54 = vpack.i.bf16 %v1250_v53, %v1202_v49  ;;  %v5112_v55 = vpop.f32.mrb[41].mxu0 }
 0xad3   :  { %v1253_v56 = vpop.f32.mrb[42].mxu0 }
 0xad4   :  { %5492 = vrot.lane.b32.xlu0 %v5491_v54, %s5927_s12  ;;  %v5113_v57 = vpop.f32.mrb[43].mxu0 }
 0xad5   :  { %v5542_v57 = vld [vmem:[%s7049_s13 + $0x30] sm:$0xff]  }
 0xb46   :  { %v5493_v63 = vpop.permute.xlu0 %5492 }
 0xb47   :  { %v5495_v5 = vunpack.i.h.bf16 %v5493_v63  ;;  %v5494_v6 = vunpack.i.l.bf16 %v5493_v63 }
 0xb49   :  { %v1287_v10 = vsel %vm1285_vm5, %v1284_v8, %v5495_v5  ;;  %v1286_v11 = vsel %vm1285_vm5, %v1283_v7, %v5494_v6  ;;  %v4639_v7 = vld [vmem:[%s7050_s14] ss:$0 sm:$0xff] }
 0xb4a   :  { %v1288_v12 = vpack.c.bf16 %v1287_v10, %v1286_v11 }
 0xb4c   :  { %5119 = vmatmul.mubr.msk.bf16.vlgmr.msra.gmra.mrb[32].mxu1 %vm193_vm1, %v1288_v12 }
 0xb4d   :  { %5146 = vmatprep.mubr.msk.bf16.mxu1 %vm5923_vm0, %v5922_v0  ;;  %5131 = vmatpush3.bf16.msra.mxu1 %v5536_v9 }
 0xb4e   :  { %5132 = vmatprep.subr.bf16.mxu1 %v5922_v0 }
 0xb51   :  { %5133 = vmatpush3.bf16.msra.mxu1 %v5537_v13 }
 0xb52   :  { %5134 = vmatprep.subr.bf16.mxu1 %v5922_v0 }
 0xb55   :  { %5135 = vmatpush3.bf16.msra.mxu1 %v5538_v14  ;;  %v4648_v14 = vld [vmem:[%s7051_s15] ss:$0 sm:$0xff] }
 0xb56   :  { %5136 = vmatprep.subr.bf16.mxu1 %v5922_v0 }
 0xb59   :  { %5137 = vmatpush3.bf16.msra.mxu1 %v5539_v41 }
 0xb5a   :  { %5138 = vmatprep.subr.bf16.mxu1 %v5922_v0 }
 0xb5d   :  { %5139 = vmatpush3.bf16.msra.mxu1 %v5540_v42 }
 0xb5e   :  { %5140 = vmatprep.subr.bf16.mxu1 %v5922_v0 }
 0xb61   :  { %5141 = vmatpush3.bf16.msra.mxu1 %v5541_v43 }
 0xb62   :  { %5142 = vmatprep.subr.bf16.mxu1 %v5922_v0 }
 0xb65   :  { %5143 = vmatpush3.bf16.msra.mxu1 %v5542_v57 }
 0xb66   :  { %5144 = vmatprep.subr.bf16.mxu1 %v5922_v0 }
 0xb69   :  { %5145 = vmatpush3.bf16.msra.mxu1 %v5543_v28 }
 0xb6a   :  { %5180 = vmatprep.subr.bf16.mxu1 %v5922_v0 }
 0xc1f   :  { %v1349_v15 = vpop.f32.mrb[32].mxu1 }
 0xc20   :  { %v1350_v17 = vadd.f32 %v4629_v21, %v1349_v15  ;;  %v5120_v16 = vpop.f32.mrb[33].mxu1 }
 0xc21   :  { %v1352_v18 = vpop.f32.mrb[34].mxu1 }
 0xc22   :  { %v1353_v20 = vadd.f32 %v4629_v21, %v1352_v18  ;;  %v5121_v22 = vpop.f32.mrb[35].mxu1  ;;  %v1356_v24 = vadd.f32 %v1350_v17, %v6167_v3 }
 0xc24   :  { %v1360_v25 = vsel %vm193_vm1, %v1356_v24, 0.0  ;;  %v1357_v26 = vadd.f32 %v1353_v20, %v6169_v4  ;;  %v5534_v4 = vld [vmem:[%s7047_s11] sm:$0xff]  }
 0xc25   :  { %1361 = vadd.xlane.f32.xlu1 %v1360_v25  ;;  %5123 = vmatpush3.bf16.msra.mxu0 %v5534_v4 }
 0xc26   :  { %v1363_v27 = vsel %vm193_vm1, %v1357_v26, 0.0  ;;  %5124 = vmatprep.subr.bf16.mxu0 %v5922_v0 }
 0xc27   :  { %1364 = vadd.xlane.f32.xlu0 %v1363_v27 }
 0xc29   :  { %5125 = vmatpush3.bf16.msra.mxu0 %v5535_v38 }
 0xc2a   :  { %5150 = vmatprep.subr.bf16.mxu0 %v5922_v0 }
 0xcb2   :  { %v1362_v30 = vpop.xlane.xlu1 %1361 }
 0xcb3   :  { %v1367_v31 = vmul.f32 0.03125, %v1362_v30 }
 0xcb4   :  { %v1365_v32 = vpop.xlane.xlu0 %1364 }
 0xcb5   :  { %v1369_v33 = vsub.f32 %v1356_v24, %v1367_v31  ;;  %v1368_v34 = vmul.f32 0.03125, %v1365_v32 }
 0xcb7   :  { %v1370_v35 = vsub.f32 %v1357_v26, %v1368_v34  ;;  %v1371_v36 = vmul.f32 %v1369_v33, %v1369_v33 }
 0xcb9   :  { %v1373_v39 = vsel %vm193_vm1, %v1371_v36, 0.0  ;;  %v1372_v40 = vmul.f32 %v1370_v35, %v1370_v35  ;;  %v5545_v36 = vld [vmem:[%s7061_s1 + $0x18] sm:$0xff]  }
 0xcba   :  { %1374 = vadd.xlane.f32.xlu0 %v1373_v39 }
 0xcbb   :  { %v1376_v3 = vsel %vm193_vm1, %v1372_v40, 0.0 }
 0xcbe   :  { %1377 = vadd.xlane.f32.xlu0 %v1376_v3 }
 0xd47   :  { %v1375_v44 = vpop.xlane.xlu0 %1374 }
 0xd48   :  { %v1379_v45 = vmul.f32 0.03125, %v1375_v44 }
 0xd4a   :  { %v1381_v19 = vadd.f32 1e-05, %v1379_v45  ;;  %v4649_v45 = vld [vmem:[%s7052_s16] ss:$0 sm:$0xff] }
 0xd4b   :  { %v1378_v23 = vpop.xlane.xlu0 %1377 }
 0xd4c   :  { %5612 = vrsqrt.f32 %v1381_v19  ;;  %v1380_v46 = vmul.f32 0.03125, %v1378_v23 }
 0xd4e   :  { %v1382_v29 = vadd.f32 1e-05, %v1380_v46 }
 0xd50   :  { %5614 = vrsqrt.f32 %v1382_v29  ;;  %v5546_v29 = vld [vmem:[%s7039_s3 + $0x10] sm:$0xff]  }
 0xd56   :  { %v5613_v37 = vpop.eup %5612 }
 0xd57   :  { %v1385_v47 = vmul.f32 %v5613_v37, %v1369_v33 }
 0xd59   :  { %v1393_v50 = vmul.f32 %v4633_v48, %v1385_v47  ;;  %v5547_v47 = vld [vmem:[%s7039_s3 + $0x18] sm:$0xff]  }
 0xd5a   :  { %v5615_v49 = vpop.eup %5614 }
 0xd5b   :  { %v1386_v51 = vmul.f32 %v5615_v49, %v1370_v35  ;;  %v1401_v54 = vadd.f32 %v4634_v52, %v1393_v50  ;;  %v5544_v35 = vld [vmem:[%s7061_s1 + $0x10] sm:$0xff]   ;;  %v5549_v49 = vld [vmem:[%s7041_s5 + $0x18] sm:$0xff]  }
 0xd5d   :  { %v1394_v53 = vmul.f32 %v4633_v48, %v1386_v51  ;;  %v5548_v48 = vld [vmem:[%s7041_s5 + $0x10] sm:$0xff]  }
 0xd5f   :  { %v1402_v55 = vadd.f32 %v4634_v52, %v1394_v53 }
 0xd61   :  { %v1403_v56 = vpack.c.bf16 %v1402_v55, %v1401_v54 }
 0xd63   :  { %5127 = vmatmul.mubr.msk.bf16.vlgmr.msra.gmra.mrb[44].mxu0 %vm193_vm1, %v1403_v56 }
 0xd64   :  { %5154 = vmatprep.mubr.msk.bf16.mxu0 %vm5923_vm0, %v5922_v0  ;;  %5151 = vmatpush3.bf16.msra.mxu0 %v5544_v35 }
 0xd65   :  { %5152 = vmatprep.subr.bf16.mxu0 %v5922_v0 }
 0xd68   :  { %5153 = vmatpush3.bf16.msra.mxu0 %v5545_v36 }
 0xd69   :  { %5158 = vmatprep.subr.bf16.mxu0 %v5922_v0 }
 0xe36   :  { %v1464_v59 = vpop.f32.mrb[44].mxu0 }
 0xe37   :  { %v1465_v60 = vadd.f32 %v4635_v58, %v1464_v59  ;;  %v5128_v61 = vpop.f32.mrb[45].mxu0 }
 0xe38   :  { %v1467_v62 = vpop.f32.mrb[46].mxu0  ;;  %v4654_v61 = vld [vmem:[#allocation5 + $0x1] ss:$0 sm:$0xff] }
 0xe39   :  { %v1468_v63 = vadd.f32 %v4635_v58, %v1467_v62  ;;  %v5129_v1 = vpop.f32.mrb[47].mxu0  ;;  %v1471_v2 = vmax.f32 %v1465_v60, 0.0 }
 0xe3a   :  { %v4670_v1 = vld [vmem:[#allocation8 + $0x1] ss:$0 sm:$0xff] }
 0xe3b   :  { %v1472_v5 = vmax.f32 %v1468_v63, 0.0 }
 0xe3d   :  { %v1473_v6 = vpack.c.bf16 %v1472_v5, %v1471_v2 }
 0xe3f   :  { %5147 = vmatmul.mubr.bf16.vlgmr.msra.gmra.mrb[36].mxu1 %v1473_v6 }
 0xe40   :  { %5182 = vmatprep.mubr.msk.bf16.mxu1 %vm5923_vm0, %v5922_v0 }
 0xf12   :  { %v1579_v8 = vpop.f32.mrb[36].mxu1 }
 0xf13   :  { %v1580_v10 = vadd.f32 %v4639_v7, %v1579_v8  ;;  %v5148_v11 = vpop.f32.mrb[37].mxu1 }
 0xf14   :  { %v1582_v12 = vpop.f32.mrb[38].mxu1 }
 0xf15   :  { %v1583_v21 = vadd.f32 %v4639_v7, %v1582_v12  ;;  %v5149_v15 = vpop.f32.mrb[39].mxu1  ;;  %v1586_v17 = vadd.f32 %v1580_v10, %v1401_v54  ;;  %v4662_v54 = vld [vmem:[#allocation7 + $0x1] ss:$0 sm:$0xff] }
 0xf17   :  { %v1590_v16 = vsel %vm193_vm1, %v1586_v17, 0.0  ;;  %v1587_v18 = vadd.f32 %v1583_v21, %v1402_v55 }
 0xf18   :  { %1591 = vadd.xlane.f32.xlu1 %v1590_v16 }
 0xf19   :  { %v1593_v20 = vsel %vm193_vm1, %v1587_v18, 0.0 }
 0xf1a   :  { %1594 = vadd.xlane.f32.xlu0 %v1593_v20 }
 0xfa5   :  { %v1592_v22 = vpop.xlane.xlu1 %1591 }
 0xfa6   :  { %v1596_v24 = vmul.f32 0.03125, %v1592_v22 }
 0xfa7   :  { %v1595_v25 = vpop.xlane.xlu0 %1594 }
 0xfa8   :  { %v1598_v26 = vsub.f32 %v1586_v17, %v1596_v24  ;;  %v1597_v27 = vmul.f32 0.03125, %v1595_v25 }
 0xfaa   :  { %v1599_v30 = vsub.f32 %v1587_v18, %v1597_v27  ;;  %v1600_v31 = vmul.f32 %v1598_v26, %v1598_v26 }
 0xfac   :  { %v1602_v32 = vsel %vm193_vm1, %v1600_v31, 0.0  ;;  %v1601_v33 = vmul.f32 %v1599_v30, %v1599_v30 }
 0xfad   :  { %1603 = vadd.xlane.f32.xlu1 %v1602_v32 }
 0xfae   :  { %v1605_v34 = vsel %vm193_vm1, %v1601_v33, 0.0 }
 0xfaf   :  { %1606 = vadd.xlane.f32.xlu0 %v1605_v34 }
0x103a   :  { %v1604_v39 = vpop.xlane.xlu1 %1603 }
0x103b   :  { %v1608_v40 = vmul.f32 0.03125, %v1604_v39 }
0x103c   :  { %v1607_v3 = vpop.xlane.xlu0 %1606 }
0x103d   :  { %v1610_v4 = vadd.f32 1e-05, %v1608_v40  ;;  %v1609_v38 = vmul.f32 0.03125, %v1607_v3 }
0x103f   :  { %5616 = vrsqrt.f32 %v1610_v4  ;;  %v1611_v9 = vadd.f32 1e-05, %v1609_v38 }
0x1041   :  { %5618 = vrsqrt.f32 %v1611_v9 }
0x1049   :  { %v5617_v13 = vpop.eup %5616 }
0x104a   :  { %v1614_v41 = vmul.f32 %v5617_v13, %v1598_v26 }
0x104b   :  { %v5619_v42 = vpop.eup %5618 }
0x104c   :  { %v1622_v43 = vmul.f32 %v4648_v14, %v1614_v41  ;;  %v1615_v44 = vmul.f32 %v5619_v42, %v1599_v30 }
0x104e   :  { %v1623_v19 = vmul.f32 %v4648_v14, %v1615_v44  ;;  %v6457_v23 = vadd.f32 %v4649_v45, %v1622_v43 }
0x1050   :  { %v6459_v46 = vadd.f32 %v4649_v45, %v1623_v19 }
0x1052   :  { %v1632_v37 = vpack.c.bf16 %v6459_v46, %v6457_v23 }
0x1054   :  { %5155 = vmatmul.mubr.msk.bf16.vlgmr.msra.gmra.mrb[48].mxu0 %vm193_vm1, %v1632_v37 }
0x1055   :  { %5159 = vmatpush3.bf16.msra.mxu0 %v5546_v29  ;;  %5162 = vmatprep.mubr.msk.bf16.mxu0 %vm5923_vm0, %v5922_v0 }
0x1056   :  { %5160 = vmatprep.subr.bf16.mxu0 %v5922_v0 }
0x1059   :  { %5161 = vmatpush3.bf16.msra.mxu0 %v5547_v47 }
0x105a   :  { %5166 = vmatprep.subr.bf16.mxu0 %v5922_v0 }
0x105c   :  { %5163 = vmatmul.mubr.msk.bf16.vlgmr.msra.gmra.mrb[52].mxu0 %vm193_vm1, %v1632_v37 }
0x105d   :  { %5167 = vmatpush3.bf16.msra.mxu0 %v5548_v48  ;;  %5170 = vmatprep.mubr.msk.bf16.mxu0 %vm5923_vm0, %v5922_v0 }
0x105e   :  { %5168 = vmatprep.subr.bf16.mxu0 %v5922_v0 }
0x1061   :  { %5169 = vmatpush3.bf16.msra.mxu0 %v5549_v49 }
0x1062   :  { %5174 = vmatprep.subr.bf16.mxu0 %v5922_v0 }
0x1064   :  { %5171 = vmatmul.mubr.msk.bf16.vlgmr.msra.gmra.mrb[56].mxu0 %vm193_vm1, %v1632_v37 }
0x1065   :  { %5176 = vmatprep.mubr.msk.bf16.mxu0 %vm5923_vm0, %v5922_v0 }
0x1127   :  { %v1695_v50 = vpop.f32.mrb[48].mxu0 }
0x1128   :  { %v5156_v51 = vpop.f32.mrb[49].mxu0  ;;  %v1696_v2 = vadd.f32 %v4654_v61, %v1695_v50 }
0x1129   :  { %v1698_v52 = vpop.f32.mrb[50].mxu0 }
0x112a   :  { %v5157_v53 = vpop.f32.mrb[51].mxu0  ;;  %v1699_v7 = vadd.f32 %v4654_v61, %v1698_v52  ;;  %v6498_v12 = vpack.c.bf16 %v1696_v2, %v1696_v2 }
0x112c   :  { %v6502_v16 = vpack.c.bf16 %v1699_v7, %v1699_v7 }
0x112f   :  { %v1761_v55 = vpop.f32.mrb[52].mxu0 }
0x1130   :  { %v1762_v56 = vadd.f32 %v4662_v54, %v1761_v55  ;;  %v5164_v57 = vpop.f32.mrb[53].mxu0 }
0x1131   :  { %v1764_v28 = vpop.f32.mrb[54].mxu0 }
0x1132   :  { %v6488_v58 = vpack.c.bf16 %v1762_v56, %v1762_v56  ;;  %v1765_v59 = vadd.f32 %v4662_v54, %v1764_v28  ;;  %v5165_v60 = vpop.f32.mrb[55].mxu0 }
0x1134   :  { %v6490_v62 = vpack.c.bf16 %v1765_v59, %v1765_v59  ;;  %v1844_v63 = vsel %vm372_vm2, %v6488_v58, 0 }
0x1135   :  { %5175 = vmatpush3.bf16.xpose.msra.mxu0 %v1844_v63 }
0x1136   :  { %v1890_v5 = vsel %vm372_vm2, %v6490_v62, 0  ;;  %5186 = vmatprep.subr.bf16.mxu0 %v5922_v0 }
0x1137   :  { %v1827_v6 = vpop.f32.mrb[56].mxu0  ;;  %5181 = vmatpush3.bf16.xpose.msra.mxu1 %v1890_v5 }
0x1138   :  { %v1828_v8 = vadd.f32 %v4670_v1, %v1827_v6  ;;  %v5172_v10 = vpop.f32.mrb[57].mxu0  ;;  %5192 = vmatprep.subr.bf16.mxu1 %v5922_v0 }
0x1139   :  { %v1830_v11 = vpop.f32.mrb[58].mxu0 }
0x113a   :  { %v6500_v21 = vpack.c.bf16 %v1828_v8, %v1828_v8  ;;  %v1831_v15 = vadd.f32 %v4670_v1, %v1830_v11  ;;  %v5173_v17 = vpop.f32.mrb[59].mxu0 }
0x113c   :  { %v6504_v18 = vpack.c.bf16 %v1831_v15, %v1831_v15  ;;  %5177 = vmatmul.mubr.msk.bf16.vlgmr.msra.gmra.mrb[60].mxu0 %vm372_vm2, %v6498_v12  ;;  %v1962_v20 = vsel %vm494_vm3, %v6500_v21, 0 }
0x113d   :  { %5187 = vmatpush3.bf16.msra.mxu0 %v1962_v20  ;;  %5188 = vmatprep.mubr.msk.bf16.mxu0 %vm5923_vm0, %v5922_v0 }
0x113e   :  { %5183 = vmatmul.mubr.msk.bf16.vlgmr.msra.gmra.mrb[40].mxu1 %vm372_vm2, %v6502_v16  ;;  %v2008_v22 = vsel %vm494_vm3, %v6504_v18, 0  ;;  %5198 = vmatprep.subr.bf16.mxu0 %v5922_v0 }
0x113f   :  { %5193 = vmatpush3.bf16.msra.mxu1 %v2008_v22  ;;  %5194 = vmatprep.mubr.msk.bf16.mxu1 %vm5923_vm0, %v5922_v0 }
0x1140   :  { %5204 = vmatprep.subr.bf16.mxu1 %v5922_v0 }
0x120f   :  { %v1880_v24 = vpop.f32.mrb[60].mxu0 }
0x1210   :  { %v1932_v25 = vmul.f32 0.35355338, %v1880_v24  ;;  %v5178_v26 = vpop.f32.mrb[61].mxu0 }
0x1211   :  { %v1883_v27 = vpop.f32.mrb[62].mxu0  ;;  %v1926_v30 = vpop.f32.mrb[40].mxu1 }
0x1212   :  { %v1933_v31 = vmul.f32 0.35355338, %v1926_v30  ;;  %v5179_v32 = vpop.f32.mrb[63].mxu0  ;;  %v5184_v33 = vpop.f32.mrb[41].mxu1  ;;  %v1934_v34 = vsel %vm372_vm2, %v1932_v25, -inf }
0x1213   :  { %v1929_v35 = vpop.f32.mrb[42].mxu1  ;;  %1935 = vmax.xlane.f32.xlu1 %v1934_v34 }
0x1214   :  { %v5185_v36 = vpop.f32.mrb[43].mxu1  ;;  %v1937_v39 = vsel %vm372_vm2, %v1933_v31, -inf }
0x1215   :  { %1938 = vmax.xlane.f32.xlu0 %v1937_v39 }
0x1224   :  { %2054 = vrot.lane.b32.xlu1 %v6488_v58, %s5924_s6 }
0x12a0   :  { %v1936_v40 = vpop.xlane.xlu1 %1935 }
0x12a1   :  { %v1940_v3 = vsub.f32 %v1932_v25, %v1936_v40 }
0x12a2   :  { %v1939_v4 = vpop.xlane.xlu0 %1938 }
0x12a3   :  { %v1942_v38 = vmul.f32 1.442695, %v1940_v3  ;;  %v1941_v9 = vsub.f32 %v1933_v31, %v1939_v4 }
0x12a4   :  { %v2055_v44 = vpop.permute.xlu1 %2054 }
0x12a5   :  { %5620 = vpow2.f32 %v1942_v38  ;;  %v1944_v13 = vmul.f32 1.442695, %v1941_v9  ;;  %v2060_v51 = vsel %vm372_vm2, %v2055_v44, 0 }
0x12a7   :  { %5622 = vpow2.f32 %v1944_v13 }
0x12af   :  { %v5621_v14 = vpop.eup %5620 }
0x12b0   :  { %v1946_v41 = vsel %vm372_vm2, %v5621_v14, 0.0 }
0x12b1   :  { %v5623_v42 = vpop.eup %5622  ;;  %1947 = vadd.xlane.f32.xlu1 %v1946_v41 }
0x12b2   :  { %v1949_v43 = vsel %vm372_vm2, %v5623_v42, 0.0 }
0x12b3   :  { %1950 = vadd.xlane.f32.xlu0 %v1949_v43 }
0x12c2   :  { %2051 = vrot.lane.b32.xlu1 %v6498_v12, %s5924_s6 }
0x12c6   :  { %2103 = vrot.lane.b32.xlu1 %v6502_v16, %s5924_s6 }
0x12c9   :  { %2106 = vrot.lane.b32.xlu0 %v6490_v62, %s5924_s6 }
0x133e   :  { %v1948_v45 = vpop.xlane.xlu1 %1947 }
0x133f   :  { %5624 = vrcp.f32 %v1948_v45 }
0x1340   :  { %v1951_v19 = vpop.xlane.xlu0 %1950 }
0x1341   :  { %5626 = vrcp.f32 %v1951_v19 }
0x1342   :  { %v2052_v54 = vpop.permute.xlu1 %2051 }
0x1344   :  { %v2107_v50 = vpop.permute.xlu0 %2106 }
0x1345   :  { %v2112_v53 = vsel %vm372_vm2, %v2107_v50, 0 }
0x1346   :  { %v2104_v55 = vpop.permute.xlu1 %2103 }
0x1349   :  { %v5625_v29 = vpop.eup %5624 }
0x134a   :  { %v1954_v37 = vmul.f32 %v5625_v29, %v5621_v14 }
0x134b   :  { %v5627_v47 = vpop.eup %5626 }
0x134c   :  { %v1955_v48 = vmul.f32 %v5627_v47, %v5623_v42  ;;  %v1956_v49 = vpack.c.bf16 %v1954_v37, %v1954_v37 }
0x134e   :  { %5189 = vmatmul.mubr.msk.bf16.vlgmr.msra.gmra.mrb[64].mxu0 %vm372_vm2, %v1956_v49  ;;  %v1957_v52 = vpack.c.bf16 %v1955_v48, %v1955_v48 }
0x134f   :  { %5199 = vmatpush3.bf16.xpose.msra.mxu0 %v2060_v51  ;;  %5200 = vmatprep.mubr.msk.bf16.mxu0 %vm5923_vm0, %v5922_v0 }
0x1350   :  { %5195 = vmatmul.mubr.msk.bf16.vlgmr.msra.gmra.mrb[44].mxu1 %vm372_vm2, %v1957_v52  ;;  %5210 = vmatprep.subr.bf16.mxu0 %v5922_v0 }
0x1351   :  { %5205 = vmatpush3.bf16.xpose.msra.mxu1 %v2112_v53  ;;  %5206 = vmatprep.mubr.msk.bf16.mxu1 %vm5923_vm0, %v5922_v0 }
0x1352   :  { %5216 = vmatprep.subr.bf16.mxu1 %v5922_v0 }
0x1356   :  { %5201 = vmatmul.mubr.msk.bf16.vlgmr.msra.gmra.mrb[68].mxu0 %vm372_vm2, %v2052_v54 }
0x1357   :  { %5212 = vmatprep.mubr.msk.bf16.mxu0 %vm5923_vm0, %v5922_v0 }
0x1358   :  { %5207 = vmatmul.mubr.msk.bf16.vlgmr.msra.gmra.mrb[48].mxu1 %vm372_vm2, %v2104_v55 }
0x1359   :  { %5218 = vmatprep.mubr.msk.bf16.mxu1 %vm5923_vm0, %v5922_v0 }
0x1421   :  { %v6548_v56 = vpop.f32.mrb[64].mxu0 }
0x1422   :  { %v5190_v57 = vpop.f32.mrb[65].mxu0 }
0x1423   :  { %v2001_v28 = vpop.f32.mrb[66].mxu0  ;;  %v6550_v59 = vpop.f32.mrb[44].mxu1 }
0x1424   :  { %v5191_v60 = vpop.f32.mrb[67].mxu0  ;;  %v5196_v61 = vpop.f32.mrb[45].mxu1 }
0x1425   :  { %v2047_v63 = vpop.f32.mrb[46].mxu1 }
0x1426   :  { %v5197_v1 = vpop.f32.mrb[47].mxu1 }
0x1429   :  { %v2096_v2 = vpop.f32.mrb[68].mxu0 }
0x142a   :  { %v2154_v5 = vmul.f32 0.35355338, %v2096_v2  ;;  %v5202_v6 = vpop.f32.mrb[69].mxu0 }
0x142b   :  { %v2099_v7 = vpop.f32.mrb[70].mxu0  ;;  %v2148_v8 = vpop.f32.mrb[48].mxu1 }
0x142c   :  { %v2155_v10 = vmul.f32 0.35355338, %v2148_v8  ;;  %v5203_v11 = vpop.f32.mrb[71].mxu0  ;;  %v5208_v15 = vpop.f32.mrb[49].mxu1  ;;  %v2156_v17 = vsel %vm372_vm2, %v2154_v5, -inf }
0x142d   :  { %v2151_v20 = vpop.f32.mrb[50].mxu1  ;;  %2157 = vmax.xlane.f32.xlu1 %v2156_v17 }
0x142e   :  { %v5209_v22 = vpop.f32.mrb[51].mxu1  ;;  %v2159_v24 = vsel %vm372_vm2, %v2155_v10, -inf }
0x142f   :  { %2160 = vmax.xlane.f32.xlu0 %v2159_v24 }
0x143e   :  { %2181 = vrot.lane.b32.xlu1 %v6500_v21, %s5924_s6 }
0x1442   :  { %2280 = vrot.lane.b32.xlu1 %v6488_v58, %s5925_s2 }
0x1446   :  { %2330 = vrot.lane.b32.xlu1 %v6490_v62, %s5925_s2 }
0x144a   :  { %2278 = vrot.lane.b32.xlu1 %v6498_v12, %s5925_s2 }
0x14ba   :  { %v2158_v25 = vpop.xlane.xlu1 %2157 }
0x14bb   :  { %v2162_v26 = vsub.f32 %v2154_v5, %v2158_v25 }
0x14bc   :  { %v2161_v27 = vpop.xlane.xlu0 %2160 }
0x14bd   :  { %v2164_v30 = vmul.f32 1.442695, %v2162_v26  ;;  %v2163_v31 = vsub.f32 %v2155_v10, %v2161_v27 }
0x14be   :  { %v2182_v32 = vpop.permute.xlu1 %2181 }
0x14bf   :  { %5628 = vpow2.f32 %v2164_v30  ;;  %v2166_v33 = vmul.f32 1.442695, %v2163_v31  ;;  %v2187_v34 = vsel %vm494_vm3, %v2182_v32, 0 }
0x14c0   :  { %5211 = vmatpush3.bf16.msra.mxu0 %v2187_v34 }
0x14c1   :  { %5630 = vpow2.f32 %v2166_v33  ;;  %5222 = vmatprep.subr.bf16.mxu0 %v5922_v0 }
0x14c2   :  { %v2281_v14 = vpop.permute.xlu1 %2280 }
0x14c3   :  { %v2286_v44 = vsel %vm372_vm2, %v2281_v14, 0 }
0x14c6   :  { %v2331_v19 = vpop.permute.xlu1 %2330 }
0x14c7   :  { %v2336_v37 = vsel %vm372_vm2, %v2331_v19, 0 }
0x14c9   :  { %v5629_v35 = vpop.eup %5628 }
0x14ca   :  { %v2168_v36 = vsel %vm372_vm2, %v5629_v35, 0.0  ;;  %v2279_v47 = vpop.permute.xlu1 %2278 }
0x14cb   :  { %v5631_v39 = vpop.eup %5630  ;;  %2169 = vadd.xlane.f32.xlu0 %v2168_v36 }
0x14cc   :  { %v2171_v40 = vsel %vm372_vm2, %v5631_v39, 0.0 }
0x14cf   :  { %2172 = vadd.xlane.f32.xlu0 %v2171_v40 }
0x14e5   :  { %2230 = vrot.lane.b32.xlu0 %v6504_v18, %s5924_s6 }
0x14e9   :  { %2328 = vrot.lane.b32.xlu0 %v6502_v16, %s5925_s2 }
0x1558   :  { %v2170_v3 = vpop.xlane.xlu0 %2169 }
0x1559   :  { %5632 = vrcp.f32 %v2170_v3 }
0x155c   :  { %v2173_v4 = vpop.xlane.xlu0 %2172 }
0x155d   :  { %5634 = vrcp.f32 %v2173_v4 }
0x1560   :  { %v2231_v38 = vpop.permute.xlu0 %2230 }
0x1561   :  { %v2236_v9 = vsel %vm494_vm3, %v2231_v38, 0 }
0x1562   :  { %5217 = vmatpush3.bf16.msra.mxu1 %v2236_v9 }
0x1563   :  { %v5633_v13 = vpop.eup %5632  ;;  %5228 = vmatprep.subr.bf16.mxu1 %v5922_v0 }
0x1564   :  { %v2176_v41 = vmul.f32 %v5633_v13, %v5629_v35  ;;  %v2329_v48 = vpop.permute.xlu0 %2328 }
0x1566   :  { %v2178_v42 = vpack.c.bf16 %v2176_v41, %v2176_v41 }
0x1567   :  { %v5635_v43 = vpop.eup %5634 }
0x1568   :  { %v2177_v45 = vmul.f32 %v5635_v43, %v5631_v39  ;;  %5213 = vmatmul.mubr.msk.bf16.vlgmr.msra.gmra.mrb[72].mxu0 %vm372_vm2, %v2178_v42 }
0x1569   :  { %5223 = vmatpush3.bf16.xpose.msra.mxu0 %v2286_v44  ;;  %5224 = vmatprep.mubr.msk.bf16.mxu0 %vm5923_vm0, %v5922_v0 }
0x156a   :  { %v2179_v29 = vpack.c.bf16 %v2177_v45, %v2177_v45  ;;  %5234 = vmatprep.subr.bf16.mxu0 %v5922_v0 }
0x156c   :  { %5219 = vmatmul.mubr.msk.bf16.vlgmr.msra.gmra.mrb[52].mxu1 %vm372_vm2, %v2179_v29 }
0x156d   :  { %5229 = vmatpush3.bf16.xpose.msra.mxu1 %v2336_v37  ;;  %5230 = vmatprep.mubr.msk.bf16.mxu1 %vm5923_vm0, %v5922_v0 }
0x156e   :  { %5240 = vmatprep.subr.bf16.mxu1 %v5922_v0 }
0x1570   :  { %5225 = vmatmul.mubr.msk.bf16.vlgmr.msra.gmra.mrb[76].mxu0 %vm372_vm2, %v2279_v47 }
0x1571   :  { %5236 = vmatprep.mubr.msk.bf16.mxu0 %vm5923_vm0, %v5922_v0 }
0x1574   :  { %5231 = vmatmul.mubr.msk.bf16.vlgmr.msra.gmra.mrb[56].mxu1 %vm372_vm2, %v2329_v48 }
0x1575   :  { %5242 = vmatprep.mubr.msk.bf16.mxu1 %vm5923_vm0, %v5922_v0 }
0x163b   :  { %v6588_v49 = vpop.f32.mrb[72].mxu0 }
0x163c   :  { %v5214_v50 = vpop.f32.mrb[73].mxu0 }
0x163d   :  { %v2226_v51 = vpop.f32.mrb[74].mxu0 }
0x163e   :  { %v5215_v52 = vpop.f32.mrb[75].mxu0 }
0x163f   :  { %v6590_v53 = vpop.f32.mrb[52].mxu1 }
0x1640   :  { %v5496_v54 = vpack.i.bf16 %v6590_v53, %v6588_v49  ;;  %v5220_v55 = vpop.f32.mrb[53].mxu1 }
0x1641   :  { %v2275_v57 = vpop.f32.mrb[54].mxu1 }
0x1642   :  { %v5221_v28 = vpop.f32.mrb[55].mxu1 }
0x1643   :  { %v2322_v60 = vpop.f32.mrb[76].mxu0 }
0x1644   :  { %v2378_v61 = vmul.f32 0.35355338, %v2322_v60  ;;  %v5226_v63 = vpop.f32.mrb[77].mxu0 }
0x1645   :  { %v2325_v1 = vpop.f32.mrb[78].mxu0 }
0x1646   :  { %v5227_v2 = vpop.f32.mrb[79].mxu0  ;;  %v2380_v5 = vsel %vm372_vm2, %v2378_v61, -inf }
0x1647   :  { %v2372_v6 = vpop.f32.mrb[56].mxu1  ;;  %2381 = vmax.xlane.f32.xlu1 %v2380_v5 }
0x1648   :  { %v2379_v7 = vmul.f32 0.35355338, %v2372_v6  ;;  %v5232_v8 = vpop.f32.mrb[57].mxu1 }
0x1649   :  { %v2375_v10 = vpop.f32.mrb[58].mxu1 }
0x164a   :  { %v5233_v11 = vpop.f32.mrb[59].mxu1  ;;  %v2383_v15 = vsel %vm372_vm2, %v2379_v7, -inf }
0x164b   :  { %2384 = vmax.xlane.f32.xlu0 %v2383_v15 }
0x1658   :  { %2404 = vrot.lane.b32.xlu1 %v6500_v21, %s5925_s2 }
0x165c   :  { %2502 = vrot.lane.b32.xlu1 %v6488_v58, %s5926_s23 }
0x1660   :  { %2552 = vrot.lane.b32.xlu1 %v6490_v62, %s5926_s23 }
0x1664   :  { %2500 = vrot.lane.b32.xlu1 %v6498_v12, %s5926_s23 }
0x16d4   :  { %v2382_v17 = vpop.xlane.xlu1 %2381 }
0x16d5   :  { %v2386_v20 = vsub.f32 %v2378_v61, %v2382_v17 }
0x16d7   :  { %v2388_v22 = vmul.f32 1.442695, %v2386_v20 }
0x16d8   :  { %v2385_v24 = vpop.xlane.xlu0 %2384  ;;  %v2405_v25 = vpop.permute.xlu1 %2404 }
0x16d9   :  { %5636 = vpow2.f32 %v2388_v22  ;;  %v2387_v26 = vsub.f32 %v2379_v7, %v2385_v24  ;;  %v2410_v27 = vsel %vm494_vm3, %v2405_v25, 0 }
0x16da   :  { %5235 = vmatpush3.bf16.msra.mxu0 %v2410_v27 }
0x16db   :  { %v2390_v30 = vmul.f32 1.442695, %v2387_v26  ;;  %5246 = vmatprep.subr.bf16.mxu0 %v5922_v0 }
0x16dc   :  { %v2503_v39 = vpop.permute.xlu1 %2502 }
0x16dd   :  { %5638 = vpow2.f32 %v2390_v30  ;;  %v2508_v38 = vsel %vm372_vm2, %v2503_v39, 0 }
0x16e3   :  { %v5637_v58 = vpop.eup %5636 }
0x16e4   :  { %v2392_v62 = vsel %vm372_vm2, %v5637_v58, 0.0 }
0x16e5   :  { %2393 = vadd.xlane.f32.xlu0 %v2392_v62 }
0x16e7   :  { %v5639_v31 = vpop.eup %5638 }
0x16e8   :  { %v2395_v12 = vsel %vm372_vm2, %v5639_v31, 0.0 }
0x16e9   :  { %2396 = vadd.xlane.f32.xlu0 %v2395_v12 }
0x16ff   :  { %2452 = vrot.lane.b32.xlu0 %v6504_v18, %s5925_s2 }
0x1703   :  { %2550 = vrot.lane.b32.xlu0 %v6502_v16, %s5926_s23  ;;  %v2553_v16 = vpop.permute.xlu1 %2552 }
0x1704   :  { %v2558_v14 = vsel %vm372_vm2, %v2553_v16, 0 }
0x1707   :  { %v2501_v41 = vpop.permute.xlu1 %2500 }
0x1772   :  { %v2394_v32 = vpop.xlane.xlu0 %2393 }
0x1773   :  { %5640 = vrcp.f32 %v2394_v32  ;;  %v5550_v32 = vld [vmem:[%s7043_s7 + $0x10] sm:$0xff]  }
0x1776   :  { %v2397_v33 = vpop.xlane.xlu0 %2396 }
0x1777   :  { %5642 = vrcp.f32 %v2397_v33  ;;  %v5551_v33 = vld [vmem:[%s7043_s7 + $0x18] sm:$0xff]  }
0x177a   :  { %v2453_v34 = vpop.permute.xlu0 %2452 }
0x177b   :  { %v2458_v35 = vsel %vm494_vm3, %v2453_v34, 0 }
0x177c   :  { %5241 = vmatpush3.bf16.msra.mxu1 %v2458_v35 }
0x177d   :  { %v5641_v36 = vpop.eup %5640  ;;  %5252 = vmatprep.subr.bf16.mxu1 %v5922_v0 }
0x177e   :  { %v2400_v40 = vmul.f32 %v5641_v36, %v5637_v58  ;;  %v2551_v42 = vpop.permute.xlu0 %2550 }
0x1780   :  { %v2402_v3 = vpack.c.bf16 %v2400_v40, %v2400_v40 }
0x1781   :  { %v5643_v4 = vpop.eup %5642 }
0x1782   :  { %v2401_v9 = vmul.f32 %v5643_v4, %v5639_v31  ;;  %5237 = vmatmul.mubr.msk.bf16.vlgmr.msra.gmra.mrb[80].mxu0 %vm372_vm2, %v2402_v3 }
0x1783   :  { %5247 = vmatpush3.bf16.xpose.msra.mxu0 %v2508_v38  ;;  %5248 = vmatprep.mubr.msk.bf16.mxu0 %vm5923_vm0, %v5922_v0 }
0x1784   :  { %v2403_v13 = vpack.c.bf16 %v2401_v9, %v2401_v9  ;;  %5258 = vmatprep.subr.bf16.mxu0 %v5922_v0 }
0x1786   :  { %5243 = vmatmul.mubr.msk.bf16.vlgmr.msra.gmra.mrb[60].mxu1 %vm372_vm2, %v2403_v13 }
0x1787   :  { %5253 = vmatpush3.bf16.xpose.msra.mxu1 %v2558_v14  ;;  %5254 = vmatprep.mubr.msk.bf16.mxu1 %vm5923_vm0, %v5922_v0 }
0x1788   :  { %5264 = vmatprep.subr.bf16.mxu1 %v5922_v0 }
0x178a   :  { %5249 = vmatmul.mubr.msk.bf16.vlgmr.msra.gmra.mrb[84].mxu0 %vm372_vm2, %v2501_v41 }
0x178b   :  { %5260 = vmatprep.mubr.msk.bf16.mxu0 %vm5923_vm0, %v5922_v0 }
0x178e   :  { %5255 = vmatmul.mubr.msk.bf16.vlgmr.msra.gmra.mrb[64].mxu1 %vm372_vm2, %v2551_v42 }
0x178f   :  { %5266 = vmatprep.mubr.msk.bf16.mxu1 %vm5923_vm0, %v5922_v0 }
0x1855   :  { %v2446_v43 = vpop.f32.mrb[80].mxu0 }
0x1856   :  { %v5238_v44 = vpop.f32.mrb[81].mxu0 }
0x1857   :  { %v2449_v45 = vpop.f32.mrb[82].mxu0 }
0x1858   :  { %v5239_v19 = vpop.f32.mrb[83].mxu0 }
0x1859   :  { %v2494_v29 = vpop.f32.mrb[60].mxu1 }
0x185a   :  { %v5501_v37 = vpack.i.bf16 %v2494_v29, %v2446_v43  ;;  %v5244_v47 = vpop.f32.mrb[61].mxu1 }
0x185b   :  { %v2497_v48 = vpop.f32.mrb[62].mxu1 }
0x185c   :  { %v5245_v50 = vpop.f32.mrb[63].mxu1 }
0x185d   :  { %v2544_v51 = vpop.f32.mrb[84].mxu0 }
0x185e   :  { %v2600_v52 = vmul.f32 0.35355338, %v2544_v51  ;;  %v5250_v55 = vpop.f32.mrb[85].mxu0 }
0x185f   :  { %v2547_v57 = vpop.f32.mrb[86].mxu0 }
0x1860   :  { %v5251_v28 = vpop.f32.mrb[87].mxu0  ;;  %v2602_v60 = vsel %vm372_vm2, %v2600_v52, -inf }
0x1861   :  { %v2594_v61 = vpop.f32.mrb[64].mxu1  ;;  %2603 = vmax.xlane.f32.xlu1 %v2602_v60 }
0x1862   :  { %v2601_v63 = vmul.f32 0.35355338, %v2594_v61  ;;  %v5256_v1 = vpop.f32.mrb[65].mxu1 }
0x1863   :  { %v2597_v2 = vpop.f32.mrb[66].mxu1 }
0x1864   :  { %v5257_v5 = vpop.f32.mrb[67].mxu1  ;;  %v2605_v6 = vsel %vm372_vm2, %v2601_v63, -inf }
0x1865   :  { %2606 = vmax.xlane.f32.xlu0 %v2605_v6 }
0x1872   :  { %2626 = vrot.lane.b32.xlu1 %v6500_v21, %s5926_s23 }
0x1876   :  { %5497 = vrot.lane.b32.xlu1 %v5496_v54, %s5917_s28 }
0x187a   :  { %5502 = vrot.lane.b32.xlu1 %v5501_v37, %s5911_s20 }
0x18ee   :  { %v2604_v7 = vpop.xlane.xlu1 %2603 }
0x18ef   :  { %v2608_v8 = vsub.f32 %v2600_v52, %v2604_v7 }
0x18f1   :  { %v2610_v10 = vmul.f32 1.442695, %v2608_v8 }
0x18f2   :  { %v2607_v11 = vpop.xlane.xlu0 %2606  ;;  %v2627_v15 = vpop.permute.xlu1 %2626 }
0x18f3   :  { %5644 = vpow2.f32 %v2610_v10  ;;  %v2609_v17 = vsub.f32 %v2601_v63, %v2607_v11  ;;  %v2632_v20 = vsel %vm494_vm3, %v2627_v15, 0 }
0x18f4   :  { %5259 = vmatpush3.bf16.msra.mxu0 %v2632_v20 }
0x18f5   :  { %v2612_v22 = vmul.f32 1.442695, %v2609_v17  ;;  %5270 = vmatprep.subr.bf16.mxu0 %v5922_v0 }
0x18f6   :  { %v5498_v16 = vpop.permute.xlu1 %5497 }
0x18f7   :  { %5646 = vpow2.f32 %v2612_v22  ;;  %v5500_v14 = vunpack.i.h.bf16 %v5498_v16  ;;  %v5499_v41 = vunpack.i.l.bf16 %v5498_v16  ;;  %v5561_v16 = vld [vmem:[%s7049_s13 + $0x78] sm:$0xff]  }
0x18f9   :  { %v2747_v45 = vsel %vm372_vm2, %v6550_v59, %v5500_v14  ;;  %v2746_v19 = vsel %vm372_vm2, %v6548_v56, %v5499_v41  ;;  %v4694_v59 = vld [vmem:[#allocation10 + $0x1] ss:$0 sm:$0xff] }
0x18fa   :  { %v5503_v13 = vpop.permute.xlu1 %5502 }
0x18fb   :  { %v5505_v42 = vunpack.i.h.bf16 %v5503_v13  ;;  %v5504_v43 = vunpack.i.l.bf16 %v5503_v13  ;;  %v4704_v13 = vld [vmem:[#allocation14 + $0x1] ss:$0 sm:$0xff] }
0x18fd   :  { %v5645_v21 = vpop.eup %5644  ;;  %v2748_v47 = vsel %vm1282_vm4, %v2746_v19, %v5504_v43  ;;  %v2749_v48 = vsel %vm1282_vm4, %v2747_v45, %v5505_v42 }
0x18fe   :  { %v2614_v49 = vsel %vm372_vm2, %v5645_v21, 0.0 }
0x18ff   :  { %2615 = vadd.xlane.f32.xlu0 %v2614_v49  ;;  %v5554_v49 = vld [vmem:[%s7049_s13 + $0x40] sm:$0xff]  }
0x1901   :  { %v5647_v53 = vpop.eup %5646 }
0x1902   :  { %v2617_v54 = vsel %vm372_vm2, %v5647_v53, 0.0 }
0x1903   :  { %2618 = vadd.xlane.f32.xlu0 %v2617_v54  ;;  %v5556_v54 = vld [vmem:[%s7049_s13 + $0x50] sm:$0xff]  }
0x1919   :  { %2674 = vrot.lane.b32.xlu0 %v6504_v18, %s5926_s23 }
0x198c   :  { %v2616_v24 = vpop.xlane.xlu0 %2615 }
0x198d   :  { %5648 = vrcp.f32 %v2616_v24  ;;  %v5557_v24 = vld [vmem:[%s7049_s13 + $0x58] sm:$0xff]  }
0x1990   :  { %v2619_v25 = vpop.xlane.xlu0 %2618 }
0x1991   :  { %5650 = vrcp.f32 %v2619_v25  ;;  %v5558_v25 = vld [vmem:[%s7049_s13 + $0x60] sm:$0xff]  }
0x1994   :  { %v2675_v26 = vpop.permute.xlu0 %2674 }
0x1995   :  { %v2680_v27 = vsel %vm494_vm3, %v2675_v26, 0  ;;  %v5559_v26 = vld [vmem:[%s7049_s13 + $0x68] sm:$0xff]  }
0x1996   :  { %5265 = vmatpush3.bf16.msra.mxu1 %v2680_v27 }
0x1997   :  { %v5649_v30 = vpop.eup %5648  ;;  %5278 = vmatprep.subr.bf16.mxu1 %v5922_v0 }
0x1998   :  { %v2622_v58 = vmul.f32 %v5649_v30, %v5645_v21  ;;  %v5553_v21 = vld [vmem:[%s7047_s11 + $0x18] sm:$0xff]  }
0x199a   :  { %v2624_v62 = vpack.c.bf16 %v2622_v58, %v2622_v58 }
0x199b   :  { %v5651_v31 = vpop.eup %5650 }
0x199c   :  { %v2623_v12 = vmul.f32 %v5651_v31, %v5647_v53  ;;  %5261 = vmatmul.mubr.msk.bf16.vlgmr.msra.gmra.mrb[88].mxu0 %vm372_vm2, %v2624_v62  ;;  %v5555_v53 = vld [vmem:[%s7049_s13 + $0x48] sm:$0xff]  }
0x199d   :  { %5274 = vmatprep.mubr.msk.bf16.mxu0 %vm5923_vm0, %v5922_v0  ;;  %5271 = vmatpush3.bf16.msra.mxu0 %v5550_v32 }
0x199e   :  { %v2625_v18 = vpack.c.bf16 %v2623_v12, %v2623_v12  ;;  %5272 = vmatprep.subr.bf16.mxu0 %v5922_v0 }
0x19a0   :  { %5267 = vmatmul.mubr.msk.bf16.vlgmr.msra.gmra.mrb[68].mxu1 %vm372_vm2, %v2625_v18 }
0x19a1   :  { %5282 = vmatprep.mubr.msk.bf16.mxu1 %vm5923_vm0, %v5922_v0  ;;  %5273 = vmatpush3.bf16.msra.mxu0 %v5551_v33  ;;  %v4698_v33 = vld [vmem:[#allocation11 + $0x1] ss:$0 sm:$0xff] }
0x19a2   :  { %5286 = vmatprep.subr.bf16.mxu0 %v5922_v0 }
0x1a6f   :  { %v2668_v34 = vpop.f32.mrb[88].mxu0 }
0x1a70   :  { %v5262_v35 = vpop.f32.mrb[89].mxu0 }
0x1a71   :  { %v2671_v36 = vpop.f32.mrb[90].mxu0 }
0x1a72   :  { %v5263_v39 = vpop.f32.mrb[91].mxu0 }
0x1a73   :  { %v2716_v40 = vpop.f32.mrb[68].mxu1  ;;  %v4699_v39 = vld [vmem:[#allocation13 + $0x1] ss:$0 sm:$0xff] }
0x1a74   :  { %v5506_v3 = vpack.i.bf16 %v2716_v40, %v2668_v34  ;;  %v5268_v4 = vpop.f32.mrb[69].mxu1 }
0x1a75   :  { %v2719_v38 = vpop.f32.mrb[70].mxu1 }
0x1a76   :  { %v5269_v9 = vpop.f32.mrb[71].mxu1  ;;  %5507 = vrot.lane.b32.xlu1 %v5506_v3, %s5927_s12 }
0x1a77   :  { %v5560_v9 = vld [vmem:[%s7049_s13 + $0x70] sm:$0xff]  }
0x1ae8   :  { %v5508_v44 = vpop.permute.xlu1 %5507 }
0x1ae9   :  { %v5510_v29 = vunpack.i.h.bf16 %v5508_v44  ;;  %v5509_v37 = vunpack.i.l.bf16 %v5508_v44 }
0x1aeb   :  { %v2751_v50 = vsel %vm1285_vm5, %v2749_v48, %v5510_v29  ;;  %v2750_v51 = vsel %vm1285_vm5, %v2748_v47, %v5509_v37  ;;  %v4725_v47 = vld [vmem:[%s7050_s14 + $0x1] ss:$0 sm:$0xff] }
0x1aec   :  { %v2752_v52 = vpack.c.bf16 %v2751_v50, %v2750_v51 }
0x1aee   :  { %5275 = vmatmul.mubr.msk.bf16.vlgmr.msra.gmra.mrb[92].mxu0 %vm193_vm1, %v2752_v52 }
0x1aef   :  { %5302 = vmatprep.mubr.msk.bf16.mxu0 %vm5923_vm0, %v5922_v0  ;;  %5287 = vmatpush3.bf16.msra.mxu0 %v5554_v49 }
0x1af0   :  { %5288 = vmatprep.subr.bf16.mxu0 %v5922_v0 }
0x1af3   :  { %5289 = vmatpush3.bf16.msra.mxu0 %v5555_v53 }
0x1af4   :  { %5290 = vmatprep.subr.bf16.mxu0 %v5922_v0 }
0x1af7   :  { %5291 = vmatpush3.bf16.msra.mxu0 %v5556_v54  ;;  %v4736_v54 = vld [vmem:[%s7051_s15 + $0x1] ss:$0 sm:$0xff] }
0x1af8   :  { %5292 = vmatprep.subr.bf16.mxu0 %v5922_v0 }
0x1afb   :  { %5293 = vmatpush3.bf16.msra.mxu0 %v5557_v24 }
0x1afc   :  { %5294 = vmatprep.subr.bf16.mxu0 %v5922_v0 }
0x1aff   :  { %5295 = vmatpush3.bf16.msra.mxu0 %v5558_v25 }
0x1b00   :  { %5296 = vmatprep.subr.bf16.mxu0 %v5922_v0 }
0x1b03   :  { %5297 = vmatpush3.bf16.msra.mxu0 %v5559_v26 }
0x1b04   :  { %5298 = vmatprep.subr.bf16.mxu0 %v5922_v0 }
0x1b07   :  { %5299 = vmatpush3.bf16.msra.mxu0 %v5560_v9 }
0x1b08   :  { %5300 = vmatprep.subr.bf16.mxu0 %v5922_v0 }
0x1b0b   :  { %5301 = vmatpush3.bf16.msra.mxu0 %v5561_v16 }
0x1b0c   :  { %5336 = vmatprep.subr.bf16.mxu0 %v5922_v0 }
0x1bc1   :  { %v2815_v55 = vpop.f32.mrb[92].mxu0 }
0x1bc2   :  { %v2816_v57 = vadd.f32 %v4694_v59, %v2815_v55  ;;  %v5276_v56 = vpop.f32.mrb[93].mxu0 }
0x1bc3   :  { %v2818_v28 = vpop.f32.mrb[94].mxu0 }
0x1bc4   :  { %v2819_v60 = vadd.f32 %v4694_v59, %v2818_v28  ;;  %v5277_v61 = vpop.f32.mrb[95].mxu0  ;;  %v2822_v63 = vadd.f32 %v2816_v57, %v6457_v23 }
0x1bc6   :  { %v2828_v1 = vsel %vm193_vm1, %v2822_v63, 0.0  ;;  %v2823_v2 = vadd.f32 %v2819_v60, %v6459_v46  ;;  %v5552_v46 = vld [vmem:[%s7047_s11 + $0x10] sm:$0xff]  }
0x1bc7   :  { %2829 = vadd.xlane.f32.xlu0 %v2828_v1  ;;  %5279 = vmatpush3.bf16.msra.mxu1 %v5552_v46 }
0x1bc8   :  { %v2831_v5 = vsel %vm193_vm1, %v2823_v2, 0.0  ;;  %5280 = vmatprep.subr.bf16.mxu1 %v5922_v0 }
0x1bc9   :  { %2832 = vadd.xlane.f32.xlu1 %v2831_v5 }
0x1bcb   :  { %5281 = vmatpush3.bf16.msra.mxu1 %v5553_v21 }
0x1bcc   :  { %5306 = vmatprep.subr.bf16.mxu1 %v5922_v0 }
0x1c54   :  { %v2830_v6 = vpop.xlane.xlu0 %2829 }
0x1c55   :  { %v2834_v7 = vmul.f32 0.03125, %v2830_v6 }
0x1c56   :  { %v2833_v8 = vpop.xlane.xlu1 %2832 }
0x1c57   :  { %v2836_v10 = vsub.f32 %v2822_v63, %v2834_v7  ;;  %v2835_v11 = vmul.f32 0.03125, %v2833_v8 }
0x1c59   :  { %v2837_v15 = vsub.f32 %v2823_v2, %v2835_v11  ;;  %v2838_v17 = vmul.f32 %v2836_v10, %v2836_v10 }
0x1c5b   :  { %v2840_v20 = vsel %vm193_vm1, %v2838_v17, 0.0  ;;  %v2839_v22 = vmul.f32 %v2837_v15, %v2837_v15  ;;  %v5563_v17 = vld [vmem:[%s7061_s1 + $0x28] sm:$0xff]  }
0x1c5c   :  { %2841 = vadd.xlane.f32.xlu0 %v2840_v20 }
0x1c5d   :  { %v2843_v23 = vsel %vm193_vm1, %v2839_v22, 0.0 }
0x1c60   :  { %2844 = vadd.xlane.f32.xlu0 %v2843_v23 }
0x1ce9   :  { %v2842_v27 = vpop.xlane.xlu0 %2841 }
0x1cea   :  { %v2846_v30 = vmul.f32 0.03125, %v2842_v27 }
0x1cec   :  { %v2848_v58 = vadd.f32 1e-05, %v2846_v30  ;;  %v4737_v30 = vld [vmem:[%s7052_s16 + $0x1] ss:$0 sm:$0xff] }
0x1ced   :  { %v2845_v62 = vpop.xlane.xlu0 %2844 }
0x1cee   :  { %5652 = vrsqrt.f32 %v2848_v58  ;;  %v2847_v31 = vmul.f32 0.03125, %v2845_v62 }
0x1cf0   :  { %v2849_v12 = vadd.f32 1e-05, %v2847_v31 }
0x1cf2   :  { %5654 = vrsqrt.f32 %v2849_v12  ;;  %v5564_v12 = vld [vmem:[%s7039_s3 + $0x20] sm:$0xff]  }
0x1cf8   :  { %v5653_v18 = vpop.eup %5652 }
0x1cf9   :  { %v2852_v32 = vmul.f32 %v5653_v18, %v2836_v10 }
0x1cfb   :  { %v2860_v35 = vmul.f32 %v4698_v33, %v2852_v32  ;;  %v5565_v32 = vld [vmem:[%s7039_s3 + $0x28] sm:$0xff]  }
0x1cfc   :  { %v5655_v34 = vpop.eup %5654 }
0x1cfd   :  { %v2853_v36 = vmul.f32 %v5655_v34, %v2837_v15  ;;  %v2868_v3 = vadd.f32 %v4699_v39, %v2860_v35  ;;  %v5562_v15 = vld [vmem:[%s7061_s1 + $0x20] sm:$0xff]   ;;  %v5567_v34 = vld [vmem:[%s7041_s5 + $0x28] sm:$0xff]  }
0x1cff   :  { %v2861_v40 = vmul.f32 %v4698_v33, %v2853_v36  ;;  %v5566_v33 = vld [vmem:[%s7041_s5 + $0x20] sm:$0xff]  }
0x1d01   :  { %v2869_v4 = vadd.f32 %v4699_v39, %v2861_v40 }
0x1d03   :  { %v2870_v38 = vpack.c.bf16 %v2869_v4, %v2868_v3 }
0x1d05   :  { %5283 = vmatmul.mubr.msk.bf16.vlgmr.msra.gmra.mrb[72].mxu1 %vm193_vm1, %v2870_v38 }
0x1d06   :  { %5310 = vmatprep.mubr.msk.bf16.mxu1 %vm5923_vm0, %v5922_v0  ;;  %5307 = vmatpush3.bf16.msra.mxu1 %v5562_v15 }
0x1d07   :  { %5308 = vmatprep.subr.bf16.mxu1 %v5922_v0 }
0x1d0a   :  { %5309 = vmatpush3.bf16.msra.mxu1 %v5563_v17 }
0x1d0b   :  { %5314 = vmatprep.subr.bf16.mxu1 %v5922_v0 }
0x1dd8   :  { %v2933_v14 = vpop.f32.mrb[72].mxu1 }
0x1dd9   :  { %v2934_v41 = vadd.f32 %v4704_v13, %v2933_v14  ;;  %v5284_v42 = vpop.f32.mrb[73].mxu1 }
0x1dda   :  { %v2936_v43 = vpop.f32.mrb[74].mxu1  ;;  %v4742_v42 = vld [vmem:[#allocation5 + $0x2] ss:$0 sm:$0xff] }
0x1ddb   :  { %v2937_v44 = vadd.f32 %v4704_v13, %v2936_v43  ;;  %v5285_v45 = vpop.f32.mrb[75].mxu1  ;;  %v2940_v19 = vmax.f32 %v2934_v41, 0.0 }
0x1ddc   :  { %v4758_v45 = vld [vmem:[#allocation8 + $0x2] ss:$0 sm:$0xff] }
0x1ddd   :  { %v2941_v29 = vmax.f32 %v2937_v44, 0.0 }
0x1ddf   :  { %v2942_v37 = vpack.c.bf16 %v2941_v29, %v2940_v19 }
0x1de1   :  { %5303 = vmatmul.mubr.bf16.vlgmr.msra.gmra.mrb[96].mxu0 %v2942_v37 }
0x1de2   :  { %5338 = vmatprep.mubr.msk.bf16.mxu0 %vm5923_vm0, %v5922_v0 }
0x1eb4   :  { %v3050_v48 = vpop.f32.mrb[96].mxu0 }
0x1eb5   :  { %v3051_v50 = vadd.f32 %v4725_v47, %v3050_v48  ;;  %v5304_v51 = vpop.f32.mrb[97].mxu0 }
0x1eb6   :  { %v3053_v52 = vpop.f32.mrb[98].mxu0 }
0x1eb7   :  { %v3054_v59 = vadd.f32 %v4725_v47, %v3053_v52  ;;  %v5305_v55 = vpop.f32.mrb[99].mxu0  ;;  %v3057_v57 = vadd.f32 %v3051_v50, %v2868_v3  ;;  %v4750_v3 = vld [vmem:[#allocation7 + $0x2] ss:$0 sm:$0xff] }
0x1eb9   :  { %v3063_v56 = vsel %vm193_vm1, %v3057_v57, 0.0  ;;  %v3058_v28 = vadd.f32 %v3054_v59, %v2869_v4 }
0x1eba   :  { %3064 = vadd.xlane.f32.xlu0 %v3063_v56 }
0x1ebb   :  { %v3066_v60 = vsel %vm193_vm1, %v3058_v28, 0.0 }
0x1ebc   :  { %3067 = vadd.xlane.f32.xlu1 %v3066_v60 }
0x1f47   :  { %v3065_v61 = vpop.xlane.xlu0 %3064 }
0x1f48   :  { %v3069_v63 = vmul.f32 0.03125, %v3065_v61 }
0x1f49   :  { %v3068_v1 = vpop.xlane.xlu1 %3067 }
0x1f4a   :  { %v3071_v2 = vsub.f32 %v3057_v57, %v3069_v63  ;;  %v3070_v5 = vmul.f32 0.03125, %v3068_v1 }
0x1f4c   :  { %v3072_v6 = vsub.f32 %v3058_v28, %v3070_v5  ;;  %v3073_v7 = vmul.f32 %v3071_v2, %v3071_v2 }
0x1f4e   :  { %v3075_v8 = vsel %vm193_vm1, %v3073_v7, 0.0  ;;  %v3074_v10 = vmul.f32 %v3072_v6, %v3072_v6 }
0x1f4f   :  { %3076 = vadd.xlane.f32.xlu0 %v3075_v8 }
0x1f50   :  { %v3078_v11 = vsel %vm193_vm1, %v3074_v10, 0.0 }
0x1f51   :  { %3079 = vadd.xlane.f32.xlu1 %v3078_v11 }
0x1fdc   :  { %v3077_v20 = vpop.xlane.xlu0 %3076 }
0x1fdd   :  { %v3081_v22 = vmul.f32 0.03125, %v3077_v20 }
0x1fde   :  { %v3080_v23 = vpop.xlane.xlu1 %3079 }
0x1fdf   :  { %v3083_v46 = vadd.f32 1e-05, %v3081_v22  ;;  %v3082_v21 = vmul.f32 0.03125, %v3080_v23 }
0x1fe1   :  { %5656 = vrsqrt.f32 %v3083_v46  ;;  %v3084_v49 = vadd.f32 1e-05, %v3082_v21 }
0x1fe3   :  { %5658 = vrsqrt.f32 %v3084_v49 }
0x1feb   :  { %v5657_v53 = vpop.eup %5656 }
0x1fec   :  { %v3087_v24 = vmul.f32 %v5657_v53, %v3071_v2 }
0x1fed   :  { %v5659_v25 = vpop.eup %5658 }
0x1fee   :  { %v3095_v26 = vmul.f32 %v4736_v54, %v3087_v24  ;;  %v3088_v27 = vmul.f32 %v5659_v25, %v3072_v6 }
0x1ff0   :  { %v3096_v58 = vmul.f32 %v4736_v54, %v3088_v27  ;;  %v6745_v62 = vadd.f32 %v4737_v30, %v3095_v26 }
0x1ff2   :  { %v6747_v31 = vadd.f32 %v4737_v30, %v3096_v58 }
0x1ff4   :  { %v3105_v18 = vpack.c.bf16 %v6747_v31, %v6745_v62 }
0x1ff6   :  { %5311 = vmatmul.mubr.msk.bf16.vlgmr.msra.gmra.mrb[76].mxu1 %vm193_vm1, %v3105_v18 }
0x1ff7   :  { %5315 = vmatpush3.bf16.msra.mxu1 %v5564_v12  ;;  %5318 = vmatprep.mubr.msk.bf16.mxu1 %vm5923_vm0, %v5922_v0 }
0x1ff8   :  { %5316 = vmatprep.subr.bf16.mxu1 %v5922_v0 }
0x1ffb   :  { %5317 = vmatpush3.bf16.msra.mxu1 %v5565_v32 }
0x1ffc   :  { %5322 = vmatprep.subr.bf16.mxu1 %v5922_v0 }
0x1ffe   :  { %5319 = vmatmul.mubr.msk.bf16.vlgmr.msra.gmra.mrb[80].mxu1 %vm193_vm1, %v3105_v18 }
0x1fff   :  { %5323 = vmatpush3.bf16.msra.mxu1 %v5566_v33  ;;  %5326 = vmatprep.mubr.msk.bf16.mxu1 %vm5923_vm0, %v5922_v0 }
0x2000   :  { %5324 = vmatprep.subr.bf16.mxu1 %v5922_v0 }
0x2003   :  { %5325 = vmatpush3.bf16.msra.mxu1 %v5567_v34 }
0x2004   :  { %5330 = vmatprep.subr.bf16.mxu1 %v5922_v0 }
0x2006   :  { %5327 = vmatmul.mubr.msk.bf16.vlgmr.msra.gmra.mrb[84].mxu1 %vm193_vm1, %v3105_v18 }
0x2007   :  { %5332 = vmatprep.mubr.msk.bf16.mxu1 %vm5923_vm0, %v5922_v0 }
0x20c9   :  { %v3168_v35 = vpop.f32.mrb[76].mxu1 }
0x20ca   :  { %v5312_v36 = vpop.f32.mrb[77].mxu1  ;;  %v3169_v19 = vadd.f32 %v4742_v42, %v3168_v35 }
0x20cb   :  { %v3171_v39 = vpop.f32.mrb[78].mxu1 }
0x20cc   :  { %v5313_v40 = vpop.f32.mrb[79].mxu1  ;;  %v3172_v47 = vadd.f32 %v4742_v42, %v3171_v39  ;;  %v6786_v52 = vpack.c.bf16 %v3169_v19, %v3169_v19 }
0x20ce   :  { %v6790_v56 = vpack.c.bf16 %v3172_v47, %v3172_v47 }
0x20d1   :  { %v3234_v4 = vpop.f32.mrb[80].mxu1 }
0x20d2   :  { %v3235_v38 = vadd.f32 %v4750_v3, %v3234_v4  ;;  %v5320_v9 = vpop.f32.mrb[81].mxu1 }
0x20d3   :  { %v3237_v16 = vpop.f32.mrb[82].mxu1 }
0x20d4   :  { %v6776_v13 = vpack.c.bf16 %v3235_v38, %v3235_v38  ;;  %v3238_v14 = vadd.f32 %v4750_v3, %v3237_v16  ;;  %v5321_v41 = vpop.f32.mrb[83].mxu1 }
0x20d6   :  { %v6778_v43 = vpack.c.bf16 %v3238_v14, %v3238_v14  ;;  %v3317_v44 = vsel %vm372_vm2, %v6776_v13, 0 }
0x20d7   :  { %5331 = vmatpush3.bf16.xpose.msra.mxu1 %v3317_v44 }
0x20d8   :  { %v3363_v29 = vsel %vm372_vm2, %v6778_v43, 0  ;;  %5342 = vmatprep.subr.bf16.mxu1 %v5922_v0 }
0x20d9   :  { %v3300_v37 = vpop.f32.mrb[84].mxu1  ;;  %5337 = vmatpush3.bf16.xpose.msra.mxu0 %v3363_v29 }
0x20da   :  { %v3301_v48 = vadd.f32 %v4758_v45, %v3300_v37  ;;  %v5328_v50 = vpop.f32.mrb[85].mxu1  ;;  %5348 = vmatprep.subr.bf16.mxu0 %v5922_v0 }
0x20db   :  { %v3303_v51 = vpop.f32.mrb[86].mxu1 }
0x20dc   :  { %v6788_v59 = vpack.c.bf16 %v3301_v48, %v3301_v48  ;;  %v3304_v55 = vadd.f32 %v4758_v45, %v3303_v51  ;;  %v5329_v57 = vpop.f32.mrb[87].mxu1 }
0x20de   :  { %v6792_v28 = vpack.c.bf16 %v3304_v55, %v3304_v55  ;;  %5333 = vmatmul.mubr.msk.bf16.vlgmr.msra.gmra.mrb[88].mxu1 %vm372_vm2, %v6786_v52  ;;  %v3435_v60 = vsel %vm494_vm3, %v6788_v59, 0 }
0x20df   :  { %5343 = vmatpush3.bf16.msra.mxu1 %v3435_v60  ;;  %5344 = vmatprep.mubr.msk.bf16.mxu1 %vm5923_vm0, %v5922_v0 }
0x20e0   :  { %5339 = vmatmul.mubr.msk.bf16.vlgmr.msra.gmra.mrb[100].mxu0 %vm372_vm2, %v6790_v56  ;;  %v3481_v61 = vsel %vm494_vm3, %v6792_v28, 0  ;;  %5354 = vmatprep.subr.bf16.mxu1 %v5922_v0 }
0x20e1   :  { %5349 = vmatpush3.bf16.msra.mxu0 %v3481_v61  ;;  %5350 = vmatprep.mubr.msk.bf16.mxu0 %vm5923_vm0, %v5922_v0 }
0x20e2   :  { %5360 = vmatprep.subr.bf16.mxu0 %v5922_v0 }
0x21b1   :  { %v3353_v63 = vpop.f32.mrb[88].mxu1 }
0x21b2   :  { %v3405_v1 = vmul.f32 0.35355338, %v3353_v63  ;;  %v5334_v2 = vpop.f32.mrb[89].mxu1 }
0x21b3   :  { %v3356_v5 = vpop.f32.mrb[90].mxu1  ;;  %v3399_v6 = vpop.f32.mrb[100].mxu0 }
0x21b4   :  { %v3406_v7 = vmul.f32 0.35355338, %v3399_v6  ;;  %v5335_v8 = vpop.f32.mrb[91].mxu1  ;;  %v5340_v10 = vpop.f32.mrb[101].mxu0  ;;  %v3407_v11 = vsel %vm372_vm2, %v3405_v1, -inf }
0x21b5   :  { %3408 = vmax.xlane.f32.xlu0 %v3407_v11  ;;  %v3402_v15 = vpop.f32.mrb[102].mxu0 }
0x21b6   :  { %v5341_v17 = vpop.f32.mrb[103].mxu0  ;;  %v3410_v20 = vsel %vm372_vm2, %v3406_v7, -inf }
0x21b7   :  { %3411 = vmax.xlane.f32.xlu1 %v3410_v20 }
0x21c8   :  { %3579 = vrot.lane.b32.xlu1 %v6778_v43, %s5924_s6 }
0x2242   :  { %v3409_v22 = vpop.xlane.xlu0 %3408 }
0x2243   :  { %v3413_v23 = vsub.f32 %v3405_v1, %v3409_v22 }
0x2244   :  { %v3412_v46 = vpop.xlane.xlu1 %3411 }
0x2245   :  { %v3415_v21 = vmul.f32 1.442695, %v3413_v23  ;;  %v3414_v49 = vsub.f32 %v3406_v7, %v3412_v46 }
0x2247   :  { %5660 = vpow2.f32 %v3415_v21  ;;  %v3417_v53 = vmul.f32 1.442695, %v3414_v49 }
0x2248   :  { %v3580_v27 = vpop.permute.xlu1 %3579 }
0x2249   :  { %5662 = vpow2.f32 %v3417_v53  ;;  %v3585_v40 = vsel %vm372_vm2, %v3580_v27, 0 }
0x2251   :  { %v5661_v54 = vpop.eup %5660 }
0x2252   :  { %v3419_v24 = vsel %vm372_vm2, %v5661_v54, 0.0 }
0x2253   :  { %v5663_v25 = vpop.eup %5662  ;;  %3420 = vadd.xlane.f32.xlu0 %v3419_v24 }
0x2254   :  { %v3422_v26 = vsel %vm372_vm2, %v5663_v25, 0.0 }
0x2255   :  { %3423 = vadd.xlane.f32.xlu1 %v3422_v26 }
0x2266   :  { %3524 = vrot.lane.b32.xlu1 %v6786_v52, %s5924_s6 }
0x2269   :  { %3527 = vrot.lane.b32.xlu0 %v6776_v13, %s5924_s6 }
0x226a   :  { %3576 = vrot.lane.b32.xlu1 %v6790_v56, %s5924_s6 }
0x22e0   :  { %v3421_v30 = vpop.xlane.xlu0 %3420 }
0x22e1   :  { %5664 = vrcp.f32 %v3421_v30 }
0x22e2   :  { %v3424_v58 = vpop.xlane.xlu1 %3423 }
0x22e3   :  { %5666 = vrcp.f32 %v3424_v58 }
0x22e4   :  { %v3528_v33 = vpop.permute.xlu0 %3527 }
0x22e5   :  { %v3533_v36 = vsel %vm372_vm2, %v3528_v33, 0 }
0x22e6   :  { %v3525_v3 = vpop.permute.xlu1 %3524 }
0x22ea   :  { %v3577_v4 = vpop.permute.xlu1 %3576 }
0x22eb   :  { %v5665_v12 = vpop.eup %5664 }
0x22ec   :  { %v3427_v18 = vmul.f32 %v5665_v12, %v5661_v54 }
0x22ed   :  { %v5667_v32 = vpop.eup %5666 }
0x22ee   :  { %v3428_v34 = vmul.f32 %v5667_v32, %v5663_v25  ;;  %v3429_v35 = vpack.c.bf16 %v3427_v18, %v3427_v18 }
0x22f0   :  { %5345 = vmatmul.mubr.msk.bf16.vlgmr.msra.gmra.mrb[92].mxu1 %vm372_vm2, %v3429_v35  ;;  %v3430_v39 = vpack.c.bf16 %v3428_v34, %v3428_v34 }
0x22f1   :  { %5355 = vmatpush3.bf16.xpose.msra.mxu1 %v3533_v36  ;;  %5356 = vmatprep.mubr.msk.bf16.mxu1 %vm5923_vm0, %v5922_v0 }
0x22f2   :  { %5351 = vmatmul.mubr.msk.bf16.vlgmr.msra.gmra.mrb[104].mxu0 %vm372_vm2, %v3430_v39  ;;  %5366 = vmatprep.subr.bf16.mxu1 %v5922_v0 }
0x22f3   :  { %5361 = vmatpush3.bf16.xpose.msra.mxu0 %v3585_v40  ;;  %5362 = vmatprep.mubr.msk.bf16.mxu0 %vm5923_vm0, %v5922_v0 }
0x22f4   :  { %5372 = vmatprep.subr.bf16.mxu0 %v5922_v0 }
0x22f8   :  { %5357 = vmatmul.mubr.msk.bf16.vlgmr.msra.gmra.mrb[96].mxu1 %vm372_vm2, %v3525_v3 }
0x22f9   :  { %5368 = vmatprep.mubr.msk.bf16.mxu1 %vm5923_vm0, %v5922_v0 }
0x22fa   :  { %5363 = vmatmul.mubr.msk.bf16.vlgmr.msra.gmra.mrb[108].mxu0 %vm372_vm2, %v3577_v4 }
0x22fb   :  { %5374 = vmatprep.mubr.msk.bf16.mxu0 %vm5923_vm0, %v5922_v0 }
0x23c3   :  { %v6836_v38 = vpop.f32.mrb[92].mxu1 }
0x23c4   :  { %v5346_v9 = vpop.f32.mrb[93].mxu1 }
0x23c5   :  { %v3474_v16 = vpop.f32.mrb[94].mxu1  ;;  %v6838_v14 = vpop.f32.mrb[104].mxu0 }
0x23c6   :  { %v5347_v41 = vpop.f32.mrb[95].mxu1  ;;  %v5352_v42 = vpop.f32.mrb[105].mxu0 }
0x23c7   :  { %v3520_v44 = vpop.f32.mrb[106].mxu0 }
0x23c8   :  { %v5353_v45 = vpop.f32.mrb[107].mxu0 }
0x23cb   :  { %v3569_v19 = vpop.f32.mrb[96].mxu1 }
0x23cc   :  { %v3627_v29 = vmul.f32 0.35355338, %v3569_v19  ;;  %v5358_v37 = vpop.f32.mrb[97].mxu1 }
0x23cd   :  { %v3572_v47 = vpop.f32.mrb[98].mxu1  ;;  %v3621_v48 = vpop.f32.mrb[108].mxu0 }
0x23ce   :  { %v3628_v50 = vmul.f32 0.35355338, %v3621_v48  ;;  %v5359_v51 = vpop.f32.mrb[99].mxu1  ;;  %v5364_v55 = vpop.f32.mrb[109].mxu0  ;;  %v3629_v57 = vsel %vm372_vm2, %v3627_v29, -inf }
0x23cf   :  { %3630 = vmax.xlane.f32.xlu0 %v3629_v57  ;;  %v3624_v60 = vpop.f32.mrb[110].mxu0 }
0x23d0   :  { %v5365_v61 = vpop.f32.mrb[111].mxu0  ;;  %v3632_v63 = vsel %vm372_vm2, %v3628_v50, -inf }
0x23d1   :  { %3633 = vmax.xlane.f32.xlu1 %v3632_v63 }
0x23e2   :  { %3703 = vrot.lane.b32.xlu1 %v6792_v28, %s5924_s6 }
0x23e6   :  { %3753 = vrot.lane.b32.xlu1 %v6776_v13, %s5925_s2 }
0x23ea   :  { %3803 = vrot.lane.b32.xlu1 %v6778_v43, %s5925_s2 }
0x23ee   :  { %3801 = vrot.lane.b32.xlu1 %v6790_v56, %s5925_s2 }
0x245c   :  { %v3631_v1 = vpop.xlane.xlu0 %3630 }
0x245d   :  { %v3635_v2 = vsub.f32 %v3627_v29, %v3631_v1 }
0x245e   :  { %v3634_v5 = vpop.xlane.xlu1 %3633 }
0x245f   :  { %v3637_v6 = vmul.f32 1.442695, %v3635_v2  ;;  %v3636_v7 = vsub.f32 %v3628_v50, %v3634_v5 }
0x2461   :  { %5668 = vpow2.f32 %v3637_v6  ;;  %v3639_v8 = vmul.f32 1.442695, %v3636_v7 }
0x2462   :  { %v3704_v10 = vpop.permute.xlu1 %3703 }
0x2463   :  { %5670 = vpow2.f32 %v3639_v8  ;;  %v3709_v11 = vsel %vm494_vm3, %v3704_v10, 0 }
0x2464   :  { %5373 = vmatpush3.bf16.msra.mxu0 %v3709_v11 }
0x2465   :  { %5384 = vmatprep.subr.bf16.mxu0 %v5922_v0 }
0x2466   :  { %v3754_v54 = vpop.permute.xlu1 %3753 }
0x2467   :  { %v3759_v58 = vsel %vm372_vm2, %v3754_v54, 0 }
0x246a   :  { %v3804_v30 = vpop.permute.xlu1 %3803 }
0x246b   :  { %v5669_v15 = vpop.eup %5668  ;;  %v3809_v18 = vsel %vm372_vm2, %v3804_v30, 0 }
0x246c   :  { %v3641_v17 = vsel %vm372_vm2, %v5669_v15, 0.0 }
0x246d   :  { %v5671_v20 = vpop.eup %5670  ;;  %3642 = vadd.xlane.f32.xlu0 %v3641_v17 }
0x246e   :  { %v3644_v22 = vsel %vm372_vm2, %v5671_v20, 0.0  ;;  %v3802_v33 = vpop.permute.xlu1 %3801 }
0x2471   :  { %3645 = vadd.xlane.f32.xlu0 %v3644_v22 }
0x2487   :  { %3654 = vrot.lane.b32.xlu0 %v6788_v59, %s5924_s6  ;;  %s5928_s6 = smov [#allocation16]  }
0x248b   :  { %3751 = vrot.lane.b32.xlu0 %v6786_v52, %s5925_s2 }
0x24fa   :  { %v3643_v23 = vpop.xlane.xlu0 %3642 }
0x24fb   :  { %5672 = vrcp.f32 %v3643_v23 }
0x24fe   :  { %v3646_v46 = vpop.xlane.xlu0 %3645 }
0x24ff   :  { %5674 = vrcp.f32 %v3646_v46 }
0x2502   :  { %v3655_v21 = vpop.permute.xlu0 %3654 }
0x2503   :  { %v3660_v49 = vsel %vm494_vm3, %v3655_v21, 0 }
0x2504   :  { %5367 = vmatpush3.bf16.msra.mxu1 %v3660_v49 }
0x2505   :  { %v5673_v53 = vpop.eup %5672  ;;  %5378 = vmatprep.subr.bf16.mxu1 %v5922_v0 }
0x2506   :  { %v3649_v24 = vmul.f32 %v5673_v53, %v5669_v15  ;;  %v3752_v32 = vpop.permute.xlu0 %3751 }
0x2508   :  { %v3651_v25 = vpack.c.bf16 %v3649_v24, %v3649_v24 }
0x2509   :  { %v5675_v26 = vpop.eup %5674 }
0x250a   :  { %v3650_v27 = vmul.f32 %v5675_v26, %v5671_v20  ;;  %5369 = vmatmul.mubr.msk.bf16.vlgmr.msra.gmra.mrb[100].mxu1 %vm372_vm2, %v3651_v25 }
0x250b   :  { %5380 = vmatprep.mubr.msk.bf16.mxu1 %vm5923_vm0, %v5922_v0 }
0x250c   :  { %v3652_v12 = vpack.c.bf16 %v3650_v27, %v3650_v27 }
0x250d   :  { %5379 = vmatpush3.bf16.xpose.msra.mxu1 %v3759_v58 }
0x250e   :  { %5375 = vmatmul.mubr.msk.bf16.vlgmr.msra.gmra.mrb[112].mxu0 %vm372_vm2, %v3652_v12  ;;  %5390 = vmatprep.subr.bf16.mxu1 %v5922_v0 }
0x250f   :  { %5385 = vmatpush3.bf16.xpose.msra.mxu0 %v3809_v18  ;;  %5386 = vmatprep.mubr.msk.bf16.mxu0 %vm5923_vm0, %v5922_v0 }
0x2510   :  { %5396 = vmatprep.subr.bf16.mxu0 %v5922_v0 }
0x2514   :  { %5381 = vmatmul.mubr.msk.bf16.vlgmr.msra.gmra.mrb[104].mxu1 %vm372_vm2, %v3752_v32 }
0x2515   :  { %5392 = vmatprep.mubr.msk.bf16.mxu1 %vm5923_vm0, %v5922_v0 }
0x2516   :  { %5387 = vmatmul.mubr.msk.bf16.vlgmr.msra.gmra.mrb[116].mxu0 %vm372_vm2, %v3802_v33 }
0x2517   :  { %5398 = vmatprep.mubr.msk.bf16.mxu0 %vm5923_vm0, %v5922_v0 }
0x25dd   :  { %v6876_v34 = vpop.f32.mrb[100].mxu1 }
0x25de   :  { %v5370_v35 = vpop.f32.mrb[101].mxu1 }
0x25df   :  { %v3699_v36 = vpop.f32.mrb[102].mxu1 }
0x25e0   :  { %v5371_v39 = vpop.f32.mrb[103].mxu1 }
0x25e1   :  { %v6878_v40 = vpop.f32.mrb[112].mxu0 }
0x25e2   :  { %v5511_v3 = vpack.i.bf16 %v6878_v40, %v6876_v34  ;;  %v5376_v4 = vpop.f32.mrb[113].mxu0 }
0x25e3   :  { %v3748_v9 = vpop.f32.mrb[114].mxu0 }
0x25e4   :  { %v5377_v16 = vpop.f32.mrb[115].mxu0 }
0x25e7   :  { %v3795_v41 = vpop.f32.mrb[104].mxu1 }
0x25e8   :  { %v3851_v42 = vmul.f32 0.35355338, %v3795_v41  ;;  %v5382_v44 = vpop.f32.mrb[105].mxu1 }
0x25e9   :  { %v3798_v45 = vpop.f32.mrb[106].mxu1  ;;  %v3845_v19 = vpop.f32.mrb[116].mxu0 }
0x25ea   :  { %v3852_v29 = vmul.f32 0.35355338, %v3845_v19  ;;  %v5383_v37 = vpop.f32.mrb[107].mxu1  ;;  %v5388_v47 = vpop.f32.mrb[117].mxu0  ;;  %v3853_v48 = vsel %vm372_vm2, %v3851_v42, -inf }
0x25eb   :  { %3854 = vmax.xlane.f32.xlu0 %v3853_v48  ;;  %v3848_v50 = vpop.f32.mrb[118].mxu0 }
0x25ec   :  { %v5389_v51 = vpop.f32.mrb[119].mxu0  ;;  %v3856_v55 = vsel %vm372_vm2, %v3852_v29, -inf }
0x25ed   :  { %3857 = vmax.xlane.f32.xlu1 %v3856_v55 }
0x25fe   :  { %3925 = vrot.lane.b32.xlu1 %v6792_v28, %s5925_s2 }
0x2602   :  { %3975 = vrot.lane.b32.xlu1 %v6776_v13, %s5926_s23 }
0x2606   :  { %4025 = vrot.lane.b32.xlu1 %v6778_v43, %s5926_s23 }
0x260a   :  { %4023 = vrot.lane.b32.xlu1 %v6790_v56, %s5926_s23 }
0x2678   :  { %v3855_v57 = vpop.xlane.xlu0 %3854 }
0x2679   :  { %v3859_v60 = vsub.f32 %v3851_v42, %v3855_v57 }
0x267a   :  { %v3858_v61 = vpop.xlane.xlu1 %3857 }
0x267b   :  { %v3861_v63 = vmul.f32 1.442695, %v3859_v60  ;;  %v3860_v1 = vsub.f32 %v3852_v29, %v3858_v61 }
0x267d   :  { %5676 = vpow2.f32 %v3861_v63  ;;  %v3863_v2 = vmul.f32 1.442695, %v3860_v1 }
0x267e   :  { %v3926_v5 = vpop.permute.xlu1 %3925 }
0x267f   :  { %5678 = vpow2.f32 %v3863_v2  ;;  %v3931_v6 = vsel %vm494_vm3, %v3926_v5, 0 }
0x2680   :  { %5397 = vmatpush3.bf16.msra.mxu0 %v3931_v6 }
0x2681   :  { %5408 = vmatprep.subr.bf16.mxu0 %v5922_v0 }
0x2682   :  { %v3976_v20 = vpop.permute.xlu1 %3975 }
0x2686   :  { %v4026_v49 = vpop.permute.xlu1 %4025 }
0x2687   :  { %v5677_v13 = vpop.eup %5676  ;;  %v4031_v54 = vsel %vm372_vm2, %v4026_v49, 0 }
0x2688   :  { %v3865_v43 = vsel %vm372_vm2, %v5677_v13, 0.0 }
0x2689   :  { %v5679_v7 = vpop.eup %5678  ;;  %3866 = vadd.xlane.f32.xlu0 %v3865_v43 }
0x268a   :  { %v3868_v56 = vsel %vm372_vm2, %v5679_v7, 0.0  ;;  %v4024_v25 = vpop.permute.xlu1 %4023 }
0x268d   :  { %3869 = vadd.xlane.f32.xlu0 %v3868_v56 }
0x26a3   :  { %3877 = vrot.lane.b32.xlu0 %v6788_v59, %s5925_s2 }
0x26a7   :  { %3973 = vrot.lane.b32.xlu0 %v6786_v52, %s5926_s23  ;;  %v3981_v52 = vsel %vm372_vm2, %v3976_v20, 0 }
0x2716   :  { %v3867_v8 = vpop.xlane.xlu0 %3866 }
0x2717   :  { %5680 = vrcp.f32 %v3867_v8  ;;  %v5568_v8 = vld [vmem:[%s7043_s7 + $0x20] sm:$0xff]  }
0x271a   :  { %v3870_v10 = vpop.xlane.xlu0 %3869 }
0x271b   :  { %5682 = vrcp.f32 %v3870_v10  ;;  %v5569_v10 = vld [vmem:[%s7043_s7 + $0x28] sm:$0xff]   ;;  %s4585_s7 = sshll.u32 %s5928_s6, 4  ;;  %s4586_s7 = int_to_ptr.vmem [resolvable:$true] %s4585_s7 }
0x271c   :  { %s5876_s2 = scalar_lea.vmem %s4586_s7, 256  ;;  %p5881_p9 = scmp.lt.s32.totalorder %s4586_s7, %s4586_s7 }
0x271d   :  { %p5877_p8 = scmp.ne.s32.totalorder %s4586_s7, %s5876_s2  ;;  %p5882_p10 = scmp.lt.s32.totalorder %s5876_s2, %s5876_s2 }
0x271e   :  { %v3878_v11 = vpop.permute.xlu0 %3877 }
0x271f   :  { %v3883_v15 = vsel %vm494_vm3, %v3878_v11, 0  ;;  %p5883_p11 = por %p5882_p10, %p5881_p9 }
0x2720   :  { %5391 = vmatpush3.bf16.msra.mxu1 %v3883_v15 }
0x2721   :  { %v5681_v17 = vpop.eup %5680  ;;  %5402 = vmatprep.subr.bf16.mxu1 %v5922_v0  ;;  %p5884_p12 = pnand %p5883_p11, %p5877_p8 }
0x2722   :  { %v3873_v22 = vmul.f32 %v5681_v17, %v5677_v13  ;;  %v3974_v24 = vpop.permute.xlu0 %3973 }
0x2724   :  { %v3875_v23 = vpack.c.bf16 %v3873_v22, %v3873_v22 }
0x2725   :  { %v5683_v46 = vpop.eup %5682 }
0x2726   :  { %v3874_v21 = vmul.f32 %v5683_v46, %v5679_v7  ;;  %5393 = vmatmul.mubr.msk.bf16.vlgmr.msra.gmra.mrb[108].mxu1 %vm372_vm2, %v3875_v23 }
0x2727   :  { %5404 = vmatprep.mubr.msk.bf16.mxu1 %vm5923_vm0, %v5922_v0 }
0x2728   :  { %v3876_v53 = vpack.c.bf16 %v3874_v21, %v3874_v21 }
0x2729   :  { %5403 = vmatpush3.bf16.xpose.msra.mxu1 %v3981_v52 }
0x272a   :  { %5399 = vmatmul.mubr.msk.bf16.vlgmr.msra.gmra.mrb[120].mxu0 %vm372_vm2, %v3876_v53  ;;  %5414 = vmatprep.subr.bf16.mxu1 %v5922_v0 }
0x272b   :  { %5409 = vmatpush3.bf16.xpose.msra.mxu0 %v4031_v54  ;;  %5410 = vmatprep.mubr.msk.bf16.mxu0 %vm5923_vm0, %v5922_v0 }
0x272c   :  { %5420 = vmatprep.subr.bf16.mxu0 %v5922_v0 }
0x2730   :  { %5405 = vmatmul.mubr.msk.bf16.vlgmr.msra.gmra.mrb[112].mxu1 %vm372_vm2, %v3974_v24 }
0x2731   :  { %5416 = vmatprep.mubr.msk.bf16.mxu1 %vm5923_vm0, %v5922_v0 }
0x2732   :  { %5411 = vmatmul.mubr.msk.bf16.vlgmr.msra.gmra.mrb[124].mxu0 %vm372_vm2, %v4024_v25 }
0x2733   :  { %5422 = vmatprep.mubr.msk.bf16.mxu0 %vm5923_vm0, %v5922_v0 }
0x27f9   :  { %v3919_v26 = vpop.f32.mrb[108].mxu1 }
0x27fa   :  { %v5394_v27 = vpop.f32.mrb[109].mxu1 }
0x27fb   :  { %v3922_v30 = vpop.f32.mrb[110].mxu1 }
0x27fc   :  { %v5395_v58 = vpop.f32.mrb[111].mxu1 }
0x27fd   :  { %v3967_v12 = vpop.f32.mrb[120].mxu0 }
0x27fe   :  { %v5516_v18 = vpack.i.bf16 %v3967_v12, %v3919_v26  ;;  %v5400_v32 = vpop.f32.mrb[121].mxu0 }
0x27ff   :  { %v3970_v33 = vpop.f32.mrb[122].mxu0 }
0x2800   :  { %v5401_v35 = vpop.f32.mrb[123].mxu0 }
0x2803   :  { %v4017_v36 = vpop.f32.mrb[112].mxu1 }
0x2804   :  { %v4073_v39 = vmul.f32 0.35355338, %v4017_v36  ;;  %v5406_v4 = vpop.f32.mrb[113].mxu1 }
0x2805   :  { %v4020_v9 = vpop.f32.mrb[114].mxu1  ;;  %v4067_v16 = vpop.f32.mrb[124].mxu0 }
0x2806   :  { %v4074_v41 = vmul.f32 0.35355338, %v4067_v16  ;;  %v5407_v42 = vpop.f32.mrb[115].mxu1  ;;  %v5412_v44 = vpop.f32.mrb[125].mxu0  ;;  %v4075_v45 = vsel %vm372_vm2, %v4073_v39, -inf }
0x2807   :  { %4076 = vmax.xlane.f32.xlu0 %v4075_v45  ;;  %v4070_v19 = vpop.f32.mrb[126].mxu0 }
0x2808   :  { %v5413_v29 = vpop.f32.mrb[127].mxu0  ;;  %v4078_v37 = vsel %vm372_vm2, %v4074_v41, -inf }
0x2809   :  { %4079 = vmax.xlane.f32.xlu1 %v4078_v37 }
0x281a   :  { %4147 = vrot.lane.b32.xlu1 %v6792_v28, %s5926_s23 }
0x281e   :  { %5512 = vrot.lane.b32.xlu1 %v5511_v3, %s5917_s28 }
0x2822   :  { %5517 = vrot.lane.b32.xlu1 %v5516_v18, %s5911_s20 }
0x2894   :  { %v4077_v47 = vpop.xlane.xlu0 %4076 }
0x2895   :  { %v4081_v48 = vsub.f32 %v4073_v39, %v4077_v47 }
0x2896   :  { %v4080_v50 = vpop.xlane.xlu1 %4079 }
0x2897   :  { %v4083_v51 = vmul.f32 1.442695, %v4081_v48  ;;  %v4082_v55 = vsub.f32 %v4074_v41, %v4080_v50 }
0x2899   :  { %5684 = vpow2.f32 %v4083_v51  ;;  %v4085_v57 = vmul.f32 1.442695, %v4082_v55 }
0x289a   :  { %v4148_v60 = vpop.permute.xlu1 %4147 }
0x289b   :  { %5686 = vpow2.f32 %v4085_v57  ;;  %v4153_v61 = vsel %vm494_vm3, %v4148_v60, 0 }
0x289c   :  { %5421 = vmatpush3.bf16.msra.mxu0 %v4153_v61 }
0x289d   :  { %5434 = vmatprep.subr.bf16.mxu0 %v5922_v0 }
0x289e   :  { %v5513_v52 = vpop.permute.xlu1 %5512 }
0x289f   :  { %v5515_v54 = vunpack.i.h.bf16 %v5513_v52  ;;  %v5514_v24 = vunpack.i.l.bf16 %v5513_v52  ;;  %v5579_v52 = vld [vmem:[%s7049_s13 + $0xb8] sm:$0xff]  }
0x28a1   :  { %v4220_v30 = vsel %vm372_vm2, %v6838_v14, %v5515_v54  ;;  %v4219_v58 = vsel %vm372_vm2, %v6836_v38, %v5514_v24  ;;  %v4782_v14 = vld [vmem:[#allocation10 + $0x2] ss:$0 sm:$0xff] }
0x28a2   :  { %v5518_v53 = vpop.permute.xlu1 %5517 }
0x28a3   :  { %v5685_v28 = vpop.eup %5684  ;;  %v5520_v25 = vunpack.i.h.bf16 %v5518_v53  ;;  %v5519_v26 = vunpack.i.l.bf16 %v5518_v53  ;;  %v4792_v53 = vld [vmem:[#allocation14 + $0x2] ss:$0 sm:$0xff] }
0x28a4   :  { %v4087_v34 = vsel %vm372_vm2, %v5685_v28, 0.0 }
0x28a5   :  { %v5687_v40 = vpop.eup %5686  ;;  %4088 = vadd.xlane.f32.xlu0 %v4087_v34  ;;  %v4221_v32 = vsel %vm1282_vm4, %v4219_v58, %v5519_v26  ;;  %v4222_v33 = vsel %vm1282_vm4, %v4220_v30, %v5520_v25  ;;  %v5572_v34 = vld [vmem:[%s7049_s13 + $0x80] sm:$0xff]  }
0x28a6   :  { %v4090_v3 = vsel %vm372_vm2, %v5687_v40, 0.0 }
0x28a9   :  { %4091 = vadd.xlane.f32.xlu0 %v4090_v3  ;;  %v5574_v3 = vld [vmem:[%s7049_s13 + $0x90] sm:$0xff]  }
0x28bf   :  { %4099 = vrot.lane.b32.xlu0 %v6788_v59, %s5926_s23 }
0x2932   :  { %v4089_v63 = vpop.xlane.xlu0 %4088 }
0x2933   :  { %5688 = vrcp.f32 %v4089_v63  ;;  %v5575_v63 = vld [vmem:[%s7049_s13 + $0x98] sm:$0xff]  }
0x2936   :  { %v4092_v1 = vpop.xlane.xlu0 %4091 }
0x2937   :  { %5690 = vrcp.f32 %v4092_v1  ;;  %v5576_v1 = vld [vmem:[%s7049_s13 + $0xa0] sm:$0xff]  }
0x293a   :  { %v4100_v2 = vpop.permute.xlu0 %4099 }
0x293b   :  { %v4105_v5 = vsel %vm494_vm3, %v4100_v2, 0  ;;  %v5577_v2 = vld [vmem:[%s7049_s13 + $0xa8] sm:$0xff]  }
0x293c   :  { %5415 = vmatpush3.bf16.msra.mxu1 %v4105_v5 }
0x293d   :  { %v5689_v6 = vpop.eup %5688  ;;  %5426 = vmatprep.subr.bf16.mxu1 %v5922_v0 }
0x293e   :  { %v4095_v13 = vmul.f32 %v5689_v6, %v5685_v28  ;;  %v5571_v28 = vld [vmem:[%s7047_s11 + $0x28] sm:$0xff]  }
0x2940   :  { %v4097_v43 = vpack.c.bf16 %v4095_v13, %v4095_v13 }
0x2941   :  { %v5691_v7 = vpop.eup %5690 }
0x2942   :  { %v4096_v56 = vmul.f32 %v5691_v7, %v5687_v40  ;;  %5417 = vmatmul.mubr.msk.bf16.vlgmr.msra.gmra.mrb[116].mxu1 %vm372_vm2, %v4097_v43  ;;  %v5573_v40 = vld [vmem:[%s7049_s13 + $0x88] sm:$0xff]  }
0x2943   :  { %5430 = vmatprep.mubr.msk.bf16.mxu1 %vm5923_vm0, %v5922_v0  ;;  %5427 = vmatpush3.bf16.msra.mxu1 %v5568_v8 }
0x2944   :  { %v4098_v59 = vpack.c.bf16 %v4096_v56, %v4096_v56  ;;  %5428 = vmatprep.subr.bf16.mxu1 %v5922_v0 }
0x2946   :  { %5423 = vmatmul.mubr.msk.bf16.vlgmr.msra.gmra.mrb[128].mxu0 %vm372_vm2, %v4098_v59 }
0x2947   :  { %5438 = vmatprep.mubr.msk.bf16.mxu0 %vm5923_vm0, %v5922_v0  ;;  %5429 = vmatpush3.bf16.msra.mxu1 %v5569_v10  ;;  %v4786_v10 = vld [vmem:[#allocation11 + $0x2] ss:$0 sm:$0xff] }
0x2948   :  { %5442 = vmatprep.subr.bf16.mxu1 %v5922_v0 }
0x2a15   :  { %v4141_v11 = vpop.f32.mrb[116].mxu1 }
0x2a16   :  { %v5418_v15 = vpop.f32.mrb[117].mxu1 }
0x2a17   :  { %v4144_v17 = vpop.f32.mrb[118].mxu1 }
0x2a18   :  { %v5419_v20 = vpop.f32.mrb[119].mxu1 }
0x2a19   :  { %v4189_v22 = vpop.f32.mrb[128].mxu0  ;;  %v4787_v20 = vld [vmem:[#allocation13 + $0x2] ss:$0 sm:$0xff] }
0x2a1a   :  { %v5521_v23 = vpack.i.bf16 %v4189_v22, %v4141_v11  ;;  %v5424_v46 = vpop.f32.mrb[129].mxu0 }
0x2a1b   :  { %v4192_v21 = vpop.f32.mrb[130].mxu0 }
0x2a1c   :  { %5522 = vrot.lane.b32.xlu0 %v5521_v23, %s5927_s12  ;;  %v5425_v49 = vpop.f32.mrb[131].mxu0 }
0x2a1d   :  { %v5578_v49 = vld [vmem:[%s7049_s13 + $0xb0] sm:$0xff]  }
0x2a8e   :  { %v5523_v27 = vpop.permute.xlu0 %5522 }
0x2a8f   :  { %v5525_v12 = vunpack.i.h.bf16 %v5523_v27  ;;  %v5524_v18 = vunpack.i.l.bf16 %v5523_v27 }
0x2a91   :  { %v4224_v35 = vsel %vm1285_vm5, %v4222_v33, %v5525_v12  ;;  %v4223_v36 = vsel %vm1285_vm5, %v4221_v32, %v5524_v18 }
0x2a92   :  { %v4225_v39 = vpack.c.bf16 %v4224_v35, %v4223_v36 }
0x2a94   :  { %5431 = vmatmul.mubr.msk.bf16.vlgmr.msra.gmra.mrb[120].mxu1 %vm193_vm1, %v4225_v39 }
0x2a95   :  { %5458 = vmatprep.mubr.msk.bf16.mxu1 %vm5923_vm0, %v5922_v0  ;;  %5443 = vmatpush3.bf16.msra.mxu1 %v5572_v34 }
0x2a96   :  { %5444 = vmatprep.subr.bf16.mxu1 %v5922_v0 }
0x2a99   :  { %5445 = vmatpush3.bf16.msra.mxu1 %v5573_v40 }
0x2a9a   :  { %5446 = vmatprep.subr.bf16.mxu1 %v5922_v0 }
0x2a9d   :  { %5447 = vmatpush3.bf16.msra.mxu1 %v5574_v3  ;;  %v4825_v3 = vld [vmem:[%s7052_s16 + $0x2] ss:$0 sm:$0xff] }
0x2a9e   :  { %5448 = vmatprep.subr.bf16.mxu1 %v5922_v0 }
0x2aa1   :  { %5449 = vmatpush3.bf16.msra.mxu1 %v5575_v63 }
0x2aa2   :  { %5450 = vmatprep.subr.bf16.mxu1 %v5922_v0 }
0x2aa5   :  { %5451 = vmatpush3.bf16.msra.mxu1 %v5576_v1 }
0x2aa6   :  { %5452 = vmatprep.subr.bf16.mxu1 %v5922_v0 }
0x2aa9   :  { %5453 = vmatpush3.bf16.msra.mxu1 %v5577_v2 }
0x2aaa   :  { %5454 = vmatprep.subr.bf16.mxu1 %v5922_v0 }
0x2aad   :  { %5455 = vmatpush3.bf16.msra.mxu1 %v5578_v49 }
0x2aae   :  { %5456 = vmatprep.subr.bf16.mxu1 %v5922_v0 }
0x2ab1   :  { %5457 = vmatpush3.bf16.msra.mxu1 %v5579_v52 }
0x2b67   :  { %v4288_v4 = vpop.f32.mrb[120].mxu1 }
0x2b68   :  { %v4289_v9 = vadd.f32 %v4782_v14, %v4288_v4  ;;  %v5432_v38 = vpop.f32.mrb[121].mxu1 }
0x2b69   :  { %v4291_v16 = vpop.f32.mrb[122].mxu1 }
0x2b6a   :  { %v4295_v41 = vadd.f32 %v4289_v9, %v6745_v62  ;;  %v4292_v42 = vadd.f32 %v4782_v14, %v4291_v16  ;;  %v5433_v44 = vpop.f32.mrb[123].mxu1 }
0x2b6c   :  { %v4296_v45 = vadd.f32 %v4292_v42, %v6747_v31  ;;  %v4301_v19 = vsel %vm193_vm1, %v4295_v41, 0.0  ;;  %v5570_v31 = vld [vmem:[%s7047_s11 + $0x20] sm:$0xff]  }
0x2b6d   :  { %4302 = vadd.xlane.f32.xlu1 %v4301_v19  ;;  %5435 = vmatpush3.bf16.msra.mxu0 %v5570_v31 }
0x2b6e   :  { %v4304_v29 = vsel %vm193_vm1, %v4296_v45, 0.0  ;;  %5436 = vmatprep.subr.bf16.mxu0 %v5922_v0  ;;  %v4813_v0 = vld [vmem:[%s7050_s14 + $0x2] ss:$0 sm:$0xff] }
0x2b6f   :  { %4305 = vadd.xlane.f32.xlu0 %v4304_v29 }
0x2b71   :  { %5437 = vmatpush3.bf16.msra.mxu0 %v5571_v28  ;;  %v4824_v28 = vld [vmem:[%s7051_s15 + $0x2] ss:$0 sm:$0xff] }
0x2bfa   :  { %v4303_v37 = vpop.xlane.xlu1 %4302 }
0x2bfb   :  { %v4307_v47 = vmul.f32 0.03125, %v4303_v37 }
0x2bfc   :  { %v4306_v48 = vpop.xlane.xlu0 %4305 }
0x2bfd   :  { %v4309_v50 = vsub.f32 %v4295_v41, %v4307_v47  ;;  %v4308_v51 = vmul.f32 0.03125, %v4306_v48 }
0x2bff   :  { %v4310_v55 = vsub.f32 %v4296_v45, %v4308_v51  ;;  %v4311_v57 = vmul.f32 %v4309_v50, %v4309_v50 }
0x2c01   :  { %v4313_v60 = vsel %vm193_vm1, %v4311_v57, 0.0  ;;  %v4312_v62 = vmul.f32 %v4310_v55, %v4310_v55 }
0x2c02   :  { %4314 = vadd.xlane.f32.xlu0 %v4313_v60 }
0x2c03   :  { %v4316_v61 = vsel %vm193_vm1, %v4312_v62, 0.0 }
0x2c06   :  { %4317 = vadd.xlane.f32.xlu0 %v4316_v61 }
0x2c8f   :  { %v4315_v5 = vpop.xlane.xlu0 %4314 }
0x2c90   :  { %v4319_v6 = vmul.f32 0.03125, %v4315_v5 }
0x2c92   :  { %v4321_v13 = vadd.f32 1e-05, %v4319_v6 }
0x2c93   :  { %v4318_v43 = vpop.xlane.xlu0 %4317 }
0x2c94   :  { %5692 = vrsqrt.f32 %v4321_v13  ;;  %v4320_v7 = vmul.f32 0.03125, %v4318_v43 }
0x2c96   :  { %v4322_v56 = vadd.f32 1e-05, %v4320_v7 }
0x2c98   :  { %5694 = vrsqrt.f32 %v4322_v56 }
0x2c9e   :  { %v5693_v59 = vpop.eup %5692 }
0x2c9f   :  { %v4325_v8 = vmul.f32 %v5693_v59, %v4309_v50 }
0x2ca1   :  { %v4333_v15 = vmul.f32 %v4786_v10, %v4325_v8 }
0x2ca2   :  { %v5695_v11 = vpop.eup %5694 }
0x2ca3   :  { %v4326_v17 = vmul.f32 %v5695_v11, %v4310_v55  ;;  %v4341_v23 = vadd.f32 %v4787_v20, %v4333_v15 }
0x2ca5   :  { %v4334_v22 = vmul.f32 %v4786_v10, %v4326_v17 }
0x2ca7   :  { %v4342_v46 = vadd.f32 %v4787_v20, %v4334_v22 }
0x2ca9   :  { %v4343_v21 = vpack.c.bf16 %v4342_v46, %v4341_v23 }
0x2cab   :  { %5439 = vmatmul.mubr.msk.bf16.vlgmr.msra.gmra.mrb[132].mxu0 %vm193_vm1, %v4343_v21 }
0x2d7e   :  { %v4406_v54 = vpop.f32.mrb[132].mxu0 }
0x2d7f   :  { %v4407_v24 = vadd.f32 %v4792_v53, %v4406_v54  ;;  %v5440_v25 = vpop.f32.mrb[133].mxu0 }
0x2d80   :  { %v4409_v26 = vpop.f32.mrb[134].mxu0 }
0x2d81   :  { %v4410_v27 = vadd.f32 %v4792_v53, %v4409_v26  ;;  %v5441_v30 = vpop.f32.mrb[135].mxu0  ;;  %v4413_v58 = vmax.f32 %v4407_v24, 0.0 }
0x2d83   :  { %v4414_v12 = vmax.f32 %v4410_v27, 0.0 }
0x2d85   :  { %v4415_v18 = vpack.c.bf16 %v4414_v12, %v4413_v58 }
0x2d87   :  { %5459 = vmatmul.mubr.bf16.vlgmr.msra.gmra.mrb[124].mxu1 %v4415_v18 }
0x2e5a   :  { %v4523_v32 = vpop.f32.mrb[124].mxu1 }
0x2e5b   :  { %v4524_v33 = vadd.f32 %v4813_v0, %v4523_v32  ;;  %v5460_v35 = vpop.f32.mrb[125].mxu1 }
0x2e5c   :  { %v4526_v36 = vpop.f32.mrb[126].mxu1 }
0x2e5d   :  { %v4530_v39 = vadd.f32 %v4524_v33, %v4341_v23  ;;  %v4527_v14 = vadd.f32 %v4813_v0, %v4526_v36  ;;  %v5461_v4 = vpop.f32.mrb[127].mxu1 }
0x2e5f   :  { %v4531_v9 = vadd.f32 %v4527_v14, %v4342_v46  ;;  %v4536_v38 = vsel %vm193_vm1, %v4530_v39, 0.0 }
0x2e60   :  { %4537 = vadd.xlane.f32.xlu1 %v4536_v38 }
0x2e61   :  { %v4539_v16 = vsel %vm193_vm1, %v4531_v9, 0.0 }
0x2e62   :  { %4540 = vadd.xlane.f32.xlu0 %v4539_v16 }
0x2eed   :  { %v4538_v41 = vpop.xlane.xlu1 %4537 }
0x2eee   :  { %v4542_v42 = vmul.f32 0.03125, %v4538_v41 }
0x2eef   :  { %v4541_v44 = vpop.xlane.xlu0 %4540 }
0x2ef0   :  { %v4544_v45 = vsub.f32 %v4530_v39, %v4542_v42  ;;  %v4543_v19 = vmul.f32 0.03125, %v4541_v44 }
0x2ef2   :  { %v4545_v29 = vsub.f32 %v4531_v9, %v4543_v19  ;;  %v4546_v37 = vmul.f32 %v4544_v45, %v4544_v45 }
0x2ef4   :  { %v4548_v47 = vsel %vm193_vm1, %v4546_v37, 0.0  ;;  %v4547_v48 = vmul.f32 %v4545_v29, %v4545_v29 }
0x2ef5   :  { %4549 = vadd.xlane.f32.xlu1 %v4548_v47 }
0x2ef6   :  { %v4551_v50 = vsel %vm193_vm1, %v4547_v48, 0.0 }
0x2ef7   :  { %4552 = vadd.xlane.f32.xlu0 %v4551_v50 }
0x2f82   :  { %v4550_v51 = vpop.xlane.xlu1 %4549 }
0x2f83   :  { %v4554_v55 = vmul.f32 0.03125, %v4550_v51 }
0x2f84   :  { %v4553_v57 = vpop.xlane.xlu0 %4552 }
0x2f85   :  { %v4556_v60 = vadd.f32 1e-05, %v4554_v55  ;;  %v4555_v62 = vmul.f32 0.03125, %v4553_v57 }
0x2f87   :  { %5696 = vrsqrt.f32 %v4556_v60  ;;  %v4557_v61 = vadd.f32 1e-05, %v4555_v62 }
0x2f89   :  { %5698 = vrsqrt.f32 %v4557_v61 }
0x2f91   :  { %v5697_v31 = vpop.eup %5696 }
0x2f92   :  { %v4560_v34 = vmul.f32 %v5697_v31, %v4544_v45 }
0x2f93   :  { %v5699_v40 = vpop.eup %5698 }
0x2f94   :  { %v4561_v63 = vmul.f32 %v5699_v40, %v4545_v29  ;;  %v4568_v1 = vmul.f32 %v4824_v28, %v4560_v34 }
0x2f96   :  { %v4569_v2 = vmul.f32 %v4824_v28, %v4561_v63  ;;  %v4576_v5 = vadd.f32 %v4825_v3, %v4568_v1 }
0x2f98   :  { %v4577_v6 = vadd.f32 %v4825_v3, %v4569_v2  ;;  %4578 = vst.msk [vmem:[#allocation16] sm:$0xff] %vm193_vm1, %v4576_v5 }
0x2f9a   :  { %4579 = vst.msk [vmem:[#allocation16 + $0x8] sm:$0xff] %vm193_vm1, %v4577_v6 }
0x2f9b   :  { %5887 = shalt.err (!%p5884_p12)
}
0x2f9c   :  { %s7062_s23 = sld [smem:[#allocation25_spill]] }
0x2fa2   :  { %s5888_s12 = scalar_lea.hbm %s7062_s23, 256 }
0x2fa3   :  { %p5889_p13 = scmp.ne.s32.totalorder %s7062_s23, %s5888_s12  ;;  %p5892_p0 = scmp.lt.u32.totalorder %s5888_s12, %s7062_s23 }
0x2fa5   :  { %p5894_p1 = pnand %p5892_p0, %p5889_p13 }
0x2fa7   :  { %5897 = shalt.err (!%p5894_p1)
}
0x2fa8   :  { %4591 = dma.vmem_to_hbm [thread:$0]  %s4586_s7, 256, %s7062_s23, [#allocation4], %s5916_s9, %s5916_s9, %s5917_s28  }
0x2fa9   :  { %5908 = dma.done.wait [#allocation4], 256  }
0x2faa   :  { %5909 = vsyncadd [#allocation4], 4294967040 }
0x2fab   :  { %4595 = vsyncpa [#allocation3], 1 }
0x2fac   :  { %4596 = vsyncpa [#allocation6], 1 }
0x2fad   :  { %4597 = vsyncpa [#allocation9], 1 }
0x2fae   :  { %4598 = vsyncpa [#allocation12], 1 }
0x2faf   :  { %4599 = vsyncpa [#allocation15], 1 }
0x2fb0   :  { %4600 = vsyncpa [#allocation4], 1 }

</bundles_post_ra>
